<compile_context>
chip_gen: v7x
topology: tpu7x:2x2x1
jax: 0.10.0
libtpu: 0.0.40
codegen_flags: <defaults>
</compile_context>

<pallas_src>
import functools
import math

import jax
import jax.numpy as jnp
from jax.experimental import pallas as pl
from jax.experimental.pallas import tpu as pltpu

D_MODEL = 32
HEADS = 4
D_HEAD = D_MODEL // HEADS
D_FFN = 2048
N_BLOCK = 2
LN_EPS = 1e-5

_REFS_PER_BLOCK = 5  # mat slab, vec slab, w1 (bf16), w2 (bf16), b1


# ----------------------------- kernel-side helpers -----------------------------

def _layernorm(y, gamma, beta):
    mu = jnp.mean(y, axis=-1, keepdims=True)
    var = jnp.mean((y - mu) ** 2, axis=-1, keepdims=True)
    return (y - mu) * jax.lax.rsqrt(var + LN_EPS) * gamma + beta


def _mha(q_src, kv_src, kmask, Bc, Sq, Sk, wqkv, bqkv, wo, bo, self_attn):
    """Multi-head attention, batched over the whole (local) batch.

    q_src:  (Bc*Sq, D) flattened query tokens.
    kv_src: (Bc*Sk, D) flattened (zero-padded) key/value tokens.
    kmask:  (1, 1, Sk) additive key mask (0 for valid, -1e9 for padded keys).
    wqkv:   (D, 3D) fused [Wq*scale | Wk | Wv]; bqkv: (1, 3D) fused biases.
    wo/bo:  (D, D) / (1, D) output projection.
    """
    if self_attn:
        # Single fused projection for Q, K, V (q_src == kv_src).
        qkv = jnp.dot(q_src, wqkv, preferred_element_type=jnp.float32) + bqkv
        q = qkv[:, 0:D_MODEL]
        k = qkv[:, D_MODEL:2 * D_MODEL]
        v = qkv[:, 2 * D_MODEL:3 * D_MODEL]
    else:
        # Q from the decoder stream, fused KV from the encoder context.
        q = (jnp.dot(q_src, wqkv[:, 0:D_MODEL],
                     preferred_element_type=jnp.float32) + bqkv[:, 0:D_MODEL])
        kv = (jnp.dot(kv_src, wqkv[:, D_MODEL:3 * D_MODEL],
                      preferred_element_type=jnp.float32) + bqkv[:, D_MODEL:3 * D_MODEL])
        k = kv[:, 0:D_MODEL]
        v = kv[:, D_MODEL:2 * D_MODEL]

    # Sq / Sk are multiples of 8, so these reshapes are sublane-aligned.
    q3 = q.reshape(Bc, Sq, D_MODEL)
    k3 = k.reshape(Bc, Sk, D_MODEL)
    v3 = v.reshape(Bc, Sk, D_MODEL)

    # Hoist the mask broadcast out of the head loop (broadcast_in_dim is not CSE'd).
    kmask_b = jnp.broadcast_to(kmask, (Bc, Sq, Sk))

    ctx_heads = []
    # Static unroll over heads; each head's scores/context are batched over Bc.
    for h in range(HEADS):
        lo, hi = h * D_HEAD, (h + 1) * D_HEAD
        s = jnp.einsum("bqd,bkd->bqk", q3[:, :, lo:hi], k3[:, :, lo:hi],
                       preferred_element_type=jnp.float32)
        s = s + kmask_b                     # mask out zero-padded key positions
        s = s - jnp.max(s, axis=-1, keepdims=True)
        e = jnp.exp(s)
        p = e / jnp.sum(e, axis=-1, keepdims=True)   # exact divide (no approx recip)
        ctx = jnp.einsum("bqk,bkd->bqd", p, v3[:, :, lo:hi],
                         preferred_element_type=jnp.float32)      # (Bc, Sq, D_HEAD)
        ctx_heads.append(ctx.reshape(Bc * Sq, D_HEAD))

    # Concatenate heads on the lane axis, then a single K=32 output projection.
    ctx_cat = jnp.concatenate(ctx_heads, axis=-1)                 # (Bc*Sq, D_MODEL)
    return jnp.dot(ctx_cat, wo, preferred_element_type=jnp.float32) + bo


def _decode_block(xf, cf, tgt_mask, src_mask, Bc, Sp, Scp,
                  mat_ref, vec_ref, w1_ref, w2_ref, b1_ref):
    """One DecodeBlock on flattened activations. xf: (Bc*Sp, D), cf: (Bc*Scp, D)."""
    mat = mat_ref[...]   # (64, 128) f32: [wqkv1|wo1] over rows 0:32, [wqkv2|wo2] 32:64
    vec = vec_ref[...]   # (8, 128)  f32: packed biases / LayerNorm params

    wqkv1 = mat[0:D_MODEL, 0:3 * D_MODEL]
    wo1 = mat[0:D_MODEL, 3 * D_MODEL:4 * D_MODEL]
    wqkv2 = mat[D_MODEL:2 * D_MODEL, 0:3 * D_MODEL]
    wo2 = mat[D_MODEL:2 * D_MODEL, 3 * D_MODEL:4 * D_MODEL]

    bqkv1 = vec[0:1, 0:96]
    bo1 = vec[0:1, 96:128]
    g1 = vec[1:2, 0:32]
    be1 = vec[1:2, 32:64]
    g2 = vec[1:2, 64:96]
    be2 = vec[1:2, 96:128]
    bqkv2 = vec[2:3, 0:96]
    bo2 = vec[2:3, 96:128]
    b2 = vec[3:4, 0:32]
    g3 = vec[3:4, 32:64]
    be3 = vec[3:4, 64:96]

    # Self-attention + residual + LayerNorm
    a1 = _mha(xf, xf, tgt_mask, Bc, Sp, Sp, wqkv1, bqkv1, wo1, bo1, self_attn=True)
    h1 = _layernorm(xf + a1, g1, be1)

    # Cross-attention + residual + LayerNorm
    a2 = _mha(h1, cf, src_mask, Bc, Sp, Scp, wqkv2, bqkv2, wo2, bo2, self_attn=False)
    h2 = _layernorm(h1 + a2, g2, be2)

    # Feed-forward + residual + LayerNorm. Weights are bf16 in VMEM; jnp promotes the
    # weight operand to f32 (activations & accumulation stay f32).
    f = jnp.dot(h2, w1_ref[...], preferred_element_type=jnp.float32) + b1_ref[...]
    f = jnp.maximum(f, 0.0)
    f = jnp.dot(f, w2_ref[...], preferred_element_type=jnp.float32) + b2
    return _layernorm(h2 + f, g3, be3)


def _decoder_kernel(Bc, Sp, Scp, n_block, *refs):
    x_ref, c_ref, tgt_mask_ref, src_mask_ref = refs[:4]
    out_ref = refs[-1]
    w_refs = refs[4:-1]

    xf = x_ref[...]                                      # (Bc*Sp, D)
    cf = c_ref[...]                                      # (Bc*Scp, D)
    tgt_mask = tgt_mask_ref[...].reshape(1, 1, Sp)
    src_mask = src_mask_ref[...].reshape(1, 1, Scp)

    for blk in range(n_block):                           # fused blocks, static unroll
        mat_ref, vec_ref, w1_ref, w2_ref, b1_ref = \
            w_refs[blk * _REFS_PER_BLOCK:(blk + 1) * _REFS_PER_BLOCK]
        xf = _decode_block(xf, cf, tgt_mask, src_mask, Bc, Sp, Scp,
                           mat_ref, vec_ref, w1_ref, w2_ref, b1_ref)

    out_ref[...] = xf


# ----------------------------- host-side wrappers -----------------------------

def _round_up8(n):
    return ((n + 7) // 8) * 8


def _pad_seq(a, target):
    B, S, D = a.shape
    if S == target:
        return a
    pad = jnp.zeros((B, target - S, D), a.dtype)
    return jnp.concatenate([a, pad], axis=1)


def _additive_key_mask(n_valid, n_pad):
    idx = jnp.arange(n_pad, dtype=jnp.int32)
    return jnp.where(idx < n_valid, 0.0, -1e9).astype(jnp.float32).reshape(1, n_pad)


def _pack_block(p):
    """Pack one DecodeBlock's params into [mat(64,128) f32, vec(8,128) f32,
    w1(32,2048) bf16, w2(2048,32) bf16, b1(1,2048) f32]."""
    scale = 1.0 / math.sqrt(D_HEAD)
    f32 = jnp.float32

    # 1/sqrt(d_head) folded into Wq / bq here (zero runtime cost).
    wqkv1 = jnp.concatenate([p["wq1"] * scale, p["wk1"], p["wv1"]], axis=1)  # (32, 96)
    wqkv2 = jnp.concatenate([p["wq2"] * scale, p["wk2"], p["wv2"]], axis=1)  # (32, 96)
    mat = jnp.concatenate(
        [jnp.concatenate([wqkv1, p["wo1"]], axis=1),
         jnp.concatenate([wqkv2, p["wo2"]], axis=1)], axis=0).astype(f32)    # (64, 128)

    bqkv1 = jnp.concatenate([p["bq1"] * scale, p["bk1"], p["bv1"]], axis=1)  # (1, 96)
    bqkv2 = jnp.concatenate([p["bq2"] * scale, p["bk2"], p["bv2"]], axis=1)  # (1, 96)
    row0 = jnp.concatenate([bqkv1, p["bo1"]], axis=1)                        # (1, 128)
    row1 = jnp.concatenate([p["g1"], p["be1"], p["g2"], p["be2"]], axis=1)   # (1, 128)
    row2 = jnp.concatenate([bqkv2, p["bo2"]], axis=1)                        # (1, 128)
    row3 = jnp.concatenate([p["b2"], p["g3"], p["be3"],
                            jnp.zeros((1, 32), f32)], axis=1)                # (1, 128)
    vec = jnp.concatenate([row0, row1, row2, row3,
                           jnp.zeros((4, 128), f32)], axis=0).astype(f32)    # (8, 128)

    w1 = p["w1"].astype(jnp.bfloat16)
    w2 = p["w2"].astype(jnp.bfloat16)
    b1 = p["b1"].astype(f32)
    return [mat, vec, w1, w2, b1]


def decoder_forward(x, context, block_params_list, *, batch_chunks=1):
    """Full Decoder forward. x: (B, S, D), context: (B, Sc, D).

    batch_chunks=1 (default, recommended at these sizes): whole problem in one grid
    step.  batch_chunks=2 splits the batch across a parallel grid axis (only worth it
    when Bc*Sp is large enough to keep both cores busy; it duplicates weight DMA).
    """
    B, S, D = x.shape
    Sc = context.shape[1]
    assert D == D_MODEL and B % batch_chunks == 0
    Bc = B // batch_chunks
    Sp, Scp = _round_up8(S), _round_up8(Sc)

    xf = _pad_seq(x, Sp).reshape(B * Sp, D)
    cf = _pad_seq(context, Scp).reshape(B * Scp, D)
    tgt_mask = _additive_key_mask(S, Sp)        # (1, Sp)
    src_mask = _additive_key_mask(Sc, Scp)      # (1, Scp)

    weight_args = []
    for p in block_params_list:
        weight_args.extend(_pack_block(p))
    n_block = len(block_params_list)

    def const_spec(a):
        return pl.BlockSpec(a.shape, lambda i: (0, 0))

    kernel = functools.partial(_decoder_kernel, Bc, Sp, Scp, n_block)

    out = pl.pallas_call(
        kernel,
        out_shape=jax.ShapeDtypeStruct((B * Sp, D), jnp.float32),
        grid=(batch_chunks,),
        in_specs=[pl.BlockSpec((Bc * Sp, D), lambda i: (i, 0)),
                  pl.BlockSpec((Bc * Scp, D), lambda i: (i, 0)),
                  const_spec(tgt_mask),
                  const_spec(src_mask)]
                 + [const_spec(a) for a in weight_args],
        out_specs=pl.BlockSpec((Bc * Sp, D), lambda i: (i, 0)),
        compiler_params=pltpu.CompilerParams(
            dimension_semantics=("parallel",)),
    )(xf, cf, tgt_mask, src_mask, *weight_args)

    # Drop sequence padding; final Dropout is identity in eval mode.
    return out.reshape(B, Sp, D)[:, :S, :]


# ----------------------------- parameter init -----------------------------

def _init_block_params(key):
    def lin(k, din, dout):
        kw, kb = jax.random.split(k)
        w = jax.random.normal(kw, (din, dout), jnp.float32) * (1.0 / math.sqrt(din))
        b = jax.random.normal(kb, (1, dout), jnp.float32) * 0.02
        return w, b

    def ln(k, dim):
        kg, kb = jax.random.split(k)
        g = 1.0 + 0.02 * jax.random.normal(kg, (1, dim), jnp.float32)
        b = 0.02 * jax.random.normal(kb, (1, dim), jnp.float32)
        return g, b

    ks = jax.random.split(key, 14)
    p = {}
    p["wq1"], p["bq1"] = lin(ks[0], D_MODEL, D_MODEL)
    p["wk1"], p["bk1"] = lin(ks[1], D_MODEL, D_MODEL)
    p["wv1"], p["bv1"] = lin(ks[2], D_MODEL, D_MODEL)
    p["wo1"], p["bo1"] = lin(ks[3], D_MODEL, D_MODEL)
    p["g1"], p["be1"] = ln(ks[4], D_MODEL)
    p["wq2"], p["bq2"] = lin(ks[5], D_MODEL, D_MODEL)
    p["wk2"], p["bk2"] = lin(ks[6], D_MODEL, D_MODEL)
    p["wv2"], p["bv2"] = lin(ks[7], D_MODEL, D_MODEL)
    p["wo2"], p["bo2"] = lin(ks[8], D_MODEL, D_MODEL)
    p["g2"], p["be2"] = ln(ks[9], D_MODEL)
    p["w1"], p["b1"] = lin(ks[10], D_MODEL, D_FFN)
    p["w2"], p["b2"] = lin(ks[11], D_FFN, D_MODEL)
    # FFN weights stored as bf16 (kernel and reference both consume the same rounded
    # values, so the comparison stays tight while the HBM weight traffic is halved).
    p["w1"] = p["w1"].astype(jnp.bfloat16)
    p["w2"] = p["w2"].astype(jnp.bfloat16)
    p["g3"], p["be3"] = ln(ks[12], D_MODEL)
    return p


def init_decoder_params(key, n_block):
    keys = jax.random.split(key, n_block)
    return [_init_block_params(k) for k in keys]


# ----------------------------- pure-JAX reference -----------------------------

def _mha_ref(q_in, kv_in, wq, bq, wk, bk, wv, bv, wo, bo):
    q = q_in @ wq + bq
    k = kv_in @ wk + bk
    v = kv_in @ wv + bv
    B, S, _ = q.shape
    Sk = k.shape[1]
    qh = q.reshape(B, S, HEADS, D_HEAD).transpose(0, 2, 1, 3)
    kh = k.reshape(B, Sk, HEADS, D_HEAD).transpose(0, 2, 1, 3)
    vh = v.reshape(B, Sk, HEADS, D_HEAD).transpose(0, 2, 1, 3)
    s = jnp.einsum("bhqd,bhkd->bhqk", qh, kh) / math.sqrt(D_HEAD)
    w = jax.nn.softmax(s, axis=-1)
    c = jnp.einsum("bhqk,bhkd->bhqd", w, vh)
    c = c.transpose(0, 2, 1, 3).reshape(B, S, D_MODEL)
    return c @ wo + bo


def _layernorm_ref(y, g, b):
    mu = jnp.mean(y, axis=-1, keepdims=True)
    var = jnp.mean((y - mu) ** 2, axis=-1, keepdims=True)
    return (y - mu) / jnp.sqrt(var + LN_EPS) * g + b


def decoder_forward_ref(x, context, block_params_list):
    for p in block_params_list:
        a1 = _mha_ref(x, x, p["wq1"], p["bq1"], p["wk1"], p["bk1"],
                      p["wv1"], p["bv1"], p["wo1"], p["bo1"])
        x = _layernorm_ref(x + a1, p["g1"], p["be1"])
        a2 = _mha_ref(x, context, p["wq2"], p["bq2"], p["wk2"], p["bk2"],
                      p["wv2"], p["bv2"], p["wo2"], p["bo2"])
        x = _layernorm_ref(x + a2, p["g2"], p["be2"])
        f = jnp.maximum(x @ p["w1"] + p["b1"], 0.0) @ p["w2"] + p["b2"]
        x = _layernorm_ref(x + f, p["g3"], p["be3"])
    return x


# ----------------------------- main -----------------------------

if __name__ == "__main__":
    key = jax.random.PRNGKey(0)
    k_x, k_c, k_p = jax.random.split(key, 3)

    B, S_TGT, S_SRC = 2, 8, 10
    x = jax.random.normal(k_x, (B, S_TGT, D_MODEL), jnp.float32)
    context = jax.random.normal(k_c, (B, S_SRC, D_MODEL), jnp.float32)
    params = init_decoder_params(k_p, N_BLOCK)

    out = decoder_forward(x, context, params)
    out = jax.block_until_ready(out)

    ref = decoder_forward_ref(x, context, params)
    max_err = float(jnp.max(jnp.abs(out - ref)))
    assert out.shape == (B, S_TGT, D_MODEL)
    # Exact softmax divide; tolerance covers MXU default-precision f32 matmul paths.
    assert max_err < 1e-2, f"mismatch vs reference: {max_err}"

    print("KERNEL_OK")
</pallas_src>

<mosaic_0001>
module attributes {stable_mosaic.version = 11 : i64} {
  func.func @_decoder_kernel(%arg0: i32, %arg1: memref<16x32xf32, #tpu.memory_space<vmem>>, %arg2: memref<32x32xf32, #tpu.memory_space<vmem>>, %arg3: memref<1x8xf32, #tpu.memory_space<vmem>>, %arg4: memref<1x16xf32, #tpu.memory_space<vmem>>, %arg5: memref<64x128xf32, #tpu.memory_space<vmem>>, %arg6: memref<8x128xf32, #tpu.memory_space<vmem>>, %arg7: memref<32x2048xbf16, #tpu.memory_space<vmem>>, %arg8: memref<2048x32xbf16, #tpu.memory_space<vmem>>, %arg9: memref<1x2048xf32, #tpu.memory_space<vmem>>, %arg10: memref<64x128xf32, #tpu.memory_space<vmem>>, %arg11: memref<8x128xf32, #tpu.memory_space<vmem>>, %arg12: memref<32x2048xbf16, #tpu.memory_space<vmem>>, %arg13: memref<2048x32xbf16, #tpu.memory_space<vmem>>, %arg14: memref<1x2048xf32, #tpu.memory_space<vmem>>, %arg15: memref<16x32xf32, #tpu.memory_space<vmem>>) attributes {dimension_semantics = [#tpu.dimension_semantics<parallel>], iteration_bounds = array<i64: 1>, scalar_prefetch = 0 : i64, scratch_operands = 0 : i64, tpu.core_type = #tpu.core_type<tc>, window_params = [{transform_indices = @transform_0, window_bounds = array<i64: 16, 32>}, {transform_indices = @transform_1, window_bounds = array<i64: 32, 32>}, {pipeline_mode = #tpu.pipeline_mode<synchronous>, transform_indices = @transform_2, window_bounds = array<i64: 1, 8>}, {pipeline_mode = #tpu.pipeline_mode<synchronous>, transform_indices = @transform_3, window_bounds = array<i64: 1, 16>}, {pipeline_mode = #tpu.pipeline_mode<synchronous>, transform_indices = @transform_4, window_bounds = array<i64: 64, 128>}, {pipeline_mode = #tpu.pipeline_mode<synchronous>, transform_indices = @transform_5, window_bounds = array<i64: 8, 128>}, {pipeline_mode = #tpu.pipeline_mode<synchronous>, transform_indices = @transform_6, window_bounds = array<i64: 32, 2048>}, {pipeline_mode = #tpu.pipeline_mode<synchronous>, transform_indices = @transform_7, window_bounds = array<i64: 2048, 32>}, {pipeline_mode = #tpu.pipeline_mode<synchronous>, transform_indices = @transform_8, window_bounds = array<i64: 1, 2048>}, {pipeline_mode = #tpu.pipeline_mode<synchronous>, transform_indices = @transform_9, window_bounds = array<i64: 64, 128>}, {pipeline_mode = #tpu.pipeline_mode<synchronous>, transform_indices = @transform_10, window_bounds = array<i64: 8, 128>}, {pipeline_mode = #tpu.pipeline_mode<synchronous>, transform_indices = @transform_11, window_bounds = array<i64: 32, 2048>}, {pipeline_mode = #tpu.pipeline_mode<synchronous>, transform_indices = @transform_12, window_bounds = array<i64: 2048, 32>}, {pipeline_mode = #tpu.pipeline_mode<synchronous>, transform_indices = @transform_13, window_bounds = array<i64: 1, 2048>}, {transform_indices = @transform_14, window_bounds = array<i64: 16, 32>}]} {
    %c0 = arith.constant 0 : index
    %c0_0 = arith.constant 0 : index
    %0 = vector.load %arg1[%c0, %c0_0] : memref<16x32xf32, #tpu.memory_space<vmem>>, vector<16x32xf32>
    %c0_1 = arith.constant 0 : index
    %c0_2 = arith.constant 0 : index
    %1 = vector.load %arg2[%c0_1, %c0_2] : memref<32x32xf32, #tpu.memory_space<vmem>>, vector<32x32xf32>
    %c0_3 = arith.constant 0 : index
    %c0_4 = arith.constant 0 : index
    %2 = vector.load %arg3[%c0_3, %c0_4] : memref<1x8xf32, #tpu.memory_space<vmem>>, vector<1x8xf32>
    %3 = vector.shape_cast %2 : vector<1x8xf32> to vector<1x1x8xf32>
    %c0_5 = arith.constant 0 : index
    %c0_6 = arith.constant 0 : index
    %4 = vector.load %arg4[%c0_5, %c0_6] : memref<1x16xf32, #tpu.memory_space<vmem>>, vector<1x16xf32>
    %5 = vector.shape_cast %4 : vector<1x16xf32> to vector<1x1x16xf32>
    %c0_7 = arith.constant 0 : index
    %c0_8 = arith.constant 0 : index
    %6 = vector.load %arg5[%c0_7, %c0_8] : memref<64x128xf32, #tpu.memory_space<vmem>>, vector<64x128xf32>
    %c0_9 = arith.constant 0 : index
    %c0_10 = arith.constant 0 : index
    %7 = vector.load %arg6[%c0_9, %c0_10] : memref<8x128xf32, #tpu.memory_space<vmem>>, vector<8x128xf32>
    %8 = vector.extract_strided_slice %6 {offsets = [0, 0], sizes = [32, 96], strides = [1, 1]} : vector<64x128xf32> to vector<32x96xf32>
    %9 = vector.extract_strided_slice %6 {offsets = [0, 96], sizes = [32, 32], strides = [1, 1]} : vector<64x128xf32> to vector<32x32xf32>
    %10 = vector.extract_strided_slice %6 {offsets = [32, 0], sizes = [32, 96], strides = [1, 1]} : vector<64x128xf32> to vector<32x96xf32>
    %11 = vector.extract_strided_slice %6 {offsets = [32, 96], sizes = [32, 32], strides = [1, 1]} : vector<64x128xf32> to vector<32x32xf32>
    %12 = vector.extract_strided_slice %7 {offsets = [0, 0], sizes = [1, 96], strides = [1, 1]} : vector<8x128xf32> to vector<1x96xf32>
    %13 = vector.extract_strided_slice %7 {offsets = [0, 96], sizes = [1, 32], strides = [1, 1]} : vector<8x128xf32> to vector<1x32xf32>
    %14 = vector.extract_strided_slice %7 {offsets = [1, 0], sizes = [1, 32], strides = [1, 1]} : vector<8x128xf32> to vector<1x32xf32>
    %15 = vector.extract_strided_slice %7 {offsets = [1, 32], sizes = [1, 32], strides = [1, 1]} : vector<8x128xf32> to vector<1x32xf32>
    %16 = vector.extract_strided_slice %7 {offsets = [1, 64], sizes = [1, 32], strides = [1, 1]} : vector<8x128xf32> to vector<1x32xf32>
    %17 = vector.extract_strided_slice %7 {offsets = [1, 96], sizes = [1, 32], strides = [1, 1]} : vector<8x128xf32> to vector<1x32xf32>
    %18 = vector.extract_strided_slice %7 {offsets = [2, 0], sizes = [1, 96], strides = [1, 1]} : vector<8x128xf32> to vector<1x96xf32>
    %19 = vector.extract_strided_slice %7 {offsets = [2, 96], sizes = [1, 32], strides = [1, 1]} : vector<8x128xf32> to vector<1x32xf32>
    %20 = vector.extract_strided_slice %7 {offsets = [3, 0], sizes = [1, 32], strides = [1, 1]} : vector<8x128xf32> to vector<1x32xf32>
    %21 = vector.extract_strided_slice %7 {offsets = [3, 32], sizes = [1, 32], strides = [1, 1]} : vector<8x128xf32> to vector<1x32xf32>
    %22 = vector.extract_strided_slice %7 {offsets = [3, 64], sizes = [1, 32], strides = [1, 1]} : vector<8x128xf32> to vector<1x32xf32>
    %cst = arith.constant dense<0.000000e+00> : vector<16x96xf32>
    %23 = tpu.matmul %0, %8, %cst {dimension_numbers = #tpu.dot_dimension_numbers<[1], [0], [0], [1], [0, 0, 1, 1], [], []>} : vector<16x32xf32>, vector<32x96xf32>, vector<16x96xf32> -> vector<16x96xf32>
    %24 = vector.broadcast %12 : vector<1x96xf32> to vector<16x96xf32>
    %25 = arith.addf %23, %24 : vector<16x96xf32>
    %26 = vector.extract_strided_slice %25 {offsets = [0, 0], sizes = [16, 32], strides = [1, 1]} : vector<16x96xf32> to vector<16x32xf32>
    %27 = vector.extract_strided_slice %25 {offsets = [0, 32], sizes = [16, 32], strides = [1, 1]} : vector<16x96xf32> to vector<16x32xf32>
    %28 = vector.extract_strided_slice %25 {offsets = [0, 64], sizes = [16, 32], strides = [1, 1]} : vector<16x96xf32> to vector<16x32xf32>
    %29 = vector.shape_cast %26 : vector<16x32xf32> to vector<2x8x32xf32>
    %30 = vector.shape_cast %27 : vector<16x32xf32> to vector<2x8x32xf32>
    %31 = vector.shape_cast %28 : vector<16x32xf32> to vector<2x8x32xf32>
    %32 = vector.shape_cast %3 : vector<1x1x8xf32> to vector<1x1x8xf32>
    %33 = vector.broadcast %32 : vector<1x1x8xf32> to vector<2x8x8xf32>
    %34 = vector.extract_strided_slice %29 {offsets = [0, 0, 0], sizes = [2, 8, 8], strides = [1, 1, 1]} : vector<2x8x32xf32> to vector<2x8x8xf32>
    %35 = vector.extract_strided_slice %30 {offsets = [0, 0, 0], sizes = [2, 8, 8], strides = [1, 1, 1]} : vector<2x8x32xf32> to vector<2x8x8xf32>
    "tpu.trace_start"() <{level = 10 : i32, message = "bqd,bkd->bqk"}> : () -> ()
    %cst_11 = arith.constant dense<0.000000e+00> : vector<2x8x8xf32>
    %36 = tpu.matmul %34, %35, %cst_11 {dimension_numbers = #tpu.dot_dimension_numbers<[2], [2], [1], [1], [0, 0, 0, 1, 1, 1], [0], [0]>} : vector<2x8x8xf32>, vector<2x8x8xf32>, vector<2x8x8xf32> -> vector<2x8x8xf32>
    "tpu.trace_stop"() : () -> ()
    %37 = arith.addf %36, %33 : vector<2x8x8xf32>
    %cst_12 = arith.constant dense<0xFF800000> : vector<2x8xf32>
    %38 = vector.multi_reduction <maximumf>, %37, %cst_12 [2] : vector<2x8x8xf32> to vector<2x8xf32>
    %39 = vector.shape_cast %38 : vector<2x8xf32> to vector<2x8x1xf32>
    %40 = vector.broadcast %39 : vector<2x8x1xf32> to vector<2x8x8xf32>
    %41 = arith.subf %37, %40 : vector<2x8x8xf32>
    %42 = math.exp %41 : vector<2x8x8xf32>
    %cst_13 = arith.constant dense<0.000000e+00> : vector<2x8xf32>
    %43 = vector.multi_reduction <add>, %42, %cst_13 [2] : vector<2x8x8xf32> to vector<2x8xf32>
    %44 = vector.shape_cast %43 : vector<2x8xf32> to vector<2x8x1xf32>
    %45 = vector.broadcast %44 : vector<2x8x1xf32> to vector<2x8x8xf32>
    %46 = arith.divf %42, %45 : vector<2x8x8xf32>
    %47 = vector.extract_strided_slice %31 {offsets = [0, 0, 0], sizes = [2, 8, 8], strides = [1, 1, 1]} : vector<2x8x32xf32> to vector<2x8x8xf32>
    "tpu.trace_start"() <{level = 10 : i32, message = "bqk,bkd->bqd"}> : () -> ()
    %cst_14 = arith.constant dense<0.000000e+00> : vector<2x8x8xf32>
    %48 = tpu.matmul %46, %47, %cst_14 {dimension_numbers = #tpu.dot_dimension_numbers<[2], [1], [1], [2], [0, 0, 0, 1, 1, 2], [0], [0]>} : vector<2x8x8xf32>, vector<2x8x8xf32>, vector<2x8x8xf32> -> vector<2x8x8xf32>
    "tpu.trace_stop"() : () -> ()
    %49 = vector.shape_cast %48 : vector<2x8x8xf32> to vector<16x8xf32>
    %50 = vector.extract_strided_slice %29 {offsets = [0, 0, 8], sizes = [2, 8, 8], strides = [1, 1, 1]} : vector<2x8x32xf32> to vector<2x8x8xf32>
    %51 = vector.extract_strided_slice %30 {offsets = [0, 0, 8], sizes = [2, 8, 8], strides = [1, 1, 1]} : vector<2x8x32xf32> to vector<2x8x8xf32>
    "tpu.trace_start"() <{level = 10 : i32, message = "bqd,bkd->bqk"}> : () -> ()
    %cst_15 = arith.constant dense<0.000000e+00> : vector<2x8x8xf32>
    %52 = tpu.matmul %50, %51, %cst_15 {dimension_numbers = #tpu.dot_dimension_numbers<[2], [2], [1], [1], [0, 0, 0, 1, 1, 1], [0], [0]>} : vector<2x8x8xf32>, vector<2x8x8xf32>, vector<2x8x8xf32> -> vector<2x8x8xf32>
    "tpu.trace_stop"() : () -> ()
    %53 = arith.addf %52, %33 : vector<2x8x8xf32>
    %cst_16 = arith.constant dense<0xFF800000> : vector<2x8xf32>
    %54 = vector.multi_reduction <maximumf>, %53, %cst_16 [2] : vector<2x8x8xf32> to vector<2x8xf32>
    %55 = vector.shape_cast %54 : vector<2x8xf32> to vector<2x8x1xf32>
    %56 = vector.broadcast %55 : vector<2x8x1xf32> to vector<2x8x8xf32>
    %57 = arith.subf %53, %56 : vector<2x8x8xf32>
    %58 = math.exp %57 : vector<2x8x8xf32>
    %cst_17 = arith.constant dense<0.000000e+00> : vector<2x8xf32>
    %59 = vector.multi_reduction <add>, %58, %cst_17 [2] : vector<2x8x8xf32> to vector<2x8xf32>
    %60 = vector.shape_cast %59 : vector<2x8xf32> to vector<2x8x1xf32>
    %61 = vector.broadcast %60 : vector<2x8x1xf32> to vector<2x8x8xf32>
    %62 = arith.divf %58, %61 : vector<2x8x8xf32>
    %63 = vector.extract_strided_slice %31 {offsets = [0, 0, 8], sizes = [2, 8, 8], strides = [1, 1, 1]} : vector<2x8x32xf32> to vector<2x8x8xf32>
    "tpu.trace_start"() <{level = 10 : i32, message = "bqk,bkd->bqd"}> : () -> ()
    %cst_18 = arith.constant dense<0.000000e+00> : vector<2x8x8xf32>
    %64 = tpu.matmul %62, %63, %cst_18 {dimension_numbers = #tpu.dot_dimension_numbers<[2], [1], [1], [2], [0, 0, 0, 1, 1, 2], [0], [0]>} : vector<2x8x8xf32>, vector<2x8x8xf32>, vector<2x8x8xf32> -> vector<2x8x8xf32>
    "tpu.trace_stop"() : () -> ()
    %65 = vector.shape_cast %64 : vector<2x8x8xf32> to vector<16x8xf32>
    %66 = vector.extract_strided_slice %29 {offsets = [0, 0, 16], sizes = [2, 8, 8], strides = [1, 1, 1]} : vector<2x8x32xf32> to vector<2x8x8xf32>
    %67 = vector.extract_strided_slice %30 {offsets = [0, 0, 16], sizes = [2, 8, 8], strides = [1, 1, 1]} : vector<2x8x32xf32> to vector<2x8x8xf32>
    "tpu.trace_start"() <{level = 10 : i32, message = "bqd,bkd->bqk"}> : () -> ()
    %cst_19 = arith.constant dense<0.000000e+00> : vector<2x8x8xf32>
    %68 = tpu.matmul %66, %67, %cst_19 {dimension_numbers = #tpu.dot_dimension_numbers<[2], [2], [1], [1], [0, 0, 0, 1, 1, 1], [0], [0]>} : vector<2x8x8xf32>, vector<2x8x8xf32>, vector<2x8x8xf32> -> vector<2x8x8xf32>
    "tpu.trace_stop"() : () -> ()
    %69 = arith.addf %68, %33 : vector<2x8x8xf32>
    %cst_20 = arith.constant dense<0xFF800000> : vector<2x8xf32>
    %70 = vector.multi_reduction <maximumf>, %69, %cst_20 [2] : vector<2x8x8xf32> to vector<2x8xf32>
    %71 = vector.shape_cast %70 : vector<2x8xf32> to vector<2x8x1xf32>
    %72 = vector.broadcast %71 : vector<2x8x1xf32> to vector<2x8x8xf32>
    %73 = arith.subf %69, %72 : vector<2x8x8xf32>
    %74 = math.exp %73 : vector<2x8x8xf32>
    %cst_21 = arith.constant dense<0.000000e+00> : vector<2x8xf32>
    %75 = vector.multi_reduction <add>, %74, %cst_21 [2] : vector<2x8x8xf32> to vector<2x8xf32>
    %76 = vector.shape_cast %75 : vector<2x8xf32> to vector<2x8x1xf32>
    %77 = vector.broadcast %76 : vector<2x8x1xf32> to vector<2x8x8xf32>
    %78 = arith.divf %74, %77 : vector<2x8x8xf32>
    %79 = vector.extract_strided_slice %31 {offsets = [0, 0, 16], sizes = [2, 8, 8], strides = [1, 1, 1]} : vector<2x8x32xf32> to vector<2x8x8xf32>
    "tpu.trace_start"() <{level = 10 : i32, message = "bqk,bkd->bqd"}> : () -> ()
    %cst_22 = arith.constant dense<0.000000e+00> : vector<2x8x8xf32>
    %80 = tpu.matmul %78, %79, %cst_22 {dimension_numbers = #tpu.dot_dimension_numbers<[2], [1], [1], [2], [0, 0, 0, 1, 1, 2], [0], [0]>} : vector<2x8x8xf32>, vector<2x8x8xf32>, vector<2x8x8xf32> -> vector<2x8x8xf32>
    "tpu.trace_stop"() : () -> ()
    %81 = vector.shape_cast %80 : vector<2x8x8xf32> to vector<16x8xf32>
    %82 = vector.extract_strided_slice %29 {offsets = [0, 0, 24], sizes = [2, 8, 8], strides = [1, 1, 1]} : vector<2x8x32xf32> to vector<2x8x8xf32>
    %83 = vector.extract_strided_slice %30 {offsets = [0, 0, 24], sizes = [2, 8, 8], strides = [1, 1, 1]} : vector<2x8x32xf32> to vector<2x8x8xf32>
    "tpu.trace_start"() <{level = 10 : i32, message = "bqd,bkd->bqk"}> : () -> ()
    %cst_23 = arith.constant dense<0.000000e+00> : vector<2x8x8xf32>
    %84 = tpu.matmul %82, %83, %cst_23 {dimension_numbers = #tpu.dot_dimension_numbers<[2], [2], [1], [1], [0, 0, 0, 1, 1, 1], [0], [0]>} : vector<2x8x8xf32>, vector<2x8x8xf32>, vector<2x8x8xf32> -> vector<2x8x8xf32>
    "tpu.trace_stop"() : () -> ()
    %85 = arith.addf %84, %33 : vector<2x8x8xf32>
    %cst_24 = arith.constant dense<0xFF800000> : vector<2x8xf32>
    %86 = vector.multi_reduction <maximumf>, %85, %cst_24 [2] : vector<2x8x8xf32> to vector<2x8xf32>
    %87 = vector.shape_cast %86 : vector<2x8xf32> to vector<2x8x1xf32>
    %88 = vector.broadcast %87 : vector<2x8x1xf32> to vector<2x8x8xf32>
    %89 = arith.subf %85, %88 : vector<2x8x8xf32>
    %90 = math.exp %89 : vector<2x8x8xf32>
    %cst_25 = arith.constant dense<0.000000e+00> : vector<2x8xf32>
    %91 = vector.multi_reduction <add>, %90, %cst_25 [2] : vector<2x8x8xf32> to vector<2x8xf32>
    %92 = vector.shape_cast %91 : vector<2x8xf32> to vector<2x8x1xf32>
    %93 = vector.broadcast %92 : vector<2x8x1xf32> to vector<2x8x8xf32>
    %94 = arith.divf %90, %93 : vector<2x8x8xf32>
    %95 = vector.extract_strided_slice %31 {offsets = [0, 0, 24], sizes = [2, 8, 8], strides = [1, 1, 1]} : vector<2x8x32xf32> to vector<2x8x8xf32>
    "tpu.trace_start"() <{level = 10 : i32, message = "bqk,bkd->bqd"}> : () -> ()
    %cst_26 = arith.constant dense<0.000000e+00> : vector<2x8x8xf32>
    %96 = tpu.matmul %94, %95, %cst_26 {dimension_numbers = #tpu.dot_dimension_numbers<[2], [1], [1], [2], [0, 0, 0, 1, 1, 2], [0], [0]>} : vector<2x8x8xf32>, vector<2x8x8xf32>, vector<2x8x8xf32> -> vector<2x8x8xf32>
    "tpu.trace_stop"() : () -> ()
    %97 = vector.shape_cast %96 : vector<2x8x8xf32> to vector<16x8xf32>
    %98 = tpu.concatenate %49, %65, %81, %97 in 1 : vector<16x8xf32>, vector<16x8xf32>, vector<16x8xf32>, vector<16x8xf32> -> vector<16x32xf32>
    %cst_27 = arith.constant dense<0.000000e+00> : vector<16x32xf32>
    %99 = tpu.matmul %98, %9, %cst_27 {dimension_numbers = #tpu.dot_dimension_numbers<[1], [0], [0], [1], [0, 0, 1, 1], [], []>} : vector<16x32xf32>, vector<32x32xf32>, vector<16x32xf32> -> vector<16x32xf32>
    %100 = vector.broadcast %13 : vector<1x32xf32> to vector<16x32xf32>
    %101 = arith.addf %99, %100 : vector<16x32xf32>
    %102 = arith.addf %0, %101 : vector<16x32xf32>
    %cst_28 = arith.constant dense<0.000000e+00> : vector<16xf32>
    %103 = vector.multi_reduction <add>, %102, %cst_28 [1] : vector<16x32xf32> to vector<16xf32>
    %104 = vector.shape_cast %103 : vector<16xf32> to vector<16x1xf32>
    %cst_29 = arith.constant 3.200000e+01 : f32
    %105 = vector.broadcast %cst_29 : f32 to vector<16x1xf32>
    %106 = arith.divf %104, %105 : vector<16x1xf32>
    %107 = vector.broadcast %106 : vector<16x1xf32> to vector<16x32xf32>
    %108 = arith.subf %102, %107 : vector<16x32xf32>
    %109 = arith.mulf %108, %108 : vector<16x32xf32>
    %cst_30 = arith.constant dense<0.000000e+00> : vector<16xf32>
    %110 = vector.multi_reduction <add>, %109, %cst_30 [1] : vector<16x32xf32> to vector<16xf32>
    %111 = vector.shape_cast %110 : vector<16xf32> to vector<16x1xf32>
    %cst_31 = arith.constant 3.200000e+01 : f32
    %112 = vector.broadcast %cst_31 : f32 to vector<16x1xf32>
    %113 = arith.divf %111, %112 : vector<16x1xf32>
    %114 = vector.broadcast %106 : vector<16x1xf32> to vector<16x32xf32>
    %115 = arith.subf %102, %114 : vector<16x32xf32>
    %cst_32 = arith.constant 9.99999974E-6 : f32
    %116 = vector.broadcast %cst_32 : f32 to vector<16x1xf32>
    %117 = arith.addf %113, %116 : vector<16x1xf32>
    %118 = math.rsqrt %117 : vector<16x1xf32>
    %119 = vector.broadcast %118 : vector<16x1xf32> to vector<16x32xf32>
    %120 = arith.mulf %115, %119 : vector<16x32xf32>
    %121 = vector.broadcast %14 : vector<1x32xf32> to vector<16x32xf32>
    %122 = arith.mulf %120, %121 : vector<16x32xf32>
    %123 = vector.broadcast %15 : vector<1x32xf32> to vector<16x32xf32>
    %124 = arith.addf %122, %123 : vector<16x32xf32>
    %125 = vector.extract_strided_slice %10 {offsets = [0, 0], sizes = [32, 32], strides = [1, 1]} : vector<32x96xf32> to vector<32x32xf32>
    %cst_33 = arith.constant dense<0.000000e+00> : vector<16x32xf32>
    %126 = tpu.matmul %124, %125, %cst_33 {dimension_numbers = #tpu.dot_dimension_numbers<[1], [0], [0], [1], [0, 0, 1, 1], [], []>} : vector<16x32xf32>, vector<32x32xf32>, vector<16x32xf32> -> vector<16x32xf32>
    %127 = vector.extract_strided_slice %18 {offsets = [0, 0], sizes = [1, 32], strides = [1, 1]} : vector<1x96xf32> to vector<1x32xf32>
    %128 = vector.broadcast %127 : vector<1x32xf32> to vector<16x32xf32>
    %129 = arith.addf %126, %128 : vector<16x32xf32>
    %130 = vector.extract_strided_slice %10 {offsets = [0, 32], sizes = [32, 64], strides = [1, 1]} : vector<32x96xf32> to vector<32x64xf32>
    %cst_34 = arith.constant dense<0.000000e+00> : vector<32x64xf32>
    %131 = tpu.matmul %1, %130, %cst_34 {dimension_numbers = #tpu.dot_dimension_numbers<[1], [0], [0], [1], [0, 0, 1, 1], [], []>} : vector<32x32xf32>, vector<32x64xf32>, vector<32x64xf32> -> vector<32x64xf32>
    %132 = vector.extract_strided_slice %18 {offsets = [0, 32], sizes = [1, 64], strides = [1, 1]} : vector<1x96xf32> to vector<1x64xf32>
    %133 = vector.broadcast %132 : vector<1x64xf32> to vector<32x64xf32>
    %134 = arith.addf %131, %133 : vector<32x64xf32>
    %135 = vector.extract_strided_slice %134 {offsets = [0, 0], sizes = [32, 32], strides = [1, 1]} : vector<32x64xf32> to vector<32x32xf32>
    %136 = vector.extract_strided_slice %134 {offsets = [0, 32], sizes = [32, 32], strides = [1, 1]} : vector<32x64xf32> to vector<32x32xf32>
    %137 = vector.shape_cast %129 : vector<16x32xf32> to vector<2x8x32xf32>
    %138 = vector.shape_cast %135 : vector<32x32xf32> to vector<2x16x32xf32>
    %139 = vector.shape_cast %136 : vector<32x32xf32> to vector<2x16x32xf32>
    %140 = vector.shape_cast %5 : vector<1x1x16xf32> to vector<1x1x16xf32>
    %141 = vector.broadcast %140 : vector<1x1x16xf32> to vector<2x8x16xf32>
    %142 = vector.extract_strided_slice %137 {offsets = [0, 0, 0], sizes = [2, 8, 8], strides = [1, 1, 1]} : vector<2x8x32xf32> to vector<2x8x8xf32>
    %143 = vector.extract_strided_slice %138 {offsets = [0, 0, 0], sizes = [2, 16, 8], strides = [1, 1, 1]} : vector<2x16x32xf32> to vector<2x16x8xf32>
    "tpu.trace_start"() <{level = 10 : i32, message = "bqd,bkd->bqk"}> : () -> ()
    %cst_35 = arith.constant dense<0.000000e+00> : vector<2x8x16xf32>
    %144 = tpu.matmul %142, %143, %cst_35 {dimension_numbers = #tpu.dot_dimension_numbers<[2], [2], [1], [1], [0, 0, 0, 1, 1, 1], [0], [0]>} : vector<2x8x8xf32>, vector<2x16x8xf32>, vector<2x8x16xf32> -> vector<2x8x16xf32>
    "tpu.trace_stop"() : () -> ()
    %145 = arith.addf %144, %141 : vector<2x8x16xf32>
    %cst_36 = arith.constant dense<0xFF800000> : vector<2x8xf32>
    %146 = vector.multi_reduction <maximumf>, %145, %cst_36 [2] : vector<2x8x16xf32> to vector<2x8xf32>
    %147 = vector.shape_cast %146 : vector<2x8xf32> to vector<2x8x1xf32>
    %148 = vector.broadcast %147 : vector<2x8x1xf32> to vector<2x8x16xf32>
    %149 = arith.subf %145, %148 : vector<2x8x16xf32>
    %150 = math.exp %149 : vector<2x8x16xf32>
    %cst_37 = arith.constant dense<0.000000e+00> : vector<2x8xf32>
    %151 = vector.multi_reduction <add>, %150, %cst_37 [2] : vector<2x8x16xf32> to vector<2x8xf32>
    %152 = vector.shape_cast %151 : vector<2x8xf32> to vector<2x8x1xf32>
    %153 = vector.broadcast %152 : vector<2x8x1xf32> to vector<2x8x16xf32>
    %154 = arith.divf %150, %153 : vector<2x8x16xf32>
    %155 = vector.extract_strided_slice %139 {offsets = [0, 0, 0], sizes = [2, 16, 8], strides = [1, 1, 1]} : vector<2x16x32xf32> to vector<2x16x8xf32>
    "tpu.trace_start"() <{level = 10 : i32, message = "bqk,bkd->bqd"}> : () -> ()
    %cst_38 = arith.constant dense<0.000000e+00> : vector<2x8x8xf32>
    %156 = tpu.matmul %154, %155, %cst_38 {dimension_numbers = #tpu.dot_dimension_numbers<[2], [1], [1], [2], [0, 0, 0, 1, 1, 2], [0], [0]>} : vector<2x8x16xf32>, vector<2x16x8xf32>, vector<2x8x8xf32> -> vector<2x8x8xf32>
    "tpu.trace_stop"() : () -> ()
    %157 = vector.shape_cast %156 : vector<2x8x8xf32> to vector<16x8xf32>
    %158 = vector.extract_strided_slice %137 {offsets = [0, 0, 8], sizes = [2, 8, 8], strides = [1, 1, 1]} : vector<2x8x32xf32> to vector<2x8x8xf32>
    %159 = vector.extract_strided_slice %138 {offsets = [0, 0, 8], sizes = [2, 16, 8], strides = [1, 1, 1]} : vector<2x16x32xf32> to vector<2x16x8xf32>
    "tpu.trace_start"() <{level = 10 : i32, message = "bqd,bkd->bqk"}> : () -> ()
    %cst_39 = arith.constant dense<0.000000e+00> : vector<2x8x16xf32>
    %160 = tpu.matmul %158, %159, %cst_39 {dimension_numbers = #tpu.dot_dimension_numbers<[2], [2], [1], [1], [0, 0, 0, 1, 1, 1], [0], [0]>} : vector<2x8x8xf32>, vector<2x16x8xf32>, vector<2x8x16xf32> -> vector<2x8x16xf32>
    "tpu.trace_stop"() : () -> ()
    %161 = arith.addf %160, %141 : vector<2x8x16xf32>
    %cst_40 = arith.constant dense<0xFF800000> : vector<2x8xf32>
    %162 = vector.multi_reduction <maximumf>, %161, %cst_40 [2] : vector<2x8x16xf32> to vector<2x8xf32>
    %163 = vector.shape_cast %162 : vector<2x8xf32> to vector<2x8x1xf32>
    %164 = vector.broadcast %163 : vector<2x8x1xf32> to vector<2x8x16xf32>
    %165 = arith.subf %161, %164 : vector<2x8x16xf32>
    %166 = math.exp %165 : vector<2x8x16xf32>
    %cst_41 = arith.constant dense<0.000000e+00> : vector<2x8xf32>
    %167 = vector.multi_reduction <add>, %166, %cst_41 [2] : vector<2x8x16xf32> to vector<2x8xf32>
    %168 = vector.shape_cast %167 : vector<2x8xf32> to vector<2x8x1xf32>
    %169 = vector.broadcast %168 : vector<2x8x1xf32> to vector<2x8x16xf32>
    %170 = arith.divf %166, %169 : vector<2x8x16xf32>
    %171 = vector.extract_strided_slice %139 {offsets = [0, 0, 8], sizes = [2, 16, 8], strides = [1, 1, 1]} : vector<2x16x32xf32> to vector<2x16x8xf32>
    "tpu.trace_start"() <{level = 10 : i32, message = "bqk,bkd->bqd"}> : () -> ()
    %cst_42 = arith.constant dense<0.000000e+00> : vector<2x8x8xf32>
    %172 = tpu.matmul %170, %171, %cst_42 {dimension_numbers = #tpu.dot_dimension_numbers<[2], [1], [1], [2], [0, 0, 0, 1, 1, 2], [0], [0]>} : vector<2x8x16xf32>, vector<2x16x8xf32>, vector<2x8x8xf32> -> vector<2x8x8xf32>
    "tpu.trace_stop"() : () -> ()
    %173 = vector.shape_cast %172 : vector<2x8x8xf32> to vector<16x8xf32>
    %174 = vector.extract_strided_slice %137 {offsets = [0, 0, 16], sizes = [2, 8, 8], strides = [1, 1, 1]} : vector<2x8x32xf32> to vector<2x8x8xf32>
    %175 = vector.extract_strided_slice %138 {offsets = [0, 0, 16], sizes = [2, 16, 8], strides = [1, 1, 1]} : vector<2x16x32xf32> to vector<2x16x8xf32>
    "tpu.trace_start"() <{level = 10 : i32, message = "bqd,bkd->bqk"}> : () -> ()
    %cst_43 = arith.constant dense<0.000000e+00> : vector<2x8x16xf32>
    %176 = tpu.matmul %174, %175, %cst_43 {dimension_numbers = #tpu.dot_dimension_numbers<[2], [2], [1], [1], [0, 0, 0, 1, 1, 1], [0], [0]>} : vector<2x8x8xf32>, vector<2x16x8xf32>, vector<2x8x16xf32> -> vector<2x8x16xf32>
    "tpu.trace_stop"() : () -> ()
    %177 = arith.addf %176, %141 : vector<2x8x16xf32>
    %cst_44 = arith.constant dense<0xFF800000> : vector<2x8xf32>
    %178 = vector.multi_reduction <maximumf>, %177, %cst_44 [2] : vector<2x8x16xf32> to vector<2x8xf32>
    %179 = vector.shape_cast %178 : vector<2x8xf32> to vector<2x8x1xf32>
    %180 = vector.broadcast %179 : vector<2x8x1xf32> to vector<2x8x16xf32>
    %181 = arith.subf %177, %180 : vector<2x8x16xf32>
    %182 = math.exp %181 : vector<2x8x16xf32>
    %cst_45 = arith.constant dense<0.000000e+00> : vector<2x8xf32>
    %183 = vector.multi_reduction <add>, %182, %cst_45 [2] : vector<2x8x16xf32> to vector<2x8xf32>
    %184 = vector.shape_cast %183 : vector<2x8xf32> to vector<2x8x1xf32>
    %185 = vector.broadcast %184 : vector<2x8x1xf32> to vector<2x8x16xf32>
    %186 = arith.divf %182, %185 : vector<2x8x16xf32>
    %187 = vector.extract_strided_slice %139 {offsets = [0, 0, 16], sizes = [2, 16, 8], strides = [1, 1, 1]} : vector<2x16x32xf32> to vector<2x16x8xf32>
    "tpu.trace_start"() <{level = 10 : i32, message = "bqk,bkd->bqd"}> : () -> ()
    %cst_46 = arith.constant dense<0.000000e+00> : vector<2x8x8xf32>
    %188 = tpu.matmul %186, %187, %cst_46 {dimension_numbers = #tpu.dot_dimension_numbers<[2], [1], [1], [2], [0, 0, 0, 1, 1, 2], [0], [0]>} : vector<2x8x16xf32>, vector<2x16x8xf32>, vector<2x8x8xf32> -> vector<2x8x8xf32>
    "tpu.trace_stop"() : () -> ()
    %189 = vector.shape_cast %188 : vector<2x8x8xf32> to vector<16x8xf32>
    %190 = vector.extract_strided_slice %137 {offsets = [0, 0, 24], sizes = [2, 8, 8], strides = [1, 1, 1]} : vector<2x8x32xf32> to vector<2x8x8xf32>
    %191 = vector.extract_strided_slice %138 {offsets = [0, 0, 24], sizes = [2, 16, 8], strides = [1, 1, 1]} : vector<2x16x32xf32> to vector<2x16x8xf32>
    "tpu.trace_start"() <{level = 10 : i32, message = "bqd,bkd->bqk"}> : () -> ()
    %cst_47 = arith.constant dense<0.000000e+00> : vector<2x8x16xf32>
    %192 = tpu.matmul %190, %191, %cst_47 {dimension_numbers = #tpu.dot_dimension_numbers<[2], [2], [1], [1], [0, 0, 0, 1, 1, 1], [0], [0]>} : vector<2x8x8xf32>, vector<2x16x8xf32>, vector<2x8x16xf32> -> vector<2x8x16xf32>
    "tpu.trace_stop"() : () -> ()
    %193 = arith.addf %192, %141 : vector<2x8x16xf32>
    %cst_48 = arith.constant dense<0xFF800000> : vector<2x8xf32>
    %194 = vector.multi_reduction <maximumf>, %193, %cst_48 [2] : vector<2x8x16xf32> to vector<2x8xf32>
    %195 = vector.shape_cast %194 : vector<2x8xf32> to vector<2x8x1xf32>
    %196 = vector.broadcast %195 : vector<2x8x1xf32> to vector<2x8x16xf32>
    %197 = arith.subf %193, %196 : vector<2x8x16xf32>
    %198 = math.exp %197 : vector<2x8x16xf32>
    %cst_49 = arith.constant dense<0.000000e+00> : vector<2x8xf32>
    %199 = vector.multi_reduction <add>, %198, %cst_49 [2] : vector<2x8x16xf32> to vector<2x8xf32>
    %200 = vector.shape_cast %199 : vector<2x8xf32> to vector<2x8x1xf32>
    %201 = vector.broadcast %200 : vector<2x8x1xf32> to vector<2x8x16xf32>
    %202 = arith.divf %198, %201 : vector<2x8x16xf32>
    %203 = vector.extract_strided_slice %139 {offsets = [0, 0, 24], sizes = [2, 16, 8], strides = [1, 1, 1]} : vector<2x16x32xf32> to vector<2x16x8xf32>
    "tpu.trace_start"() <{level = 10 : i32, message = "bqk,bkd->bqd"}> : () -> ()
    %cst_50 = arith.constant dense<0.000000e+00> : vector<2x8x8xf32>
    %204 = tpu.matmul %202, %203, %cst_50 {dimension_numbers = #tpu.dot_dimension_numbers<[2], [1], [1], [2], [0, 0, 0, 1, 1, 2], [0], [0]>} : vector<2x8x16xf32>, vector<2x16x8xf32>, vector<2x8x8xf32> -> vector<2x8x8xf32>
    "tpu.trace_stop"() : () -> ()
    %205 = vector.shape_cast %204 : vector<2x8x8xf32> to vector<16x8xf32>
    %206 = tpu.concatenate %157, %173, %189, %205 in 1 : vector<16x8xf32>, vector<16x8xf32>, vector<16x8xf32>, vector<16x8xf32> -> vector<16x32xf32>
    %cst_51 = arith.constant dense<0.000000e+00> : vector<16x32xf32>
    %207 = tpu.matmul %206, %11, %cst_51 {dimension_numbers = #tpu.dot_dimension_numbers<[1], [0], [0], [1], [0, 0, 1, 1], [], []>} : vector<16x32xf32>, vector<32x32xf32>, vector<16x32xf32> -> vector<16x32xf32>
    %208 = vector.broadcast %19 : vector<1x32xf32> to vector<16x32xf32>
    %209 = arith.addf %207, %208 : vector<16x32xf32>
    %210 = arith.addf %124, %209 : vector<16x32xf32>
    %cst_52 = arith.constant dense<0.000000e+00> : vector<16xf32>
    %211 = vector.multi_reduction <add>, %210, %cst_52 [1] : vector<16x32xf32> to vector<16xf32>
    %212 = vector.shape_cast %211 : vector<16xf32> to vector<16x1xf32>
    %cst_53 = arith.constant 3.200000e+01 : f32
    %213 = vector.broadcast %cst_53 : f32 to vector<16x1xf32>
    %214 = arith.divf %212, %213 : vector<16x1xf32>
    %215 = vector.broadcast %214 : vector<16x1xf32> to vector<16x32xf32>
    %216 = arith.subf %210, %215 : vector<16x32xf32>
    %217 = arith.mulf %216, %216 : vector<16x32xf32>
    %cst_54 = arith.constant dense<0.000000e+00> : vector<16xf32>
    %218 = vector.multi_reduction <add>, %217, %cst_54 [1] : vector<16x32xf32> to vector<16xf32>
    %219 = vector.shape_cast %218 : vector<16xf32> to vector<16x1xf32>
    %cst_55 = arith.constant 3.200000e+01 : f32
    %220 = vector.broadcast %cst_55 : f32 to vector<16x1xf32>
    %221 = arith.divf %219, %220 : vector<16x1xf32>
    %222 = vector.broadcast %214 : vector<16x1xf32> to vector<16x32xf32>
    %223 = arith.subf %210, %222 : vector<16x32xf32>
    %cst_56 = arith.constant 9.99999974E-6 : f32
    %224 = vector.broadcast %cst_56 : f32 to vector<16x1xf32>
    %225 = arith.addf %221, %224 : vector<16x1xf32>
    %226 = math.rsqrt %225 : vector<16x1xf32>
    %227 = vector.broadcast %226 : vector<16x1xf32> to vector<16x32xf32>
    %228 = arith.mulf %223, %227 : vector<16x32xf32>
    %229 = vector.broadcast %16 : vector<1x32xf32> to vector<16x32xf32>
    %230 = arith.mulf %228, %229 : vector<16x32xf32>
    %231 = vector.broadcast %17 : vector<1x32xf32> to vector<16x32xf32>
    %232 = arith.addf %230, %231 : vector<16x32xf32>
    %c0_57 = arith.constant 0 : index
    %c0_58 = arith.constant 0 : index
    %233 = vector.load %arg7[%c0_57, %c0_58] : memref<32x2048xbf16, #tpu.memory_space<vmem>>, vector<32x2048xbf16>
    %cst_59 = arith.constant dense<0.000000e+00> : vector<16x2048xf32>
    %234 = tpu.matmul %232, %233, %cst_59 {dimension_numbers = #tpu.dot_dimension_numbers<[1], [0], [0], [1], [0, 0, 1, 1], [], []>} : vector<16x32xf32>, vector<32x2048xbf16>, vector<16x2048xf32> -> vector<16x2048xf32>
    %c0_60 = arith.constant 0 : index
    %c0_61 = arith.constant 0 : index
    %235 = vector.load %arg9[%c0_60, %c0_61] : memref<1x2048xf32, #tpu.memory_space<vmem>>, vector<1x2048xf32>
    %236 = vector.broadcast %235 : vector<1x2048xf32> to vector<16x2048xf32>
    %237 = arith.addf %234, %236 : vector<16x2048xf32>
    %cst_62 = arith.constant 0.000000e+00 : f32
    %238 = vector.broadcast %cst_62 : f32 to vector<16x2048xf32>
    %239 = arith.maximumf %237, %238 : vector<16x2048xf32>
    %c0_63 = arith.constant 0 : index
    %c0_64 = arith.constant 0 : index
    %240 = vector.load %arg8[%c0_63, %c0_64] : memref<2048x32xbf16, #tpu.memory_space<vmem>>, vector<2048x32xbf16>
    %cst_65 = arith.constant dense<0.000000e+00> : vector<16x32xf32>
    %241 = tpu.matmul %239, %240, %cst_65 {dimension_numbers = #tpu.dot_dimension_numbers<[1], [0], [0], [1], [0, 0, 1, 1], [], []>} : vector<16x2048xf32>, vector<2048x32xbf16>, vector<16x32xf32> -> vector<16x32xf32>
    %242 = vector.broadcast %20 : vector<1x32xf32> to vector<16x32xf32>
    %243 = arith.addf %241, %242 : vector<16x32xf32>
    %244 = arith.addf %232, %243 : vector<16x32xf32>
    %cst_66 = arith.constant dense<0.000000e+00> : vector<16xf32>
    %245 = vector.multi_reduction <add>, %244, %cst_66 [1] : vector<16x32xf32> to vector<16xf32>
    %246 = vector.shape_cast %245 : vector<16xf32> to vector<16x1xf32>
    %cst_67 = arith.constant 3.200000e+01 : f32
    %247 = vector.broadcast %cst_67 : f32 to vector<16x1xf32>
    %248 = arith.divf %246, %247 : vector<16x1xf32>
    %249 = vector.broadcast %248 : vector<16x1xf32> to vector<16x32xf32>
    %250 = arith.subf %244, %249 : vector<16x32xf32>
    %251 = arith.mulf %250, %250 : vector<16x32xf32>
    %cst_68 = arith.constant dense<0.000000e+00> : vector<16xf32>
    %252 = vector.multi_reduction <add>, %251, %cst_68 [1] : vector<16x32xf32> to vector<16xf32>
    %253 = vector.shape_cast %252 : vector<16xf32> to vector<16x1xf32>
    %cst_69 = arith.constant 3.200000e+01 : f32
    %254 = vector.broadcast %cst_69 : f32 to vector<16x1xf32>
    %255 = arith.divf %253, %254 : vector<16x1xf32>
    %256 = vector.broadcast %248 : vector<16x1xf32> to vector<16x32xf32>
    %257 = arith.subf %244, %256 : vector<16x32xf32>
    %cst_70 = arith.constant 9.99999974E-6 : f32
    %258 = vector.broadcast %cst_70 : f32 to vector<16x1xf32>
    %259 = arith.addf %255, %258 : vector<16x1xf32>
    %260 = math.rsqrt %259 : vector<16x1xf32>
    %261 = vector.broadcast %260 : vector<16x1xf32> to vector<16x32xf32>
    %262 = arith.mulf %257, %261 : vector<16x32xf32>
    %263 = vector.broadcast %21 : vector<1x32xf32> to vector<16x32xf32>
    %264 = arith.mulf %262, %263 : vector<16x32xf32>
    %265 = vector.broadcast %22 : vector<1x32xf32> to vector<16x32xf32>
    %266 = arith.addf %264, %265 : vector<16x32xf32>
    %c0_71 = arith.constant 0 : index
    %c0_72 = arith.constant 0 : index
    %267 = vector.load %arg10[%c0_71, %c0_72] : memref<64x128xf32, #tpu.memory_space<vmem>>, vector<64x128xf32>
    %c0_73 = arith.constant 0 : index
    %c0_74 = arith.constant 0 : index
    %268 = vector.load %arg11[%c0_73, %c0_74] : memref<8x128xf32, #tpu.memory_space<vmem>>, vector<8x128xf32>
    %269 = vector.extract_strided_slice %267 {offsets = [0, 0], sizes = [32, 96], strides = [1, 1]} : vector<64x128xf32> to vector<32x96xf32>
    %270 = vector.extract_strided_slice %267 {offsets = [0, 96], sizes = [32, 32], strides = [1, 1]} : vector<64x128xf32> to vector<32x32xf32>
    %271 = vector.extract_strided_slice %267 {offsets = [32, 0], sizes = [32, 96], strides = [1, 1]} : vector<64x128xf32> to vector<32x96xf32>
    %272 = vector.extract_strided_slice %267 {offsets = [32, 96], sizes = [32, 32], strides = [1, 1]} : vector<64x128xf32> to vector<32x32xf32>
    %273 = vector.extract_strided_slice %268 {offsets = [0, 0], sizes = [1, 96], strides = [1, 1]} : vector<8x128xf32> to vector<1x96xf32>
    %274 = vector.extract_strided_slice %268 {offsets = [0, 96], sizes = [1, 32], strides = [1, 1]} : vector<8x128xf32> to vector<1x32xf32>
    %275 = vector.extract_strided_slice %268 {offsets = [1, 0], sizes = [1, 32], strides = [1, 1]} : vector<8x128xf32> to vector<1x32xf32>
    %276 = vector.extract_strided_slice %268 {offsets = [1, 32], sizes = [1, 32], strides = [1, 1]} : vector<8x128xf32> to vector<1x32xf32>
    %277 = vector.extract_strided_slice %268 {offsets = [1, 64], sizes = [1, 32], strides = [1, 1]} : vector<8x128xf32> to vector<1x32xf32>
    %278 = vector.extract_strided_slice %268 {offsets = [1, 96], sizes = [1, 32], strides = [1, 1]} : vector<8x128xf32> to vector<1x32xf32>
    %279 = vector.extract_strided_slice %268 {offsets = [2, 0], sizes = [1, 96], strides = [1, 1]} : vector<8x128xf32> to vector<1x96xf32>
    %280 = vector.extract_strided_slice %268 {offsets = [2, 96], sizes = [1, 32], strides = [1, 1]} : vector<8x128xf32> to vector<1x32xf32>
    %281 = vector.extract_strided_slice %268 {offsets = [3, 0], sizes = [1, 32], strides = [1, 1]} : vector<8x128xf32> to vector<1x32xf32>
    %282 = vector.extract_strided_slice %268 {offsets = [3, 32], sizes = [1, 32], strides = [1, 1]} : vector<8x128xf32> to vector<1x32xf32>
    %283 = vector.extract_strided_slice %268 {offsets = [3, 64], sizes = [1, 32], strides = [1, 1]} : vector<8x128xf32> to vector<1x32xf32>
    %cst_75 = arith.constant dense<0.000000e+00> : vector<16x96xf32>
    %284 = tpu.matmul %266, %269, %cst_75 {dimension_numbers = #tpu.dot_dimension_numbers<[1], [0], [0], [1], [0, 0, 1, 1], [], []>} : vector<16x32xf32>, vector<32x96xf32>, vector<16x96xf32> -> vector<16x96xf32>
    %285 = vector.broadcast %273 : vector<1x96xf32> to vector<16x96xf32>
    %286 = arith.addf %284, %285 : vector<16x96xf32>
    %287 = vector.extract_strided_slice %286 {offsets = [0, 0], sizes = [16, 32], strides = [1, 1]} : vector<16x96xf32> to vector<16x32xf32>
    %288 = vector.extract_strided_slice %286 {offsets = [0, 32], sizes = [16, 32], strides = [1, 1]} : vector<16x96xf32> to vector<16x32xf32>
    %289 = vector.extract_strided_slice %286 {offsets = [0, 64], sizes = [16, 32], strides = [1, 1]} : vector<16x96xf32> to vector<16x32xf32>
    %290 = vector.shape_cast %287 : vector<16x32xf32> to vector<2x8x32xf32>
    %291 = vector.shape_cast %288 : vector<16x32xf32> to vector<2x8x32xf32>
    %292 = vector.shape_cast %289 : vector<16x32xf32> to vector<2x8x32xf32>
    %293 = vector.shape_cast %3 : vector<1x1x8xf32> to vector<1x1x8xf32>
    %294 = vector.broadcast %293 : vector<1x1x8xf32> to vector<2x8x8xf32>
    %295 = vector.extract_strided_slice %290 {offsets = [0, 0, 0], sizes = [2, 8, 8], strides = [1, 1, 1]} : vector<2x8x32xf32> to vector<2x8x8xf32>
    %296 = vector.extract_strided_slice %291 {offsets = [0, 0, 0], sizes = [2, 8, 8], strides = [1, 1, 1]} : vector<2x8x32xf32> to vector<2x8x8xf32>
    "tpu.trace_start"() <{level = 10 : i32, message = "bqd,bkd->bqk"}> : () -> ()
    %cst_76 = arith.constant dense<0.000000e+00> : vector<2x8x8xf32>
    %297 = tpu.matmul %295, %296, %cst_76 {dimension_numbers = #tpu.dot_dimension_numbers<[2], [2], [1], [1], [0, 0, 0, 1, 1, 1], [0], [0]>} : vector<2x8x8xf32>, vector<2x8x8xf32>, vector<2x8x8xf32> -> vector<2x8x8xf32>
    "tpu.trace_stop"() : () -> ()
    %298 = arith.addf %297, %294 : vector<2x8x8xf32>
    %cst_77 = arith.constant dense<0xFF800000> : vector<2x8xf32>
    %299 = vector.multi_reduction <maximumf>, %298, %cst_77 [2] : vector<2x8x8xf32> to vector<2x8xf32>
    %300 = vector.shape_cast %299 : vector<2x8xf32> to vector<2x8x1xf32>
    %301 = vector.broadcast %300 : vector<2x8x1xf32> to vector<2x8x8xf32>
    %302 = arith.subf %298, %301 : vector<2x8x8xf32>
    %303 = math.exp %302 : vector<2x8x8xf32>
    %cst_78 = arith.constant dense<0.000000e+00> : vector<2x8xf32>
    %304 = vector.multi_reduction <add>, %303, %cst_78 [2] : vector<2x8x8xf32> to vector<2x8xf32>
    %305 = vector.shape_cast %304 : vector<2x8xf32> to vector<2x8x1xf32>
    %306 = vector.broadcast %305 : vector<2x8x1xf32> to vector<2x8x8xf32>
    %307 = arith.divf %303, %306 : vector<2x8x8xf32>
    %308 = vector.extract_strided_slice %292 {offsets = [0, 0, 0], sizes = [2, 8, 8], strides = [1, 1, 1]} : vector<2x8x32xf32> to vector<2x8x8xf32>
    "tpu.trace_start"() <{level = 10 : i32, message = "bqk,bkd->bqd"}> : () -> ()
    %cst_79 = arith.constant dense<0.000000e+00> : vector<2x8x8xf32>
    %309 = tpu.matmul %307, %308, %cst_79 {dimension_numbers = #tpu.dot_dimension_numbers<[2], [1], [1], [2], [0, 0, 0, 1, 1, 2], [0], [0]>} : vector<2x8x8xf32>, vector<2x8x8xf32>, vector<2x8x8xf32> -> vector<2x8x8xf32>
    "tpu.trace_stop"() : () -> ()
    %310 = vector.shape_cast %309 : vector<2x8x8xf32> to vector<16x8xf32>
    %311 = vector.extract_strided_slice %290 {offsets = [0, 0, 8], sizes = [2, 8, 8], strides = [1, 1, 1]} : vector<2x8x32xf32> to vector<2x8x8xf32>
    %312 = vector.extract_strided_slice %291 {offsets = [0, 0, 8], sizes = [2, 8, 8], strides = [1, 1, 1]} : vector<2x8x32xf32> to vector<2x8x8xf32>
    "tpu.trace_start"() <{level = 10 : i32, message = "bqd,bkd->bqk"}> : () -> ()
    %cst_80 = arith.constant dense<0.000000e+00> : vector<2x8x8xf32>
    %313 = tpu.matmul %311, %312, %cst_80 {dimension_numbers = #tpu.dot_dimension_numbers<[2], [2], [1], [1], [0, 0, 0, 1, 1, 1], [0], [0]>} : vector<2x8x8xf32>, vector<2x8x8xf32>, vector<2x8x8xf32> -> vector<2x8x8xf32>
    "tpu.trace_stop"() : () -> ()
    %314 = arith.addf %313, %294 : vector<2x8x8xf32>
    %cst_81 = arith.constant dense<0xFF800000> : vector<2x8xf32>
    %315 = vector.multi_reduction <maximumf>, %314, %cst_81 [2] : vector<2x8x8xf32> to vector<2x8xf32>
    %316 = vector.shape_cast %315 : vector<2x8xf32> to vector<2x8x1xf32>
    %317 = vector.broadcast %316 : vector<2x8x1xf32> to vector<2x8x8xf32>
    %318 = arith.subf %314, %317 : vector<2x8x8xf32>
    %319 = math.exp %318 : vector<2x8x8xf32>
    %cst_82 = arith.constant dense<0.000000e+00> : vector<2x8xf32>
    %320 = vector.multi_reduction <add>, %319, %cst_82 [2] : vector<2x8x8xf32> to vector<2x8xf32>
    %321 = vector.shape_cast %320 : vector<2x8xf32> to vector<2x8x1xf32>
    %322 = vector.broadcast %321 : vector<2x8x1xf32> to vector<2x8x8xf32>
    %323 = arith.divf %319, %322 : vector<2x8x8xf32>
    %324 = vector.extract_strided_slice %292 {offsets = [0, 0, 8], sizes = [2, 8, 8], strides = [1, 1, 1]} : vector<2x8x32xf32> to vector<2x8x8xf32>
    "tpu.trace_start"() <{level = 10 : i32, message = "bqk,bkd->bqd"}> : () -> ()
    %cst_83 = arith.constant dense<0.000000e+00> : vector<2x8x8xf32>
    %325 = tpu.matmul %323, %324, %cst_83 {dimension_numbers = #tpu.dot_dimension_numbers<[2], [1], [1], [2], [0, 0, 0, 1, 1, 2], [0], [0]>} : vector<2x8x8xf32>, vector<2x8x8xf32>, vector<2x8x8xf32> -> vector<2x8x8xf32>
    "tpu.trace_stop"() : () -> ()
    %326 = vector.shape_cast %325 : vector<2x8x8xf32> to vector<16x8xf32>
    %327 = vector.extract_strided_slice %290 {offsets = [0, 0, 16], sizes = [2, 8, 8], strides = [1, 1, 1]} : vector<2x8x32xf32> to vector<2x8x8xf32>
    %328 = vector.extract_strided_slice %291 {offsets = [0, 0, 16], sizes = [2, 8, 8], strides = [1, 1, 1]} : vector<2x8x32xf32> to vector<2x8x8xf32>
    "tpu.trace_start"() <{level = 10 : i32, message = "bqd,bkd->bqk"}> : () -> ()
    %cst_84 = arith.constant dense<0.000000e+00> : vector<2x8x8xf32>
    %329 = tpu.matmul %327, %328, %cst_84 {dimension_numbers = #tpu.dot_dimension_numbers<[2], [2], [1], [1], [0, 0, 0, 1, 1, 1], [0], [0]>} : vector<2x8x8xf32>, vector<2x8x8xf32>, vector<2x8x8xf32> -> vector<2x8x8xf32>
    "tpu.trace_stop"() : () -> ()
    %330 = arith.addf %329, %294 : vector<2x8x8xf32>
    %cst_85 = arith.constant dense<0xFF800000> : vector<2x8xf32>
    %331 = vector.multi_reduction <maximumf>, %330, %cst_85 [2] : vector<2x8x8xf32> to vector<2x8xf32>
    %332 = vector.shape_cast %331 : vector<2x8xf32> to vector<2x8x1xf32>
    %333 = vector.broadcast %332 : vector<2x8x1xf32> to vector<2x8x8xf32>
    %334 = arith.subf %330, %333 : vector<2x8x8xf32>
    %335 = math.exp %334 : vector<2x8x8xf32>
    %cst_86 = arith.constant dense<0.000000e+00> : vector<2x8xf32>
    %336 = vector.multi_reduction <add>, %335, %cst_86 [2] : vector<2x8x8xf32> to vector<2x8xf32>
    %337 = vector.shape_cast %336 : vector<2x8xf32> to vector<2x8x1xf32>
    %338 = vector.broadcast %337 : vector<2x8x1xf32> to vector<2x8x8xf32>
    %339 = arith.divf %335, %338 : vector<2x8x8xf32>
    %340 = vector.extract_strided_slice %292 {offsets = [0, 0, 16], sizes = [2, 8, 8], strides = [1, 1, 1]} : vector<2x8x32xf32> to vector<2x8x8xf32>
    "tpu.trace_start"() <{level = 10 : i32, message = "bqk,bkd->bqd"}> : () -> ()
    %cst_87 = arith.constant dense<0.000000e+00> : vector<2x8x8xf32>
    %341 = tpu.matmul %339, %340, %cst_87 {dimension_numbers = #tpu.dot_dimension_numbers<[2], [1], [1], [2], [0, 0, 0, 1, 1, 2], [0], [0]>} : vector<2x8x8xf32>, vector<2x8x8xf32>, vector<2x8x8xf32> -> vector<2x8x8xf32>
    "tpu.trace_stop"() : () -> ()
    %342 = vector.shape_cast %341 : vector<2x8x8xf32> to vector<16x8xf32>
    %343 = vector.extract_strided_slice %290 {offsets = [0, 0, 24], sizes = [2, 8, 8], strides = [1, 1, 1]} : vector<2x8x32xf32> to vector<2x8x8xf32>
    %344 = vector.extract_strided_slice %291 {offsets = [0, 0, 24], sizes = [2, 8, 8], strides = [1, 1, 1]} : vector<2x8x32xf32> to vector<2x8x8xf32>
    "tpu.trace_start"() <{level = 10 : i32, message = "bqd,bkd->bqk"}> : () -> ()
    %cst_88 = arith.constant dense<0.000000e+00> : vector<2x8x8xf32>
    %345 = tpu.matmul %343, %344, %cst_88 {dimension_numbers = #tpu.dot_dimension_numbers<[2], [2], [1], [1], [0, 0, 0, 1, 1, 1], [0], [0]>} : vector<2x8x8xf32>, vector<2x8x8xf32>, vector<2x8x8xf32> -> vector<2x8x8xf32>
    "tpu.trace_stop"() : () -> ()
    %346 = arith.addf %345, %294 : vector<2x8x8xf32>
    %cst_89 = arith.constant dense<0xFF800000> : vector<2x8xf32>
    %347 = vector.multi_reduction <maximumf>, %346, %cst_89 [2] : vector<2x8x8xf32> to vector<2x8xf32>
    %348 = vector.shape_cast %347 : vector<2x8xf32> to vector<2x8x1xf32>
    %349 = vector.broadcast %348 : vector<2x8x1xf32> to vector<2x8x8xf32>
    %350 = arith.subf %346, %349 : vector<2x8x8xf32>
    %351 = math.exp %350 : vector<2x8x8xf32>
    %cst_90 = arith.constant dense<0.000000e+00> : vector<2x8xf32>
    %352 = vector.multi_reduction <add>, %351, %cst_90 [2] : vector<2x8x8xf32> to vector<2x8xf32>
    %353 = vector.shape_cast %352 : vector<2x8xf32> to vector<2x8x1xf32>
    %354 = vector.broadcast %353 : vector<2x8x1xf32> to vector<2x8x8xf32>
    %355 = arith.divf %351, %354 : vector<2x8x8xf32>
    %356 = vector.extract_strided_slice %292 {offsets = [0, 0, 24], sizes = [2, 8, 8], strides = [1, 1, 1]} : vector<2x8x32xf32> to vector<2x8x8xf32>
    "tpu.trace_start"() <{level = 10 : i32, message = "bqk,bkd->bqd"}> : () -> ()
    %cst_91 = arith.constant dense<0.000000e+00> : vector<2x8x8xf32>
    %357 = tpu.matmul %355, %356, %cst_91 {dimension_numbers = #tpu.dot_dimension_numbers<[2], [1], [1], [2], [0, 0, 0, 1, 1, 2], [0], [0]>} : vector<2x8x8xf32>, vector<2x8x8xf32>, vector<2x8x8xf32> -> vector<2x8x8xf32>
    "tpu.trace_stop"() : () -> ()
    %358 = vector.shape_cast %357 : vector<2x8x8xf32> to vector<16x8xf32>
    %359 = tpu.concatenate %310, %326, %342, %358 in 1 : vector<16x8xf32>, vector<16x8xf32>, vector<16x8xf32>, vector<16x8xf32> -> vector<16x32xf32>
    %cst_92 = arith.constant dense<0.000000e+00> : vector<16x32xf32>
    %360 = tpu.matmul %359, %270, %cst_92 {dimension_numbers = #tpu.dot_dimension_numbers<[1], [0], [0], [1], [0, 0, 1, 1], [], []>} : vector<16x32xf32>, vector<32x32xf32>, vector<16x32xf32> -> vector<16x32xf32>
    %361 = vector.broadcast %274 : vector<1x32xf32> to vector<16x32xf32>
    %362 = arith.addf %360, %361 : vector<16x32xf32>
    %363 = arith.addf %266, %362 : vector<16x32xf32>
    %cst_93 = arith.constant dense<0.000000e+00> : vector<16xf32>
    %364 = vector.multi_reduction <add>, %363, %cst_93 [1] : vector<16x32xf32> to vector<16xf32>
    %365 = vector.shape_cast %364 : vector<16xf32> to vector<16x1xf32>
    %cst_94 = arith.constant 3.200000e+01 : f32
    %366 = vector.broadcast %cst_94 : f32 to vector<16x1xf32>
    %367 = arith.divf %365, %366 : vector<16x1xf32>
    %368 = vector.broadcast %367 : vector<16x1xf32> to vector<16x32xf32>
    %369 = arith.subf %363, %368 : vector<16x32xf32>
    %370 = arith.mulf %369, %369 : vector<16x32xf32>
    %cst_95 = arith.constant dense<0.000000e+00> : vector<16xf32>
    %371 = vector.multi_reduction <add>, %370, %cst_95 [1] : vector<16x32xf32> to vector<16xf32>
    %372 = vector.shape_cast %371 : vector<16xf32> to vector<16x1xf32>
    %cst_96 = arith.constant 3.200000e+01 : f32
    %373 = vector.broadcast %cst_96 : f32 to vector<16x1xf32>
    %374 = arith.divf %372, %373 : vector<16x1xf32>
    %375 = vector.broadcast %367 : vector<16x1xf32> to vector<16x32xf32>
    %376 = arith.subf %363, %375 : vector<16x32xf32>
    %cst_97 = arith.constant 9.99999974E-6 : f32
    %377 = vector.broadcast %cst_97 : f32 to vector<16x1xf32>
    %378 = arith.addf %374, %377 : vector<16x1xf32>
    %379 = math.rsqrt %378 : vector<16x1xf32>
    %380 = vector.broadcast %379 : vector<16x1xf32> to vector<16x32xf32>
    %381 = arith.mulf %376, %380 : vector<16x32xf32>
    %382 = vector.broadcast %275 : vector<1x32xf32> to vector<16x32xf32>
    %383 = arith.mulf %381, %382 : vector<16x32xf32>
    %384 = vector.broadcast %276 : vector<1x32xf32> to vector<16x32xf32>
    %385 = arith.addf %383, %384 : vector<16x32xf32>
    %386 = vector.extract_strided_slice %271 {offsets = [0, 0], sizes = [32, 32], strides = [1, 1]} : vector<32x96xf32> to vector<32x32xf32>
    %cst_98 = arith.constant dense<0.000000e+00> : vector<16x32xf32>
    %387 = tpu.matmul %385, %386, %cst_98 {dimension_numbers = #tpu.dot_dimension_numbers<[1], [0], [0], [1], [0, 0, 1, 1], [], []>} : vector<16x32xf32>, vector<32x32xf32>, vector<16x32xf32> -> vector<16x32xf32>
    %388 = vector.extract_strided_slice %279 {offsets = [0, 0], sizes = [1, 32], strides = [1, 1]} : vector<1x96xf32> to vector<1x32xf32>
    %389 = vector.broadcast %388 : vector<1x32xf32> to vector<16x32xf32>
    %390 = arith.addf %387, %389 : vector<16x32xf32>
    %391 = vector.extract_strided_slice %271 {offsets = [0, 32], sizes = [32, 64], strides = [1, 1]} : vector<32x96xf32> to vector<32x64xf32>
    %cst_99 = arith.constant dense<0.000000e+00> : vector<32x64xf32>
    %392 = tpu.matmul %1, %391, %cst_99 {dimension_numbers = #tpu.dot_dimension_numbers<[1], [0], [0], [1], [0, 0, 1, 1], [], []>} : vector<32x32xf32>, vector<32x64xf32>, vector<32x64xf32> -> vector<32x64xf32>
    %393 = vector.extract_strided_slice %279 {offsets = [0, 32], sizes = [1, 64], strides = [1, 1]} : vector<1x96xf32> to vector<1x64xf32>
    %394 = vector.broadcast %393 : vector<1x64xf32> to vector<32x64xf32>
    %395 = arith.addf %392, %394 : vector<32x64xf32>
    %396 = vector.extract_strided_slice %395 {offsets = [0, 0], sizes = [32, 32], strides = [1, 1]} : vector<32x64xf32> to vector<32x32xf32>
    %397 = vector.extract_strided_slice %395 {offsets = [0, 32], sizes = [32, 32], strides = [1, 1]} : vector<32x64xf32> to vector<32x32xf32>
    %398 = vector.shape_cast %390 : vector<16x32xf32> to vector<2x8x32xf32>
    %399 = vector.shape_cast %396 : vector<32x32xf32> to vector<2x16x32xf32>
    %400 = vector.shape_cast %397 : vector<32x32xf32> to vector<2x16x32xf32>
    %401 = vector.shape_cast %5 : vector<1x1x16xf32> to vector<1x1x16xf32>
    %402 = vector.broadcast %401 : vector<1x1x16xf32> to vector<2x8x16xf32>
    %403 = vector.extract_strided_slice %398 {offsets = [0, 0, 0], sizes = [2, 8, 8], strides = [1, 1, 1]} : vector<2x8x32xf32> to vector<2x8x8xf32>
    %404 = vector.extract_strided_slice %399 {offsets = [0, 0, 0], sizes = [2, 16, 8], strides = [1, 1, 1]} : vector<2x16x32xf32> to vector<2x16x8xf32>
    "tpu.trace_start"() <{level = 10 : i32, message = "bqd,bkd->bqk"}> : () -> ()
    %cst_100 = arith.constant dense<0.000000e+00> : vector<2x8x16xf32>
    %405 = tpu.matmul %403, %404, %cst_100 {dimension_numbers = #tpu.dot_dimension_numbers<[2], [2], [1], [1], [0, 0, 0, 1, 1, 1], [0], [0]>} : vector<2x8x8xf32>, vector<2x16x8xf32>, vector<2x8x16xf32> -> vector<2x8x16xf32>
    "tpu.trace_stop"() : () -> ()
    %406 = arith.addf %405, %402 : vector<2x8x16xf32>
    %cst_101 = arith.constant dense<0xFF800000> : vector<2x8xf32>
    %407 = vector.multi_reduction <maximumf>, %406, %cst_101 [2] : vector<2x8x16xf32> to vector<2x8xf32>
    %408 = vector.shape_cast %407 : vector<2x8xf32> to vector<2x8x1xf32>
    %409 = vector.broadcast %408 : vector<2x8x1xf32> to vector<2x8x16xf32>
    %410 = arith.subf %406, %409 : vector<2x8x16xf32>
    %411 = math.exp %410 : vector<2x8x16xf32>
    %cst_102 = arith.constant dense<0.000000e+00> : vector<2x8xf32>
    %412 = vector.multi_reduction <add>, %411, %cst_102 [2] : vector<2x8x16xf32> to vector<2x8xf32>
    %413 = vector.shape_cast %412 : vector<2x8xf32> to vector<2x8x1xf32>
    %414 = vector.broadcast %413 : vector<2x8x1xf32> to vector<2x8x16xf32>
    %415 = arith.divf %411, %414 : vector<2x8x16xf32>
    %416 = vector.extract_strided_slice %400 {offsets = [0, 0, 0], sizes = [2, 16, 8], strides = [1, 1, 1]} : vector<2x16x32xf32> to vector<2x16x8xf32>
    "tpu.trace_start"() <{level = 10 : i32, message = "bqk,bkd->bqd"}> : () -> ()
    %cst_103 = arith.constant dense<0.000000e+00> : vector<2x8x8xf32>
    %417 = tpu.matmul %415, %416, %cst_103 {dimension_numbers = #tpu.dot_dimension_numbers<[2], [1], [1], [2], [0, 0, 0, 1, 1, 2], [0], [0]>} : vector<2x8x16xf32>, vector<2x16x8xf32>, vector<2x8x8xf32> -> vector<2x8x8xf32>
    "tpu.trace_stop"() : () -> ()
    %418 = vector.shape_cast %417 : vector<2x8x8xf32> to vector<16x8xf32>
    %419 = vector.extract_strided_slice %398 {offsets = [0, 0, 8], sizes = [2, 8, 8], strides = [1, 1, 1]} : vector<2x8x32xf32> to vector<2x8x8xf32>
    %420 = vector.extract_strided_slice %399 {offsets = [0, 0, 8], sizes = [2, 16, 8], strides = [1, 1, 1]} : vector<2x16x32xf32> to vector<2x16x8xf32>
    "tpu.trace_start"() <{level = 10 : i32, message = "bqd,bkd->bqk"}> : () -> ()
    %cst_104 = arith.constant dense<0.000000e+00> : vector<2x8x16xf32>
    %421 = tpu.matmul %419, %420, %cst_104 {dimension_numbers = #tpu.dot_dimension_numbers<[2], [2], [1], [1], [0, 0, 0, 1, 1, 1], [0], [0]>} : vector<2x8x8xf32>, vector<2x16x8xf32>, vector<2x8x16xf32> -> vector<2x8x16xf32>
    "tpu.trace_stop"() : () -> ()
    %422 = arith.addf %421, %402 : vector<2x8x16xf32>
    %cst_105 = arith.constant dense<0xFF800000> : vector<2x8xf32>
    %423 = vector.multi_reduction <maximumf>, %422, %cst_105 [2] : vector<2x8x16xf32> to vector<2x8xf32>
    %424 = vector.shape_cast %423 : vector<2x8xf32> to vector<2x8x1xf32>
    %425 = vector.broadcast %424 : vector<2x8x1xf32> to vector<2x8x16xf32>
    %426 = arith.subf %422, %425 : vector<2x8x16xf32>
    %427 = math.exp %426 : vector<2x8x16xf32>
    %cst_106 = arith.constant dense<0.000000e+00> : vector<2x8xf32>
    %428 = vector.multi_reduction <add>, %427, %cst_106 [2] : vector<2x8x16xf32> to vector<2x8xf32>
    %429 = vector.shape_cast %428 : vector<2x8xf32> to vector<2x8x1xf32>
    %430 = vector.broadcast %429 : vector<2x8x1xf32> to vector<2x8x16xf32>
    %431 = arith.divf %427, %430 : vector<2x8x16xf32>
    %432 = vector.extract_strided_slice %400 {offsets = [0, 0, 8], sizes = [2, 16, 8], strides = [1, 1, 1]} : vector<2x16x32xf32> to vector<2x16x8xf32>
    "tpu.trace_start"() <{level = 10 : i32, message = "bqk,bkd->bqd"}> : () -> ()
    %cst_107 = arith.constant dense<0.000000e+00> : vector<2x8x8xf32>
    %433 = tpu.matmul %431, %432, %cst_107 {dimension_numbers = #tpu.dot_dimension_numbers<[2], [1], [1], [2], [0, 0, 0, 1, 1, 2], [0], [0]>} : vector<2x8x16xf32>, vector<2x16x8xf32>, vector<2x8x8xf32> -> vector<2x8x8xf32>
    "tpu.trace_stop"() : () -> ()
    %434 = vector.shape_cast %433 : vector<2x8x8xf32> to vector<16x8xf32>
    %435 = vector.extract_strided_slice %398 {offsets = [0, 0, 16], sizes = [2, 8, 8], strides = [1, 1, 1]} : vector<2x8x32xf32> to vector<2x8x8xf32>
    %436 = vector.extract_strided_slice %399 {offsets = [0, 0, 16], sizes = [2, 16, 8], strides = [1, 1, 1]} : vector<2x16x32xf32> to vector<2x16x8xf32>
    "tpu.trace_start"() <{level = 10 : i32, message = "bqd,bkd->bqk"}> : () -> ()
    %cst_108 = arith.constant dense<0.000000e+00> : vector<2x8x16xf32>
    %437 = tpu.matmul %435, %436, %cst_108 {dimension_numbers = #tpu.dot_dimension_numbers<[2], [2], [1], [1], [0, 0, 0, 1, 1, 1], [0], [0]>} : vector<2x8x8xf32>, vector<2x16x8xf32>, vector<2x8x16xf32> -> vector<2x8x16xf32>
    "tpu.trace_stop"() : () -> ()
    %438 = arith.addf %437, %402 : vector<2x8x16xf32>
    %cst_109 = arith.constant dense<0xFF800000> : vector<2x8xf32>
    %439 = vector.multi_reduction <maximumf>, %438, %cst_109 [2] : vector<2x8x16xf32> to vector<2x8xf32>
    %440 = vector.shape_cast %439 : vector<2x8xf32> to vector<2x8x1xf32>
    %441 = vector.broadcast %440 : vector<2x8x1xf32> to vector<2x8x16xf32>
    %442 = arith.subf %438, %441 : vector<2x8x16xf32>
    %443 = math.exp %442 : vector<2x8x16xf32>
    %cst_110 = arith.constant dense<0.000000e+00> : vector<2x8xf32>
    %444 = vector.multi_reduction <add>, %443, %cst_110 [2] : vector<2x8x16xf32> to vector<2x8xf32>
    %445 = vector.shape_cast %444 : vector<2x8xf32> to vector<2x8x1xf32>
    %446 = vector.broadcast %445 : vector<2x8x1xf32> to vector<2x8x16xf32>
    %447 = arith.divf %443, %446 : vector<2x8x16xf32>
    %448 = vector.extract_strided_slice %400 {offsets = [0, 0, 16], sizes = [2, 16, 8], strides = [1, 1, 1]} : vector<2x16x32xf32> to vector<2x16x8xf32>
    "tpu.trace_start"() <{level = 10 : i32, message = "bqk,bkd->bqd"}> : () -> ()
    %cst_111 = arith.constant dense<0.000000e+00> : vector<2x8x8xf32>
    %449 = tpu.matmul %447, %448, %cst_111 {dimension_numbers = #tpu.dot_dimension_numbers<[2], [1], [1], [2], [0, 0, 0, 1, 1, 2], [0], [0]>} : vector<2x8x16xf32>, vector<2x16x8xf32>, vector<2x8x8xf32> -> vector<2x8x8xf32>
    "tpu.trace_stop"() : () -> ()
    %450 = vector.shape_cast %449 : vector<2x8x8xf32> to vector<16x8xf32>
    %451 = vector.extract_strided_slice %398 {offsets = [0, 0, 24], sizes = [2, 8, 8], strides = [1, 1, 1]} : vector<2x8x32xf32> to vector<2x8x8xf32>
    %452 = vector.extract_strided_slice %399 {offsets = [0, 0, 24], sizes = [2, 16, 8], strides = [1, 1, 1]} : vector<2x16x32xf32> to vector<2x16x8xf32>
    "tpu.trace_start"() <{level = 10 : i32, message = "bqd,bkd->bqk"}> : () -> ()
    %cst_112 = arith.constant dense<0.000000e+00> : vector<2x8x16xf32>
    %453 = tpu.matmul %451, %452, %cst_112 {dimension_numbers = #tpu.dot_dimension_numbers<[2], [2], [1], [1], [0, 0, 0, 1, 1, 1], [0], [0]>} : vector<2x8x8xf32>, vector<2x16x8xf32>, vector<2x8x16xf32> -> vector<2x8x16xf32>
    "tpu.trace_stop"() : () -> ()
    %454 = arith.addf %453, %402 : vector<2x8x16xf32>
    %cst_113 = arith.constant dense<0xFF800000> : vector<2x8xf32>
    %455 = vector.multi_reduction <maximumf>, %454, %cst_113 [2] : vector<2x8x16xf32> to vector<2x8xf32>
    %456 = vector.shape_cast %455 : vector<2x8xf32> to vector<2x8x1xf32>
    %457 = vector.broadcast %456 : vector<2x8x1xf32> to vector<2x8x16xf32>
    %458 = arith.subf %454, %457 : vector<2x8x16xf32>
    %459 = math.exp %458 : vector<2x8x16xf32>
    %cst_114 = arith.constant dense<0.000000e+00> : vector<2x8xf32>
    %460 = vector.multi_reduction <add>, %459, %cst_114 [2] : vector<2x8x16xf32> to vector<2x8xf32>
    %461 = vector.shape_cast %460 : vector<2x8xf32> to vector<2x8x1xf32>
    %462 = vector.broadcast %461 : vector<2x8x1xf32> to vector<2x8x16xf32>
    %463 = arith.divf %459, %462 : vector<2x8x16xf32>
    %464 = vector.extract_strided_slice %400 {offsets = [0, 0, 24], sizes = [2, 16, 8], strides = [1, 1, 1]} : vector<2x16x32xf32> to vector<2x16x8xf32>
    "tpu.trace_start"() <{level = 10 : i32, message = "bqk,bkd->bqd"}> : () -> ()
    %cst_115 = arith.constant dense<0.000000e+00> : vector<2x8x8xf32>
    %465 = tpu.matmul %463, %464, %cst_115 {dimension_numbers = #tpu.dot_dimension_numbers<[2], [1], [1], [2], [0, 0, 0, 1, 1, 2], [0], [0]>} : vector<2x8x16xf32>, vector<2x16x8xf32>, vector<2x8x8xf32> -> vector<2x8x8xf32>
    "tpu.trace_stop"() : () -> ()
    %466 = vector.shape_cast %465 : vector<2x8x8xf32> to vector<16x8xf32>
    %467 = tpu.concatenate %418, %434, %450, %466 in 1 : vector<16x8xf32>, vector<16x8xf32>, vector<16x8xf32>, vector<16x8xf32> -> vector<16x32xf32>
    %cst_116 = arith.constant dense<0.000000e+00> : vector<16x32xf32>
    %468 = tpu.matmul %467, %272, %cst_116 {dimension_numbers = #tpu.dot_dimension_numbers<[1], [0], [0], [1], [0, 0, 1, 1], [], []>} : vector<16x32xf32>, vector<32x32xf32>, vector<16x32xf32> -> vector<16x32xf32>
    %469 = vector.broadcast %280 : vector<1x32xf32> to vector<16x32xf32>
    %470 = arith.addf %468, %469 : vector<16x32xf32>
    %471 = arith.addf %385, %470 : vector<16x32xf32>
    %cst_117 = arith.constant dense<0.000000e+00> : vector<16xf32>
    %472 = vector.multi_reduction <add>, %471, %cst_117 [1] : vector<16x32xf32> to vector<16xf32>
    %473 = vector.shape_cast %472 : vector<16xf32> to vector<16x1xf32>
    %cst_118 = arith.constant 3.200000e+01 : f32
    %474 = vector.broadcast %cst_118 : f32 to vector<16x1xf32>
    %475 = arith.divf %473, %474 : vector<16x1xf32>
    %476 = vector.broadcast %475 : vector<16x1xf32> to vector<16x32xf32>
    %477 = arith.subf %471, %476 : vector<16x32xf32>
    %478 = arith.mulf %477, %477 : vector<16x32xf32>
    %cst_119 = arith.constant dense<0.000000e+00> : vector<16xf32>
    %479 = vector.multi_reduction <add>, %478, %cst_119 [1] : vector<16x32xf32> to vector<16xf32>
    %480 = vector.shape_cast %479 : vector<16xf32> to vector<16x1xf32>
    %cst_120 = arith.constant 3.200000e+01 : f32
    %481 = vector.broadcast %cst_120 : f32 to vector<16x1xf32>
    %482 = arith.divf %480, %481 : vector<16x1xf32>
    %483 = vector.broadcast %475 : vector<16x1xf32> to vector<16x32xf32>
    %484 = arith.subf %471, %483 : vector<16x32xf32>
    %cst_121 = arith.constant 9.99999974E-6 : f32
    %485 = vector.broadcast %cst_121 : f32 to vector<16x1xf32>
    %486 = arith.addf %482, %485 : vector<16x1xf32>
    %487 = math.rsqrt %486 : vector<16x1xf32>
    %488 = vector.broadcast %487 : vector<16x1xf32> to vector<16x32xf32>
    %489 = arith.mulf %484, %488 : vector<16x32xf32>
    %490 = vector.broadcast %277 : vector<1x32xf32> to vector<16x32xf32>
    %491 = arith.mulf %489, %490 : vector<16x32xf32>
    %492 = vector.broadcast %278 : vector<1x32xf32> to vector<16x32xf32>
    %493 = arith.addf %491, %492 : vector<16x32xf32>
    %c0_122 = arith.constant 0 : index
    %c0_123 = arith.constant 0 : index
    %494 = vector.load %arg12[%c0_122, %c0_123] : memref<32x2048xbf16, #tpu.memory_space<vmem>>, vector<32x2048xbf16>
    %cst_124 = arith.constant dense<0.000000e+00> : vector<16x2048xf32>
    %495 = tpu.matmul %493, %494, %cst_124 {dimension_numbers = #tpu.dot_dimension_numbers<[1], [0], [0], [1], [0, 0, 1, 1], [], []>} : vector<16x32xf32>, vector<32x2048xbf16>, vector<16x2048xf32> -> vector<16x2048xf32>
    %c0_125 = arith.constant 0 : index
    %c0_126 = arith.constant 0 : index
    %496 = vector.load %arg14[%c0_125, %c0_126] : memref<1x2048xf32, #tpu.memory_space<vmem>>, vector<1x2048xf32>
    %497 = vector.broadcast %496 : vector<1x2048xf32> to vector<16x2048xf32>
    %498 = arith.addf %495, %497 : vector<16x2048xf32>
    %cst_127 = arith.constant 0.000000e+00 : f32
    %499 = vector.broadcast %cst_127 : f32 to vector<16x2048xf32>
    %500 = arith.maximumf %498, %499 : vector<16x2048xf32>
    %c0_128 = arith.constant 0 : index
    %c0_129 = arith.constant 0 : index
    %501 = vector.load %arg13[%c0_128, %c0_129] : memref<2048x32xbf16, #tpu.memory_space<vmem>>, vector<2048x32xbf16>
    %cst_130 = arith.constant dense<0.000000e+00> : vector<16x32xf32>
    %502 = tpu.matmul %500, %501, %cst_130 {dimension_numbers = #tpu.dot_dimension_numbers<[1], [0], [0], [1], [0, 0, 1, 1], [], []>} : vector<16x2048xf32>, vector<2048x32xbf16>, vector<16x32xf32> -> vector<16x32xf32>
    %503 = vector.broadcast %281 : vector<1x32xf32> to vector<16x32xf32>
    %504 = arith.addf %502, %503 : vector<16x32xf32>
    %505 = arith.addf %493, %504 : vector<16x32xf32>
    %cst_131 = arith.constant dense<0.000000e+00> : vector<16xf32>
    %506 = vector.multi_reduction <add>, %505, %cst_131 [1] : vector<16x32xf32> to vector<16xf32>
    %507 = vector.shape_cast %506 : vector<16xf32> to vector<16x1xf32>
    %cst_132 = arith.constant 3.200000e+01 : f32
    %508 = vector.broadcast %cst_132 : f32 to vector<16x1xf32>
    %509 = arith.divf %507, %508 : vector<16x1xf32>
    %510 = vector.broadcast %509 : vector<16x1xf32> to vector<16x32xf32>
    %511 = arith.subf %505, %510 : vector<16x32xf32>
    %512 = arith.mulf %511, %511 : vector<16x32xf32>
    %cst_133 = arith.constant dense<0.000000e+00> : vector<16xf32>
    %513 = vector.multi_reduction <add>, %512, %cst_133 [1] : vector<16x32xf32> to vector<16xf32>
    %514 = vector.shape_cast %513 : vector<16xf32> to vector<16x1xf32>
    %cst_134 = arith.constant 3.200000e+01 : f32
    %515 = vector.broadcast %cst_134 : f32 to vector<16x1xf32>
    %516 = arith.divf %514, %515 : vector<16x1xf32>
    %517 = vector.broadcast %509 : vector<16x1xf32> to vector<16x32xf32>
    %518 = arith.subf %505, %517 : vector<16x32xf32>
    %cst_135 = arith.constant 9.99999974E-6 : f32
    %519 = vector.broadcast %cst_135 : f32 to vector<16x1xf32>
    %520 = arith.addf %516, %519 : vector<16x1xf32>
    %521 = math.rsqrt %520 : vector<16x1xf32>
    %522 = vector.broadcast %521 : vector<16x1xf32> to vector<16x32xf32>
    %523 = arith.mulf %518, %522 : vector<16x32xf32>
    %524 = vector.broadcast %282 : vector<1x32xf32> to vector<16x32xf32>
    %525 = arith.mulf %523, %524 : vector<16x32xf32>
    %526 = vector.broadcast %283 : vector<1x32xf32> to vector<16x32xf32>
    %527 = arith.addf %525, %526 : vector<16x32xf32>
    %c0_136 = arith.constant 0 : index
    %c0_137 = arith.constant 0 : index
    %528 = vector.load %arg15[%c0_136, %c0_137] : memref<16x32xf32, #tpu.memory_space<vmem>>, vector<16x32xf32>
    tpu.vector_store %arg15[%c0_136, %c0_137], %527 {strides = array<i32>} : memref<16x32xf32, #tpu.memory_space<vmem>>, vector<16x32xf32>,
    return
  }
  func.func @transform_0(%arg0: i32) -> (i32, i32) {
    %c0_i32 = arith.constant 0 : i32
    %c0_i32_0 = arith.constant 0 : i32
    return %arg0, %c0_i32 : i32, i32
  }
  func.func @transform_1(%arg0: i32) -> (i32, i32) {
    %c0_i32 = arith.constant 0 : i32
    %c0_i32_0 = arith.constant 0 : i32
    return %arg0, %c0_i32 : i32, i32
  }
  func.func @transform_2(%arg0: i32) -> (i32, i32) {
    %c0_i32 = arith.constant 0 : i32
    %c0_i32_0 = arith.constant 0 : i32
    %c0_i32_1 = arith.constant 0 : i32
    return %c0_i32, %c0_i32_0 : i32, i32
  }
  func.func @transform_3(%arg0: i32) -> (i32, i32) {
    %c0_i32 = arith.constant 0 : i32
    %c0_i32_0 = arith.constant 0 : i32
    %c0_i32_1 = arith.constant 0 : i32
    return %c0_i32, %c0_i32_0 : i32, i32
  }
  func.func @transform_4(%arg0: i32) -> (i32, i32) {
    %c0_i32 = arith.constant 0 : i32
    %c0_i32_0 = arith.constant 0 : i32
    %c0_i32_1 = arith.constant 0 : i32
    return %c0_i32, %c0_i32_0 : i32, i32
  }
  func.func @transform_5(%arg0: i32) -> (i32, i32) {
    %c0_i32 = arith.constant 0 : i32
    %c0_i32_0 = arith.constant 0 : i32
    %c0_i32_1 = arith.constant 0 : i32
    return %c0_i32, %c0_i32_0 : i32, i32
  }
  func.func @transform_6(%arg0: i32) -> (i32, i32) {
    %c0_i32 = arith.constant 0 : i32
    %c0_i32_0 = arith.constant 0 : i32
    %c0_i32_1 = arith.constant 0 : i32
    return %c0_i32, %c0_i32_0 : i32, i32
  }
  func.func @transform_7(%arg0: i32) -> (i32, i32) {
    %c0_i32 = arith.constant 0 : i32
    %c0_i32_0 = arith.constant 0 : i32
    %c0_i32_1 = arith.constant 0 : i32
    return %c0_i32, %c0_i32_0 : i32, i32
  }
  func.func @transform_8(%arg0: i32) -> (i32, i32) {
    %c0_i32 = arith.constant 0 : i32
    %c0_i32_0 = arith.constant 0 : i32
    %c0_i32_1 = arith.constant 0 : i32
    return %c0_i32, %c0_i32_0 : i32, i32
  }
  func.func @transform_9(%arg0: i32) -> (i32, i32) {
    %c0_i32 = arith.constant 0 : i32
    %c0_i32_0 = arith.constant 0 : i32
    %c0_i32_1 = arith.constant 0 : i32
    return %c0_i32, %c0_i32_0 : i32, i32
  }
  func.func @transform_10(%arg0: i32) -> (i32, i32) {
    %c0_i32 = arith.constant 0 : i32
    %c0_i32_0 = arith.constant 0 : i32
    %c0_i32_1 = arith.constant 0 : i32
    return %c0_i32, %c0_i32_0 : i32, i32
  }
  func.func @transform_11(%arg0: i32) -> (i32, i32) {
    %c0_i32 = arith.constant 0 : i32
    %c0_i32_0 = arith.constant 0 : i32
    %c0_i32_1 = arith.constant 0 : i32
    return %c0_i32, %c0_i32_0 : i32, i32
  }
  func.func @transform_12(%arg0: i32) -> (i32, i32) {
    %c0_i32 = arith.constant 0 : i32
    %c0_i32_0 = arith.constant 0 : i32
    %c0_i32_1 = arith.constant 0 : i32
    return %c0_i32, %c0_i32_0 : i32, i32
  }
  func.func @transform_13(%arg0: i32) -> (i32, i32) {
    %c0_i32 = arith.constant 0 : i32
    %c0_i32_0 = arith.constant 0 : i32
    %c0_i32_1 = arith.constant 0 : i32
    return %c0_i32, %c0_i32_0 : i32, i32
  }
  func.func @transform_14(%arg0: i32) -> (i32, i32) {
    %c0_i32 = arith.constant 0 : i32
    %c0_i32_0 = arith.constant 0 : i32
    return %arg0, %c0_i32 : i32, i32
  }
}

</mosaic_0001>

<bundles_post_ra>
// kernel: tpu_custom_call.1
= control target key start
LH: loop header
LB: loop body
LE: loop exit
PB: predicated region body
PF: predicated region fallthrough
CT: control target
= control target key end

     0   :  { %vm70_vm0 = vcmask 261120   ;;  %v13310_v9 = vmov 0.0   ;;  %s15817_s0 = inlined_call_operand.vmem [shape: f32[16,32], index: 0, kind: input, shape index: {}]   ;;  %s15818_s1 = inlined_call_operand.vmem [shape: f32[32,32], index: 1, kind: input, shape index: {}]   ;;  %s15819_s2 = inlined_call_operand.vmem [shape: f32[1,8], index: 2, kind: input, shape index: {}]   ;;  %s15820_s3 = inlined_call_operand.vmem [shape: f32[1,16], index: 3, kind: input, shape index: {}]   ;;  %s15821_s4 = inlined_call_operand.vmem [shape: f32[64,128], index: 4, kind: input, shape index: {}]   ;;  %s15822_s5 = inlined_call_operand.vmem [shape: f32[8,128], index: 5, kind: input, shape index: {}]   ;;  %s15823_s6 = inlined_call_operand.vmem [shape: bf16[32,2048], index: 6, kind: input, shape index: {}]   ;;  %s15824_s7 = inlined_call_operand.vmem [shape: bf16[2048,32], index: 7, kind: input, shape index: {}]   ;;  %s15825_s8 = inlined_call_operand.vmem [shape: f32[1,2048], index: 8, kind: input, shape index: {}]   ;;  %s15826_s9 = inlined_call_operand.vmem [shape: f32[64,128], index: 9, kind: input, shape index: {}]   ;;  %s15827_s10 = inlined_call_operand.vmem [shape: f32[8,128], index: 10, kind: input, shape index: {}]   ;;  %s15828_s11 = inlined_call_operand.vmem [shape: bf16[32,2048], index: 11, kind: input, shape index: {}]   ;;  %s15829_s12 = inlined_call_operand.vmem [shape: bf16[2048,32], index: 12, kind: input, shape index: {}]   ;;  %s15830_s13 = inlined_call_operand.vmem [shape: f32[1,2048], index: 13, kind: input, shape index: {}]   ;;  %s15831_s14 = inlined_call_operand.hbm [shape: f32[16,32], index: 14, kind: output, shape index: {}]  }
   0x1   :  { %v13408_v0 = vld [vmem:[%s15821_s4] sm:$0xff]  ;;  %v13413_v1 = vld [vmem:[%s15821_s4 + $0x8] sm:$0xff]  ;;  %v59_v2 = vld [vmem:[%s15821_s4 + $0x10] sm:$0xff]  ;;  %11965 = vmatprep.subr.mxu1 %v13310_v9 }
   0x2   :  { %v12666_v3 = vpack.i.bf16 %v13413_v1, %v13408_v0  ;;  %v12454_v4 = vpack.c.bf16 %v13413_v1, %v13408_v0  ;;  %v60_v5 = vld [vmem:[%s15821_s4 + $0x18] sm:$0xff]  ;;  %v49_v6 = vld [vmem:[%s15817_s0] sm:$0xff]  ;;  %v50_v8 = vld [vmem:[%s15817_s0 + $0x8] sm:$0xff] }
   0x3   :  { %v12458_v7 = vpack.c.bf16 %v60_v5, %v59_v2  ;;  %11962 = vmatprep.mubr.msk.f32.mxu0 %vm70_vm0, %v49_v6 }
   0x4   :  { %12455 = vmatprep.subr.bf16.mxu0 %v12454_v4 }
   0x5   :  { %12457 = vmatpush3.bf16.msra.mxu0 %v12454_v4 }
   0x6   :  { %12459 = vmatprep.subr.bf16.mxu0 %v12458_v7 }
   0x9   :  { %12461 = vmatpush3.bf16.msra.mxu0 %v12458_v7 }
   0xa   :  { %11975 = vmatprep.subr.mxu0 %v13310_v9 }
   0xc   :  { %11963 = vmatmul.mubr.msk.f32.vlgmr.msra.gmra.mrb[0].mxu0 %vm70_vm0, %v50_v8 }
   0xd   :  { %19 = vsyncpa [#allocation3], 0  ;;  %v66_v10 = vlaneseq  ;;  %vm13311_vm1 = vmmov 0   ;;  %v13447_v13 = vld [vmem:[%s15822_s5] sm:$0xff]  ;;  %s13312_s27 = smov 96   ;;  %vm161_vm2 = vcmask 64512  }
   0xe   :  { %11967 = vmatprep.mubr.msk.f32.mxu1 %vm13311_vm1, %v13310_v9  ;;  %11977 = vmatprep.mubr.msk.f32.mxu0 %vm13311_vm1, %v13310_v9  ;;  %v13478_v21 = vld [vmem:[%s15819_s2] ss:$0 sm:$0xff]  ;;  %s15838_s30 = smov 64   ;;  %s13314_s15 = smov 88   ;;  %vm1506_vm3 = vcmask 195584   ;;  %vm1503_vm4 = vcmask 130048   ;;  %vm13721_vm5 = vmpackc.low %vm161_vm2, %vm161_vm2 }
   0xf   :  { %v13435_v11 = vshrl.u32 %v66_v10, 7  ;;  %s13315_s16 = smov 120   ;;  %s15834_s17 = smov 56  }
  0x10   :  { %s13317_s18 = smov 80   ;;  %s13318_s19 = smov 112  }
  0x11   :  { %v13442_v12 = vsub.s32 0, %v13435_v11  ;;  %s15832_s20 = smov 48   ;;  %s13320_s21 = smov 72  }
  0x12   :  { %s15846_s22 = smov 104   ;;  %s15836_s23 = smov 40  }
  0x13   :  { %v13451_v14 = vrot.slane %v13447_v13, %v13442_v12  ;;  %s15848_s24 = smov 32   ;;  %s15840_s25 = smov 24  }
  0x14   :  { %s15860_s26 = smov 8  }
  0xdf   :  { %v11964_v15 = vpop.f32.mrb[0].mxu0 }
  0xe0   :  { %v143_v16 = vpop.f32.mrb[1].mxu0  ;;  %v13459_v18 = vadd.f32 %v11964_v15, %v13451_v14 }
  0xe1   :  { %v13454_v17 = vadd.f32 %v143_v16, %v13451_v14 }
  0xe3   :  { %159 = vrot.lane.b32.xlu0 %v13454_v17, %s13312_s27 }
  0xe7   :  { %237 = vrot.lane.b32.xlu0 %v13459_v18, %s13312_s27 }
 0x155   :  { %v160_v19 = vpop.permute.xlu0 %159 }
 0x156   :  { %11966 = vmatpush3.xpose.msk.msra.mxu1 %vm161_vm2, %v160_v19 }
 0x157   :  { %11970 = vmatprep.subr.mxu1 %v13310_v9 }
 0x159   :  { %11968 = vmatmul.mubr.msk.f32.vlgmr.msra.gmra.mrb[0].mxu1 %vm161_vm2, %v13454_v17  ;;  %v238_v20 = vpop.permute.xlu0 %237 }
 0x15a   :  { %11971 = vmatpush3.xpose.msk.msra.mxu1 %vm161_vm2, %v238_v20  ;;  %11972 = vmatprep.mubr.msk.f32.mxu1 %vm13311_vm1, %v13310_v9 }
 0x15b   :  { %11980 = vmatprep.subr.mxu1 %v13310_v9 }
 0x15d   :  { %11973 = vmatmul.mubr.msk.f32.vlgmr.msra.gmra.mrb[2].mxu1 %vm161_vm2, %v13459_v18 }
 0x15e   :  { %11982 = vmatprep.mubr.msk.f32.mxu1 %vm13311_vm1, %v13310_v9 }
 0x22c   :  { %v232_v22 = vpop.f32.mrb[0].mxu1 }
 0x22d   :  { %v233_v23 = vadd.f32 %v13478_v21, %v232_v22  ;;  %v11969_v24 = vpop.f32.mrb[1].mxu1 }
 0x22f   :  { %v313_v25 = vsel %vm161_vm2, %v233_v23, -inf }
 0x230   :  { %314 = vmax.xlane.f32.xlu1 %v313_v25  ;;  %v309_v26 = vpop.f32.mrb[2].mxu1 }
 0x231   :  { %v310_v27 = vadd.f32 %v13478_v21, %v309_v26  ;;  %v11974_v28 = vpop.f32.mrb[3].mxu1 }
 0x233   :  { %v316_v29 = vsel %vm161_vm2, %v310_v27, -inf }
 0x234   :  { %317 = vmax.xlane.f32.xlu1 %v316_v29 }
 0x245   :  { %335 = vrot.lane.b32.xlu1 %v13454_v17, %s15838_s30 }
 0x249   :  { %411 = vrot.lane.b32.xlu1 %v13459_v18, %s15838_s30 }
 0x24d   :  { %489 = vrot.lane.b32.xlu1 %v13454_v17, %s13314_s15 }
 0x251   :  { %567 = vrot.lane.b32.xlu1 %v13459_v18, %s13314_s15 }
 0x2bd   :  { %v315_v30 = vpop.xlane.xlu1 %314 }
 0x2be   :  { %v319_v31 = vsub.f32 %v233_v23, %v315_v30 }
 0x2c0   :  { %v321_v32 = vmul.f32 1.442695, %v319_v31 }
 0x2c1   :  { %v318_v33 = vpop.xlane.xlu1 %317 }
 0x2c2   :  { %13122 = vpow2.f32 %v321_v32  ;;  %v320_v34 = vsub.f32 %v310_v27, %v318_v33 }
 0x2c4   :  { %v323_v35 = vmul.f32 1.442695, %v320_v34 }
 0x2c5   :  { %v336_v36 = vpop.permute.xlu1 %335 }
 0x2c6   :  { %13124 = vpow2.f32 %v323_v35  ;;  %11976 = vmatpush3.msra.mxu0 %v336_v36 }
 0x2c7   :  { %11985 = vmatprep.subr.mxu0 %v13310_v9 }
 0x2c9   :  { %v412_v37 = vpop.permute.xlu1 %411 }
 0x2ca   :  { %11981 = vmatpush3.msra.mxu1 %v412_v37 }
 0x2cb   :  { %11990 = vmatprep.subr.mxu1 %v13310_v9 }
 0x2cc   :  { %v13123_v38 = vpop.eup %13122 }
 0x2cd   :  { %v325_v39 = vsel %vm161_vm2, %v13123_v38, 0.0  ;;  %v490_v42 = vpop.permute.xlu1 %489 }
 0x2ce   :  { %326 = vadd.xlane.f32.xlu0 %v325_v39 }
 0x2d0   :  { %v13125_v40 = vpop.eup %13124 }
 0x2d1   :  { %v328_v41 = vsel %vm161_vm2, %v13125_v40, 0.0  ;;  %v568_v43 = vpop.permute.xlu1 %567 }
 0x2d2   :  { %329 = vadd.xlane.f32.xlu1 %v328_v41 }
 0x2e3   :  { %565 = vrot.lane.b32.xlu1 %v13459_v18, %s13315_s16 }
 0x2e4   :  { %487 = vrot.lane.b32.xlu0 %v13454_v17, %s13315_s16 }
 0x35b   :  { %v327_v44 = vpop.xlane.xlu0 %326 }
 0x35c   :  { %13126 = vrcp.f32 %v327_v44 }
 0x35f   :  { %v330_v45 = vpop.xlane.xlu1 %329  ;;  %v488_v50 = vpop.permute.xlu0 %487 }
 0x360   :  { %13128 = vrcp.f32 %v330_v45 }
 0x363   :  { %v566_v51 = vpop.permute.xlu1 %565 }
 0x366   :  { %v13127_v46 = vpop.eup %13126 }
 0x367   :  { %v332_v47 = vmul.f32 %v13127_v46, %v13123_v38 }
 0x369   :  { %11978 = vmatmul.mubr.msk.f32.vlgmr.msra.gmra.mrb[2].mxu0 %vm161_vm2, %v332_v47 }
 0x36a   :  { %v13129_v48 = vpop.eup %13128  ;;  %11986 = vmatpush3.xpose.msk.msra.mxu0 %vm161_vm2, %v490_v42  ;;  %11987 = vmatprep.mubr.msk.f32.mxu0 %vm13311_vm1, %v13310_v9 }
 0x36b   :  { %v334_v49 = vmul.f32 %v13129_v48, %v13125_v40  ;;  %11995 = vmatprep.subr.mxu0 %v13310_v9 }
 0x36d   :  { %11983 = vmatmul.mubr.msk.f32.vlgmr.msra.gmra.mrb[4].mxu1 %vm161_vm2, %v334_v49  ;;  %11988 = vmatmul.mubr.msk.f32.vlgmr.msra.gmra.mrb[4].mxu0 %vm161_vm2, %v488_v50 }
 0x36e   :  { %11991 = vmatpush3.xpose.msk.msra.mxu1 %vm161_vm2, %v568_v43  ;;  %11992 = vmatprep.mubr.msk.f32.mxu1 %vm13311_vm1, %v13310_v9 }
 0x36f   :  { %12000 = vmatprep.subr.mxu1 %v13310_v9  ;;  %11997 = vmatprep.mubr.msk.f32.mxu0 %vm13311_vm1, %v13310_v9 }
 0x371   :  { %11993 = vmatmul.mubr.msk.f32.vlgmr.msra.gmra.mrb[6].mxu1 %vm161_vm2, %v566_v51 }
 0x372   :  { %12002 = vmatprep.mubr.msk.f32.mxu1 %vm13311_vm1, %v13310_v9 }
 0x43c   :  { %v13516_v52 = vpop.f32.mrb[2].mxu0 }
 0x43d   :  { %v11979_v53 = vpop.f32.mrb[3].mxu0 }
 0x440   :  { %v13518_v54 = vpop.f32.mrb[4].mxu1  ;;  %v561_v55 = vpop.f32.mrb[4].mxu0 }
 0x441   :  { %v562_v56 = vadd.f32 %v13478_v21, %v561_v55  ;;  %v11984_v57 = vpop.f32.mrb[5].mxu1  ;;  %v11989_v58 = vpop.f32.mrb[5].mxu0 }
 0x443   :  { %v643_v59 = vsel %vm161_vm2, %v562_v56, -inf }
 0x444   :  { %v639_v60 = vpop.f32.mrb[6].mxu1  ;;  %644 = vmax.xlane.f32.xlu1 %v643_v59 }
 0x445   :  { %v640_v61 = vadd.f32 %v13478_v21, %v639_v60  ;;  %v11994_v62 = vpop.f32.mrb[7].mxu1 }
 0x447   :  { %v646_v63 = vsel %vm161_vm2, %v640_v61, -inf }
 0x448   :  { %647 = vmax.xlane.f32.xlu0 %v646_v63 }
 0x455   :  { %665 = vrot.lane.b32.xlu1 %v13454_v17, %s15834_s17 }
 0x459   :  { %819 = vrot.lane.b32.xlu1 %v13454_v17, %s13317_s18 }
 0x45d   :  { %897 = vrot.lane.b32.xlu1 %v13459_v18, %s13317_s18 }
 0x45e   :  { %741 = vrot.lane.b32.xlu0 %v13459_v18, %s15834_s17  ;;  %s15842_s17 = smov 16  }
 0x462   :  { %817 = vrot.lane.b32.xlu0 %v13454_v17, %s13318_s19 }
 0x4d1   :  { %v645_v2 = vpop.xlane.xlu1 %644 }
 0x4d2   :  { %v649_v4 = vsub.f32 %v562_v56, %v645_v2 }
 0x4d4   :  { %v651_v5 = vmul.f32 1.442695, %v649_v4 }
 0x4d5   :  { %v666_v6 = vpop.permute.xlu1 %665  ;;  %v648_v7 = vpop.xlane.xlu0 %647 }
 0x4d6   :  { %13130 = vpow2.f32 %v651_v5  ;;  %v650_v8 = vsub.f32 %v640_v61, %v648_v7  ;;  %11996 = vmatpush3.msra.mxu0 %v666_v6 }
 0x4d7   :  { %12005 = vmatprep.subr.mxu0 %v13310_v9 }
 0x4d8   :  { %v653_v10 = vmul.f32 1.442695, %v650_v8 }
 0x4d9   :  { %v742_v15 = vpop.permute.xlu0 %741  ;;  %v820_v23 = vpop.permute.xlu1 %819 }
 0x4da   :  { %13132 = vpow2.f32 %v653_v10  ;;  %12001 = vmatpush3.msra.mxu1 %v742_v15 }
 0x4db   :  { %12010 = vmatprep.subr.mxu1 %v13310_v9 }
 0x4dd   :  { %v898_v24 = vpop.permute.xlu1 %897  ;;  %v818_v31 = vpop.permute.xlu0 %817 }
 0x4e0   :  { %v13131_v16 = vpop.eup %13130 }
 0x4e1   :  { %v655_v19 = vsel %vm161_vm2, %v13131_v16, 0.0 }
 0x4e2   :  { %656 = vadd.xlane.f32.xlu1 %v655_v19 }
 0x4e4   :  { %v13133_v20 = vpop.eup %13132 }
 0x4e5   :  { %v658_v22 = vsel %vm161_vm2, %v13133_v20, 0.0 }
 0x4e6   :  { %659 = vadd.xlane.f32.xlu1 %v658_v22 }
 0x4f7   :  { %895 = vrot.lane.b32.xlu1 %v13459_v18, %s13318_s19 }
 0x56f   :  { %v657_v25 = vpop.xlane.xlu1 %656 }
 0x570   :  { %13134 = vrcp.f32 %v657_v25 }
 0x573   :  { %v660_v26 = vpop.xlane.xlu1 %659 }
 0x574   :  { %13136 = vrcp.f32 %v660_v26 }
 0x577   :  { %v896_v32 = vpop.permute.xlu1 %895 }
 0x57a   :  { %v13135_v27 = vpop.eup %13134 }
 0x57b   :  { %v662_v28 = vmul.f32 %v13135_v27, %v13131_v16 }
 0x57d   :  { %11998 = vmatmul.mubr.msk.f32.vlgmr.msra.gmra.mrb[6].mxu0 %vm161_vm2, %v662_v28  ;;  %v13274_v28 = vld [vmem:[%s15821_s4 + $0x10] sm:$0xff] }
 0x57e   :  { %v13137_v29 = vpop.eup %13136  ;;  %12006 = vmatpush3.xpose.msk.msra.mxu0 %vm161_vm2, %v820_v23  ;;  %12007 = vmatprep.mubr.msk.f32.mxu0 %vm13311_vm1, %v13310_v9 }
 0x57f   :  { %v664_v30 = vmul.f32 %v13137_v29, %v13133_v20  ;;  %12015 = vmatprep.subr.mxu0 %v13310_v9 }
 0x581   :  { %12003 = vmatmul.mubr.msk.f32.vlgmr.msra.gmra.mrb[8].mxu1 %vm161_vm2, %v664_v30  ;;  %12008 = vmatmul.mubr.msk.f32.vlgmr.msra.gmra.mrb[8].mxu0 %vm161_vm2, %v818_v31 }
 0x582   :  { %12011 = vmatpush3.xpose.msk.msra.mxu1 %vm161_vm2, %v898_v24  ;;  %12012 = vmatprep.mubr.msk.f32.mxu1 %vm13311_vm1, %v13310_v9 }
 0x583   :  { %12020 = vmatprep.subr.mxu1 %v13310_v9  ;;  %12017 = vmatprep.mubr.msk.f32.mxu0 %vm13311_vm1, %v13310_v9 }
 0x585   :  { %12013 = vmatmul.mubr.msk.f32.vlgmr.msra.gmra.mrb[10].mxu1 %vm161_vm2, %v896_v32 }
 0x586   :  { %12022 = vmatprep.mubr.msk.f32.mxu1 %vm13311_vm1, %v13310_v9 }
 0x650   :  { %v13556_v33 = vpop.f32.mrb[6].mxu0 }
 0x651   :  { %v11999_v34 = vpop.f32.mrb[7].mxu0 }
 0x654   :  { %v13558_v35 = vpop.f32.mrb[8].mxu1  ;;  %v891_v36 = vpop.f32.mrb[8].mxu0 }
 0x655   :  { %v892_v37 = vadd.f32 %v13478_v21, %v891_v36  ;;  %v12004_v38 = vpop.f32.mrb[9].mxu1  ;;  %v12009_v39 = vpop.f32.mrb[9].mxu0 }
 0x657   :  { %v973_v40 = vsel %vm161_vm2, %v892_v37, -inf }
 0x658   :  { %v969_v41 = vpop.f32.mrb[10].mxu1  ;;  %974 = vmax.xlane.f32.xlu0 %v973_v40 }
 0x659   :  { %v970_v42 = vadd.f32 %v13478_v21, %v969_v41  ;;  %v12014_v43 = vpop.f32.mrb[11].mxu1 }
 0x65b   :  { %v976_v44 = vsel %vm161_vm2, %v970_v42, -inf }
 0x65c   :  { %977 = vmax.xlane.f32.xlu1 %v976_v44 }
 0x66d   :  { %995 = vrot.lane.b32.xlu1 %v13454_v17, %s15832_s20 }
 0x66e   :  { %1071 = vrot.lane.b32.xlu0 %v13459_v18, %s15832_s20  ;;  %s15844_s20 = smov 8  }
 0x671   :  { %1149 = vrot.lane.b32.xlu1 %v13454_v17, %s13320_s21 }
 0x675   :  { %1227 = vrot.lane.b32.xlu1 %v13459_v18, %s13320_s21 }
 0x679   :  { %1225 = vrot.lane.b32.xlu1 %v13459_v18, %s15846_s22 }
 0x6e5   :  { %v975_v45 = vpop.xlane.xlu0 %974 }
 0x6e6   :  { %v979_v46 = vsub.f32 %v892_v37, %v975_v45 }
 0x6e8   :  { %v981_v47 = vmul.f32 1.442695, %v979_v46 }
 0x6e9   :  { %v978_v48 = vpop.xlane.xlu1 %977  ;;  %v1072_v49 = vpop.permute.xlu0 %1071 }
 0x6ea   :  { %13138 = vpow2.f32 %v981_v47  ;;  %v980_v50 = vsub.f32 %v970_v42, %v978_v48  ;;  %12021 = vmatpush3.msra.mxu1 %v1072_v49 }
 0x6eb   :  { %12030 = vmatprep.subr.mxu1 %v13310_v9 }
 0x6ec   :  { %v983_v51 = vmul.f32 1.442695, %v980_v50 }
 0x6ed   :  { %v996_v53 = vpop.permute.xlu1 %995 }
 0x6ee   :  { %13140 = vpow2.f32 %v983_v51  ;;  %12016 = vmatpush3.msra.mxu0 %v996_v53 }
 0x6ef   :  { %12025 = vmatprep.subr.mxu0 %v13310_v9 }
 0x6f1   :  { %v1150_v61 = vpop.permute.xlu1 %1149 }
 0x6f4   :  { %v13139_v55 = vpop.eup %13138 }
 0x6f5   :  { %v985_v56 = vsel %vm161_vm2, %v13139_v55, 0.0  ;;  %v1228_v4 = vpop.permute.xlu1 %1227 }
 0x6f6   :  { %986 = vadd.xlane.f32.xlu0 %v985_v56 }
 0x6f8   :  { %v13141_v57 = vpop.eup %13140 }
 0x6f9   :  { %v988_v58 = vsel %vm161_vm2, %v13141_v57, 0.0  ;;  %v1226_v7 = vpop.permute.xlu1 %1225 }
 0x6fa   :  { %989 = vadd.xlane.f32.xlu0 %v988_v58 }
 0x710   :  { %1147 = vrot.lane.b32.xlu0 %v13454_v17, %s15846_s22 }
 0x783   :  { %v987_v59 = vpop.xlane.xlu0 %986 }
 0x784   :  { %13142 = vrcp.f32 %v987_v59 }
 0x787   :  { %v990_v60 = vpop.xlane.xlu0 %989 }
 0x788   :  { %13144 = vrcp.f32 %v990_v60 }
 0x78b   :  { %v1148_v6 = vpop.permute.xlu0 %1147 }
 0x78e   :  { %v13143_v62 = vpop.eup %13142 }
 0x78f   :  { %v992_v63 = vmul.f32 %v13143_v62, %v13139_v55 }
 0x791   :  { %12018 = vmatmul.mubr.msk.f32.vlgmr.msra.gmra.mrb[10].mxu0 %vm161_vm2, %v992_v63 }
 0x792   :  { %v13145_v2 = vpop.eup %13144  ;;  %12026 = vmatpush3.xpose.msk.msra.mxu0 %vm161_vm2, %v1150_v61  ;;  %12027 = vmatprep.mubr.msk.f32.mxu0 %vm13311_vm1, %v13310_v9 }
 0x793   :  { %v994_v5 = vmul.f32 %v13145_v2, %v13141_v57  ;;  %12035 = vmatprep.subr.mxu0 %v13310_v9 }
 0x795   :  { %12023 = vmatmul.mubr.msk.f32.vlgmr.msra.gmra.mrb[12].mxu1 %vm161_vm2, %v994_v5  ;;  %12028 = vmatmul.mubr.msk.f32.vlgmr.msra.gmra.mrb[12].mxu0 %vm161_vm2, %v1148_v6 }
 0x796   :  { %12031 = vmatpush3.xpose.msk.msra.mxu1 %vm161_vm2, %v1228_v4  ;;  %12032 = vmatprep.mubr.msk.f32.mxu1 %vm13311_vm1, %v13310_v9 }
 0x797   :  { %12040 = vmatprep.subr.mxu1 %v13310_v9  ;;  %12037 = vmatprep.mubr.msk.f32.mxu0 %vm13311_vm1, %v13310_v9 }
 0x799   :  { %12033 = vmatmul.mubr.msk.f32.vlgmr.msra.gmra.mrb[14].mxu1 %vm161_vm2, %v1226_v7 }
 0x79a   :  { %12042 = vmatprep.mubr.msk.f32.mxu1 %vm13311_vm1, %v13310_v9 }
 0x864   :  { %v1067_v8 = vpop.f32.mrb[10].mxu0 }
 0x865   :  { %v12019_v10 = vpop.f32.mrb[11].mxu0 }
 0x868   :  { %v1143_v15 = vpop.f32.mrb[12].mxu1  ;;  %v1221_v16 = vpop.f32.mrb[12].mxu0 }
 0x869   :  { %v1222_v19 = vadd.f32 %v13478_v21, %v1221_v16  ;;  %v12024_v20 = vpop.f32.mrb[13].mxu1  ;;  %v12029_v22 = vpop.f32.mrb[13].mxu0  ;;  %v13276_v16 = vld [vmem:[%s15817_s0 + $0x8] sm:$0xff] }
 0x86b   :  { %v1303_v23 = vsel %vm161_vm2, %v1222_v19, -inf }
 0x86c   :  { %v1299_v24 = vpop.f32.mrb[14].mxu1  ;;  %1304 = vmax.xlane.f32.xlu0 %v1303_v23 }
 0x86d   :  { %v1300_v25 = vadd.f32 %v13478_v21, %v1299_v24  ;;  %v12034_v26 = vpop.f32.mrb[15].mxu1  ;;  %v13275_v21 = vld [vmem:[%s15821_s4 + $0x18] sm:$0xff] }
 0x86e   :  { %v12671_v29 = vpack.i.bf16 %v13275_v21, %v13274_v28 }
 0x86f   :  { %v1306_v27 = vsel %vm161_vm2, %v1300_v25, -inf }
 0x870   :  { %1307 = vmax.xlane.f32.xlu1 %v1306_v27 }
 0x881   :  { %1325 = vrot.lane.b32.xlu1 %v13454_v17, %s15836_s23 }
 0x885   :  { %12667 = vrot.lane.b32.xlu1 %v12666_v3, %s15848_s24 }
 0x889   :  { %12672 = vrot.lane.b32.xlu1 %v12671_v29, %s15848_s24 }
 0x88d   :  { %1481 = vrot.lane.b32.xlu1 %v13558_v35, %s15844_s20 }
 0x891   :  { %1489 = vrot.lane.b32.xlu1 %v1143_v15, %s15842_s17 }
 0x8f9   :  { %v1305_v0 = vpop.xlane.xlu0 %1304 }
 0x8fa   :  { %v1309_v1 = vsub.f32 %v1222_v19, %v1305_v0 }
 0x8fc   :  { %v1311_v3 = vmul.f32 1.442695, %v1309_v1 }
 0x8fd   :  { %v1308_v17 = vpop.xlane.xlu1 %1307 }
 0x8fe   :  { %13146 = vpow2.f32 %v1311_v3  ;;  %v1310_v30 = vsub.f32 %v1300_v25, %v1308_v17  ;;  %v63_v17 = vld [vmem:[%s15821_s4 + $0x30] sm:$0xff] }
 0x900   :  { %v1313_v31 = vmul.f32 1.442695, %v1310_v30  ;;  %v64_v30 = vld [vmem:[%s15821_s4 + $0x38] sm:$0xff] }
 0x901   :  { %v1326_v32 = vpop.permute.xlu1 %1325 }
 0x902   :  { %13148 = vpow2.f32 %v1313_v31  ;;  %12036 = vmatpush3.msra.mxu0 %v1326_v32  ;;  %v13655_v31 = vpack.i.bf16 %v64_v30, %v63_v17  ;;  %v13658_v32 = vsub.s32 1, %v13435_v11 }
 0x908   :  { %v13147_v34 = vpop.eup %13146 }
 0x909   :  { %v1315_v36 = vsel %vm161_vm2, %v13147_v34, 0.0 }
 0x90a   :  { %1316 = vadd.xlane.f32.xlu0 %v1315_v36  ;;  %v62_v36 = vld [vmem:[%s15821_s4 + $0x28] sm:$0xff] }
 0x90c   :  { %v13149_v37 = vpop.eup %13148 }
 0x90d   :  { %v1318_v35 = vsel %vm161_vm2, %v13149_v37, 0.0 }
 0x90e   :  { %1319 = vadd.xlane.f32.xlu0 %v1318_v35 }
 0x924   :  { %1401 = vrot.lane.b32.xlu0 %v13459_v18, %s15836_s23  ;;  %v12668_v18 = vpop.permute.xlu1 %12667  ;;  %s15859_s23 = smov 32  }
 0x925   :  { %v12670_v46 = vunpack.i.h.bf16 %v12668_v18 }
 0x928   :  { %1479 = vrot.lane.b32.xlu0 %v13556_v33, %s15844_s20  ;;  %v12673_v45 = vpop.permute.xlu1 %12672  ;;  %v12669_v33 = vunpack.i.l.bf16 %v12668_v18 }
 0x929   :  { %v12675_v47 = vunpack.i.h.bf16 %v12673_v45  ;;  %v12674_v48 = vunpack.i.l.bf16 %v12673_v45 }
 0x92a   :  { %v12462_v49 = vpack.c.bf16 %v12670_v46, %v12669_v33 }
 0x92b   :  { %v12466_v50 = vpack.c.bf16 %v12675_v47, %v12674_v48 }
 0x92c   :  { %1487 = vrot.lane.b32.xlu0 %v1067_v8, %s15842_s17  ;;  %12463 = vmatprep.subr.bf16.mxu0 %v12462_v49  ;;  %v1482_v58 = vpop.permute.xlu1 %1481  ;;  %s15854_s17 = smov 64  }
 0x92d   :  { %v1502_v4 = vsel %vm161_vm2, %v13518_v54, %v1482_v58  ;;  %v13277_v54 = vld [vmem:[%s15817_s0] sm:$0xff]  ;;  %s15852_s0 = smov 16  }
 0x930   :  { %v1490_v61 = vpop.permute.xlu1 %1489 }
 0x997   :  { %v1317_v38 = vpop.xlane.xlu0 %1316 }
 0x998   :  { %13150 = vrcp.f32 %v1317_v38 }
 0x99b   :  { %v1320_v39 = vpop.xlane.xlu0 %1319 }
 0x99c   :  { %13152 = vrcp.f32 %v1320_v39  ;;  %v51_v39 = vld [vmem:[%s15818_s1] sm:$0xff] }
 0x99f   :  { %v1402_v40 = vpop.permute.xlu0 %1401 }
 0x9a0   :  { %12041 = vmatpush3.msra.mxu1 %v1402_v40  ;;  %v12474_v40 = vpack.c.bf16 %v64_v30, %v63_v17 }
 0x9a2   :  { %v13151_v41 = vpop.eup %13150 }
 0x9a3   :  { %v1322_v42 = vmul.f32 %v13151_v41, %v13147_v34  ;;  %v1480_v57 = vpop.permute.xlu0 %1479  ;;  %v61_v34 = vld [vmem:[%s15821_s4 + $0x20] sm:$0xff]  ;;  %v13683_v41 = vsub.s32 2, %v13435_v11  ;;  %s15853_s4 = smov 24  }
 0x9a4   :  { %v1501_v60 = vsel %vm161_vm2, %v13516_v52, %v1480_v57  ;;  %v13672_v35 = vpack.i.bf16 %v62_v36, %v61_v34  ;;  %v12470_v38 = vpack.c.bf16 %v62_v36, %v61_v34  ;;  %v52_v57 = vld [vmem:[%s15818_s1 + $0x8] sm:$0xff] }
 0x9a5   :  { %12038 = vmatmul.mubr.msk.f32.vlgmr.msra.gmra.mrb[14].mxu0 %vm161_vm2, %v1322_v42  ;;  %v13687_v42 = vrot.slane %v13447_v13, %v13683_v41 }
 0x9a6   :  { %v13153_v43 = vpop.eup %13152  ;;  %12465 = vmatpush3.bf16.msra.mxu0 %v12462_v49  ;;  %12471 = vmatprep.subr.bf16.mxu1 %v12470_v38 }
 0x9a7   :  { %v1324_v44 = vmul.f32 %v13153_v43, %v13149_v37  ;;  %12467 = vmatprep.subr.bf16.mxu0 %v12466_v50  ;;  %v1488_v59 = vpop.permute.xlu0 %1487  ;;  %v13670_v37 = vrot.slane %v13447_v13, %v13658_v32 }
 0x9a8   :  { %v1504_v62 = vsel %vm1503_vm4, %v1501_v60, %v1488_v59  ;;  %v53_v60 = vld [vmem:[%s15818_s1 + $0x10] sm:$0xff] }
 0x9a9   :  { %12043 = vmatmul.mubr.msk.f32.vlgmr.msra.gmra.mrb[16].mxu1 %vm161_vm2, %v1324_v44 }
 0x9aa   :  { %12469 = vmatpush3.bf16.msra.mxu0 %v12466_v50  ;;  %12473 = vmatpush3.bf16.msra.mxu1 %v12470_v38 }
 0x9ab   :  { %12475 = vmatprep.subr.bf16.mxu1 %v12474_v40 }
 0x9ae   :  { %12477 = vmatpush3.bf16.msra.mxu1 %v12474_v40 }
 0xa78   :  { %v1397_v51 = vpop.f32.mrb[14].mxu0 }
 0xa79   :  { %1495 = vrot.lane.b32.xlu0 %v1397_v51, %s15840_s25  ;;  %v12039_v53 = vpop.f32.mrb[15].mxu0 }
 0xa7c   :  { %v1473_v55 = vpop.f32.mrb[16].mxu1 }
 0xa7d   :  { %1497 = vrot.lane.b32.xlu1 %v1473_v55, %s15840_s25  ;;  %v12044_v56 = vpop.f32.mrb[17].mxu1  ;;  %1526 = vrot.lane.b32.xlu0 %v13451_v14, %s15848_s24  ;;  %v1505_v14 = vsel %vm1503_vm4, %v1502_v4, %v1490_v61  ;;  %v54_v4 = vld [vmem:[%s15818_s1 + $0x18] sm:$0xff]  ;;  %s15858_s25 = smov 40  }
 0xaeb   :  { %v1496_v63 = vpop.permute.xlu0 %1495 }
 0xaec   :  { %v1507_v2 = vsel %vm1506_vm3, %v1504_v62, %v1496_v63 }
 0xaed   :  { %12053 = vmatprep.mubr.msk.f32.mxu0 %vm70_vm0, %v1507_v2 }
 0xaef   :  { %v1498_v5 = vpop.permute.xlu1 %1497  ;;  %v1527_v7 = vpop.permute.xlu0 %1526 }
 0xaf0   :  { %v1508_v6 = vsel %vm1506_vm3, %v1505_v14, %v1498_v5 }
 0xaf1   :  { %12054 = vmatmul.mubr.msk.f32.vlgmr.msra.gmra.mrb[16].mxu0 %vm70_vm0, %v1508_v6  ;;  %v13327_v6 = vmov 0.0|0.0  }
 0xaf2   :  { %12075 = vmatprep.mubr.msk.f32.mxu0 %vm70_vm0, %v51_v39  ;;  %12486 = vmatprep.subr.bf16.mxu1 %v13327_v6 }
 0xbc4   :  { %v12055_v52 = vpop.f32.mrb[16].mxu0 }
 0xbc5   :  { %v1607_v8 = vadd.f32 %v12055_v52, %v1527_v7  ;;  %v1601_v10 = vpop.f32.mrb[17].mxu0 }
 0xbc6   :  { %v1602_v15 = vadd.f32 %v1601_v10, %v1527_v7 }
 0xbc7   :  { %v1611_v19 = vadd.f32 %v13276_v16, %v1607_v8 }
 0xbc8   :  { %v1610_v20 = vadd.f32 %v13277_v54, %v1602_v15 }
 0xbc9   :  { %v1615_v22 = vsel %vm70_vm0, %v1611_v19, 0.0 }
 0xbca   :  { %1616 = vadd.xlane.f32.xlu0 %v1615_v22  ;;  %v1612_v23 = vsel %vm70_vm0, %v1610_v20, 0.0 }
 0xbcb   :  { %1613 = vadd.xlane.f32.xlu1 %v1612_v23 }
 0xc57   :  { %v1617_v24 = vpop.xlane.xlu0 %1616 }
 0xc58   :  { %v1620_v25 = vmul.f32 0.03125, %v1617_v24  ;;  %v1614_v26 = vpop.xlane.xlu1 %1613 }
 0xc59   :  { %v1619_v27 = vmul.f32 0.03125, %v1614_v26 }
 0xc5a   :  { %v1622_v28 = vsub.f32 %v1611_v19, %v1620_v25 }
 0xc5b   :  { %v1621_v21 = vsub.f32 %v1610_v20, %v1619_v27 }
 0xc5c   :  { %v1624_v29 = vmul.f32 %v1622_v28, %v1622_v28 }
 0xc5d   :  { %v1623_v0 = vmul.f32 %v1621_v21, %v1621_v21 }
 0xc5e   :  { %v1628_v1 = vsel %vm70_vm0, %v1624_v29, 0.0 }
 0xc5f   :  { %1629 = vadd.xlane.f32.xlu1 %v1628_v1  ;;  %v1625_v3 = vsel %vm70_vm0, %v1623_v0, 0.0  ;;  %v13752_v0 = vld [vmem:[%s15820_s3] ss:$0 sm:$0xff] }
 0xc60   :  { %1626 = vadd.xlane.f32.xlu0 %v1625_v3 }
 0xc70   :  { %12682 = vrot.lane.b32.xlu1 %v13655_v31, %s13312_s27 }
 0xc74   :  { %1646 = vrot.lane.b32.xlu1 %v13670_v37, %s13312_s27 }
 0xc76   :  { %12677 = vrot.lane.b32.xlu0 %v13672_v35, %s13312_s27 }
 0xc7a   :  { %1753 = vrot.lane.b32.xlu0 %v13687_v42, %s13312_s27 }
 0xcec   :  { %v1630_v43 = vpop.xlane.xlu1 %1629 }
 0xced   :  { %v1632_v44 = vmul.f32 0.03125, %v1630_v43  ;;  %v1627_v18 = vpop.xlane.xlu0 %1626 }
 0xcee   :  { %v1631_v45 = vmul.f32 0.03125, %v1627_v18 }
 0xcef   :  { %v1634_v46 = vadd.f32 1e-05, %v1632_v44 }
 0xcf0   :  { %v1633_v33 = vadd.f32 1e-05, %v1631_v45  ;;  %v12683_v47 = vpop.permute.xlu1 %12682 }
 0xcf1   :  { %13154 = vrsqrt.f32 %v1634_v46  ;;  %v12678_v48 = vpop.permute.xlu0 %12677  ;;  %v12685_v49 = vunpack.i.h.bf16 %v12683_v47  ;;  %v12684_v50 = vunpack.i.l.bf16 %v12683_v47 }
 0xcf2   :  { %13156 = vrsqrt.f32 %v1633_v33  ;;  %v12680_v51 = vunpack.i.h.bf16 %v12678_v48  ;;  %v12679_v53 = vunpack.i.l.bf16 %v12678_v48 }
 0xcf3   :  { %v12482_v13 = vpack.c.bf16 %v12685_v49, %v12684_v50 }
 0xcf4   :  { %v12478_v55 = vpack.c.bf16 %v12680_v51, %v12679_v53  ;;  %v1647_v63 = vpop.permute.xlu1 %1646 }
 0xcf5   :  { %v1754_v7 = vpop.permute.xlu0 %1753 }
 0xcf6   :  { %12479 = vmatprep.subr.bf16.mxu0 %v12478_v55 }
 0xcf7   :  { %12481 = vmatpush3.bf16.msra.mxu0 %v12478_v55 }
 0xcf8   :  { %12483 = vmatprep.subr.bf16.mxu0 %v12482_v13 }
 0xcfb   :  { %v13155_v56 = vpop.eup %13154  ;;  %12485 = vmatpush3.bf16.msra.mxu0 %v12482_v13 }
 0xcfc   :  { %v13157_v58 = vpop.eup %13156  ;;  %v1638_v59 = vmul.f32 %v13155_v56, %v1622_v28  ;;  %12490 = vmatprep.subr.bf16.mxu0 %v13327_v6 }
 0xcfd   :  { %v1637_v61 = vmul.f32 %v13157_v58, %v1621_v21 }
 0xcfe   :  { %12076 = vmatmul.mubr.msk.f32.vlgmr.msra.gmra.mrb[18].mxu0 %vm70_vm0, %v52_v57  ;;  %v1644_v62 = vmul.f32 %v13670_v37, %v1638_v59 }
 0xcff   :  { %v1643_v2 = vmul.f32 %v13670_v37, %v1637_v61  ;;  %12078 = vmatprep.mubr.msk.f32.mxu0 %vm70_vm0, %v53_v60 }
 0xd00   :  { %v13706_v5 = vadd.f32 %v1647_v63, %v1644_v62 }
 0xd01   :  { %v13704_v14 = vadd.f32 %v1647_v63, %v1643_v2 }
 0xd02   :  { %12079 = vmatmul.mubr.msk.f32.gmra.mrb[20].mxu0 %vm70_vm0, %v54_v4 }
 0xd03   :  { %12064 = vmatprep.mubr.msk.f32.mxu1 %vm70_vm0, %v13704_v14  ;;  %12092 = vmatprep.mubr.msk.f32.mxu0 %vm13311_vm1, %v13310_v9 }
 0xd04   :  { %12065 = vmatmul.mubr.msk.f32.vlgmr.msra.gmra.mrb[18].mxu1 %vm70_vm0, %v13706_v5 }
 0xd05   :  { %12085 = vmatprep.mubr.msk.f32.mxu1 %vm13311_vm1, %v13310_v9 }
 0xdd1   :  { %v12077_v52 = vpop.f32.mrb[18].mxu0 }
 0xdd2   :  { %v1840_v8 = vadd.f32 %v12077_v52, %v1754_v7  ;;  %v1834_v10 = vpop.f32.mrb[19].mxu0 }
 0xdd3   :  { %v1835_v15 = vadd.f32 %v1834_v10, %v1754_v7 }
 0xdd5   :  { %v12080_v19 = vpop.f32.mrb[20].mxu0  ;;  %v12487_v54 = vpack.c.bf16 %v1840_v8, %v1835_v15  ;;  %v13725_v20 = vpack.i.bf16 %v1840_v8, %v1835_v15 }
 0xdd6   :  { %v1850_v22 = vadd.f32 %v12080_v19, %v1754_v7  ;;  %v1844_v23 = vpop.f32.mrb[21].mxu0 }
 0xdd7   :  { %v1845_v24 = vadd.f32 %v1844_v23, %v1754_v7  ;;  %v12066_v25 = vpop.f32.mrb[18].mxu1  ;;  %12489 = vmatpush3.bf16.xpose.msk.msra.mxu1 %vm13721_vm5, %v12487_v54 }
 0xdd8   :  { %v1727_v26 = vpop.f32.mrb[19].mxu1  ;;  %12494 = vmatprep.subr.bf16.mxu1 %v13327_v6  ;;  %v13743_v29 = vadd.f32 %v12066_v25, %v13687_v42 }
 0xdd9   :  { %v12491_v27 = vpack.c.bf16 %v1850_v22, %v1845_v24  ;;  %v13730_v28 = vpack.i.bf16 %v1850_v22, %v1845_v24  ;;  %v13735_v21 = vadd.f32 %v1727_v26, %v13687_v42 }
 0xddb   :  { %12493 = vmatpush3.bf16.xpose.msk.msra.mxu0 %vm13721_vm5, %v12491_v27 }
 0xddc   :  { %12500 = vmatprep.subr.bf16.mxu0 %v13327_v6 }
 0xdde   :  { %12086 = vmatmul.mubr.msk.f32.vlgmr.msra.gmra.mrb[20].mxu1 %vm161_vm2, %v13735_v21 }
 0xddf   :  { %12099 = vmatprep.mubr.msk.f32.mxu1 %vm13311_vm1, %v13310_v9 }
 0xde2   :  { %12093 = vmatmul.mubr.msk.f32.vlgmr.msra.gmra.mrb[22].mxu0 %vm161_vm2, %v13743_v29 }
 0xde3   :  { %12113 = vmatprep.mubr.msk.f32.mxu0 %vm13311_vm1, %v13310_v9 }
 0xeb1   :  { %v1934_v1 = vpop.f32.mrb[20].mxu1 }
 0xeb2   :  { %v1935_v3 = vadd.f32 %v13752_v0, %v1934_v1  ;;  %v12087_v17 = vpop.f32.mrb[21].mxu1 }
 0xeb4   :  { %v2017_v30 = vsel %vm1503_vm4, %v1935_v3, -inf }
 0xeb5   :  { %v2013_v34 = vpop.f32.mrb[22].mxu0  ;;  %2018 = vmax.xlane.f32.xlu1 %v2017_v30 }
 0xeb6   :  { %v2014_v36 = vadd.f32 %v13752_v0, %v2013_v34  ;;  %v12094_v38 = vpop.f32.mrb[23].mxu0 }
 0xeb8   :  { %v2020_v39 = vsel %vm1503_vm4, %v2014_v36, -inf }
 0xeb9   :  { %2021 = vmax.xlane.f32.xlu0 %v2020_v39 }
 0xf42   :  { %v2019_v40 = vpop.xlane.xlu1 %2018 }
 0xf43   :  { %v2023_v43 = vsub.f32 %v1935_v3, %v2019_v40 }
 0xf45   :  { %v2025_v44 = vmul.f32 1.442695, %v2023_v43 }
 0xf46   :  { %v2022_v18 = vpop.xlane.xlu0 %2021 }
 0xf47   :  { %13158 = vpow2.f32 %v2025_v44  ;;  %v2024_v45 = vsub.f32 %v2014_v36, %v2022_v18 }
 0xf49   :  { %v2027_v46 = vmul.f32 1.442695, %v2024_v45 }
 0xf4b   :  { %13160 = vpow2.f32 %v2027_v46 }
 0xf51   :  { %v13159_v33 = vpop.eup %13158 }
 0xf52   :  { %v2029_v47 = vsel %vm1503_vm4, %v13159_v33, 0.0 }
 0xf53   :  { %2030 = vadd.xlane.f32.xlu0 %v2029_v47 }
 0xf55   :  { %v13161_v48 = vpop.eup %13160 }
 0xf56   :  { %v2032_v49 = vsel %vm1503_vm4, %v13161_v48, 0.0 }
 0xf57   :  { %2033 = vadd.xlane.f32.xlu1 %v2032_v49 }
 0xf68   :  { %12692 = vrot.lane.b32.xlu1 %v13730_v28, %s13312_s27 }
 0xf69   :  { %12687 = vrot.lane.b32.xlu0 %v13725_v20, %s13312_s27 }
 0xf6c   :  { %12697 = vrot.lane.b32.xlu1 %v13725_v20, %s13315_s16 }
 0xf6d   :  { %12702 = vrot.lane.b32.xlu0 %v13730_v28, %s13315_s16 }
 0xf70   :  { %2197 = vrot.lane.b32.xlu1 %v13735_v21, %s13315_s16 }
 0xf71   :  { %2279 = vrot.lane.b32.xlu0 %v13743_v29, %s13315_s16 }
 0xfe0   :  { %v2031_v50 = vpop.xlane.xlu0 %2030 }
 0xfe1   :  { %13162 = vrcp.f32 %v2031_v50 }
 0xfe4   :  { %v12688_v51 = vpop.permute.xlu0 %12687  ;;  %v2034_v53 = vpop.xlane.xlu1 %2033 }
 0xfe5   :  { %v12690_v55 = vunpack.i.h.bf16 %v12688_v51  ;;  %v12689_v13 = vunpack.i.l.bf16 %v12688_v51  ;;  %13164 = vrcp.f32 %v2034_v53 }
 0xfe7   :  { %v12495_v56 = vpack.c.bf16 %v12690_v55, %v12689_v13 }
 0xfe8   :  { %v12693_v57 = vpop.permute.xlu1 %12692  ;;  %v12703_v52 = vpop.permute.xlu0 %12702 }
 0xfe9   :  { %v12695_v58 = vunpack.i.h.bf16 %v12693_v57  ;;  %v12694_v59 = vunpack.i.l.bf16 %v12693_v57  ;;  %12496 = vmatpush3.bf16.msra.mxu1 %v12495_v56  ;;  %v12705_v15 = vunpack.i.h.bf16 %v12703_v52  ;;  %v12704_v19 = vunpack.i.l.bf16 %v12703_v52 }
 0xfea   :  { %12497 = vmatprep.subr.bf16.mxu1 %v13327_v6 }
 0xfeb   :  { %v13163_v60 = vpop.eup %13162  ;;  %v12498_v61 = vpack.c.bf16 %v12695_v58, %v12694_v59  ;;  %v12505_v54 = vpack.c.bf16 %v12705_v15, %v12704_v19 }
 0xfec   :  { %v12698_v62 = vpop.permute.xlu1 %12697  ;;  %v2036_v63 = vmul.f32 %v13163_v60, %v13159_v33  ;;  %v2280_v23 = vpop.permute.xlu0 %2279 }
 0xfed   :  { %v12700_v2 = vunpack.i.h.bf16 %v12698_v62  ;;  %v12699_v4 = vunpack.i.l.bf16 %v12698_v62 }
 0xfee   :  { %12100 = vmatmul.mubr.msk.f32.vlgmr.msra.gmra.mrb[22].mxu1 %vm1503_vm4, %v2036_v63 }
 0xfef   :  { %v13165_v7 = vpop.eup %13164  ;;  %v12501_v8 = vpack.c.bf16 %v12700_v2, %v12699_v4  ;;  %12499 = vmatpush3.bf16.msra.mxu1 %v12498_v61  ;;  %12106 = vmatprep.mubr.msk.f32.mxu1 %vm13311_vm1, %v13310_v9 }
 0xff0   :  { %v2038_v10 = vmul.f32 %v13165_v7, %v13161_v48  ;;  %12504 = vmatprep.subr.bf16.mxu1 %v13327_v6  ;;  %v2198_v22 = vpop.permute.xlu1 %2197 }
 0xff1   :  { %12503 = vmatpush3.bf16.xpose.msk.msra.mxu0 %vm13721_vm5, %v12501_v8 }
 0xff2   :  { %12107 = vmatmul.mubr.msk.f32.vlgmr.msra.gmra.mrb[24].mxu1 %vm1503_vm4, %v2038_v10  ;;  %12508 = vmatprep.subr.bf16.mxu0 %v13327_v6 }
 0xff3   :  { %12120 = vmatprep.mubr.msk.f32.mxu1 %vm13311_vm1, %v13310_v9 }
 0xff8   :  { %12507 = vmatpush3.bf16.xpose.msk.msra.mxu1 %vm13721_vm5, %v12505_v54  ;;  %12114 = vmatmul.mubr.msk.f32.vlgmr.msra.gmra.mrb[24].mxu0 %vm161_vm2, %v2198_v22 }
 0xff9   :  { %12511 = vmatprep.subr.bf16.mxu1 %v13327_v6  ;;  %12127 = vmatprep.mubr.msk.f32.mxu0 %vm13311_vm1, %v13310_v9 }
 0xfff   :  { %12121 = vmatmul.mubr.msk.f32.vlgmr.msra.gmra.mrb[26].mxu1 %vm161_vm2, %v2280_v23 }
0x1000   :  { %12134 = vmatprep.mubr.msk.f32.mxu1 %vm13311_vm1, %v13310_v9 }
0x10c1   :  { %v13792_v24 = vpop.f32.mrb[22].mxu1 }
0x10c2   :  { %v12101_v25 = vpop.f32.mrb[23].mxu1 }
0x10c5   :  { %v13794_v26 = vpop.f32.mrb[24].mxu1 }
0x10c6   :  { %v12108_v27 = vpop.f32.mrb[25].mxu1 }
0x10cb   :  { %v2275_v1 = vpop.f32.mrb[24].mxu0 }
0x10cc   :  { %v2276_v3 = vadd.f32 %v13752_v0, %v2275_v1  ;;  %v12115_v17 = vpop.f32.mrb[25].mxu0 }
0x10ce   :  { %v2361_v30 = vsel %vm1503_vm4, %v2276_v3, -inf }
0x10cf   :  { %2362 = vmax.xlane.f32.xlu1 %v2361_v30 }
0x10d2   :  { %v2357_v34 = vpop.f32.mrb[26].mxu1 }
0x10d3   :  { %v2358_v36 = vadd.f32 %v13752_v0, %v2357_v34  ;;  %v12122_v38 = vpop.f32.mrb[27].mxu1 }
0x10d5   :  { %v2364_v39 = vsel %vm1503_vm4, %v2358_v36, -inf }
0x10d6   :  { %2365 = vmax.xlane.f32.xlu0 %v2364_v39 }
0x10e0   :  { %12712 = vrot.lane.b32.xlu1 %v13730_v28, %s13314_s15 }
0x10e4   :  { %12717 = vrot.lane.b32.xlu1 %v13725_v20, %s13318_s19 }
0x115c   :  { %v2363_v40 = vpop.xlane.xlu1 %2362 }
0x115d   :  { %v2367_v43 = vsub.f32 %v2276_v3, %v2363_v40 }
0x115f   :  { %v2369_v44 = vmul.f32 1.442695, %v2367_v43 }
0x1160   :  { %v12713_v18 = vpop.permute.xlu1 %12712 }
0x1161   :  { %13166 = vpow2.f32 %v2369_v44  ;;  %v12715_v45 = vunpack.i.h.bf16 %v12713_v18  ;;  %v12714_v46 = vunpack.i.l.bf16 %v12713_v18 }
0x1163   :  { %v12512_v33 = vpack.c.bf16 %v12715_v45, %v12714_v46  ;;  %v2366_v47 = vpop.xlane.xlu0 %2365 }
0x1164   :  { %v2368_v48 = vsub.f32 %v2358_v36, %v2366_v47  ;;  %v12718_v56 = vpop.permute.xlu1 %12717 }
0x1165   :  { %12513 = vmatpush3.bf16.msra.mxu1 %v12512_v33  ;;  %v12720_v63 = vunpack.i.h.bf16 %v12718_v56  ;;  %v12719_v2 = vunpack.i.l.bf16 %v12718_v56 }
0x1166   :  { %v2371_v49 = vmul.f32 1.442695, %v2368_v48  ;;  %12518 = vmatprep.subr.bf16.mxu1 %v13327_v6 }
0x1167   :  { %v12515_v52 = vpack.c.bf16 %v12720_v63, %v12719_v2 }
0x1168   :  { %13168 = vpow2.f32 %v2371_v49 }
0x116b   :  { %v13167_v50 = vpop.eup %13166 }
0x116c   :  { %v2373_v51 = vsel %vm1503_vm4, %v13167_v50, 0.0 }
0x116d   :  { %2374 = vadd.xlane.f32.xlu0 %v2373_v51 }
0x1172   :  { %v13169_v53 = vpop.eup %13168 }
0x1173   :  { %v2376_v55 = vsel %vm1503_vm4, %v13169_v53, 0.0 }
0x1174   :  { %2377 = vadd.xlane.f32.xlu1 %v2376_v55 }
0x1183   :  { %12707 = vrot.lane.b32.xlu0 %v13725_v20, %s13314_s15 }
0x1185   :  { %2541 = vrot.lane.b32.xlu1 %v13735_v21, %s13318_s19 }
0x1187   :  { %12722 = vrot.lane.b32.xlu0 %v13730_v28, %s13318_s19 }
0x118b   :  { %2623 = vrot.lane.b32.xlu0 %v13743_v29, %s13318_s19 }
0x11fa   :  { %v2375_v13 = vpop.xlane.xlu0 %2374 }
0x11fb   :  { %13170 = vrcp.f32 %v2375_v13 }
0x11fe   :  { %v12708_v57 = vpop.permute.xlu0 %12707 }
0x11ff   :  { %v12710_v58 = vunpack.i.h.bf16 %v12708_v57  ;;  %v12709_v59 = vunpack.i.l.bf16 %v12708_v57 }
0x1201   :  { %v12509_v60 = vpack.c.bf16 %v12710_v58, %v12709_v59  ;;  %v2378_v61 = vpop.xlane.xlu1 %2377 }
0x1202   :  { %13172 = vrcp.f32 %v2378_v61  ;;  %v12723_v7 = vpop.permute.xlu0 %12722 }
0x1203   :  { %12510 = vmatpush3.bf16.msra.mxu0 %v12509_v60  ;;  %v12725_v8 = vunpack.i.h.bf16 %v12723_v7  ;;  %v12724_v10 = vunpack.i.l.bf16 %v12723_v7 }
0x1204   :  { %12514 = vmatprep.subr.bf16.mxu0 %v13327_v6 }
0x1205   :  { %v13171_v62 = vpop.eup %13170  ;;  %v12519_v54 = vpack.c.bf16 %v12725_v8, %v12724_v10  ;;  %v2542_v22 = vpop.permute.xlu1 %2541 }
0x1206   :  { %v2380_v4 = vmul.f32 %v13171_v62, %v13167_v50  ;;  %v2624_v23 = vpop.permute.xlu0 %2623 }
0x1208   :  { %12128 = vmatmul.mubr.msk.f32.vlgmr.msra.gmra.mrb[26].mxu0 %vm1503_vm4, %v2380_v4 }
0x1209   :  { %12141 = vmatprep.mubr.msk.f32.mxu0 %vm13311_vm1, %v13310_v9 }
0x120c   :  { %v13173_v15 = vpop.eup %13172  ;;  %12517 = vmatpush3.bf16.xpose.msk.msra.mxu0 %vm13721_vm5, %v12515_v52 }
0x120d   :  { %v2382_v19 = vmul.f32 %v13173_v15, %v13169_v53  ;;  %12522 = vmatprep.subr.bf16.mxu0 %v13327_v6 }
0x120f   :  { %12135 = vmatmul.mubr.msk.f32.vlgmr.msra.gmra.mrb[28].mxu1 %vm1503_vm4, %v2382_v19 }
0x1210   :  { %12521 = vmatpush3.bf16.xpose.msk.msra.mxu1 %vm13721_vm5, %v12519_v54  ;;  %12148 = vmatprep.mubr.msk.f32.mxu1 %vm13311_vm1, %v13310_v9 }
0x1211   :  { %12525 = vmatprep.subr.bf16.mxu1 %v13327_v6 }
0x1213   :  { %12142 = vmatmul.mubr.msk.f32.vlgmr.msra.gmra.mrb[28].mxu0 %vm161_vm2, %v2542_v22 }
0x1214   :  { %12155 = vmatprep.mubr.msk.f32.mxu0 %vm13311_vm1, %v13310_v9 }
0x1217   :  { %12149 = vmatmul.mubr.msk.f32.vlgmr.msra.gmra.mrb[30].mxu1 %vm161_vm2, %v2624_v23 }
0x1218   :  { %12162 = vmatprep.mubr.msk.f32.mxu1 %vm13311_vm1, %v13310_v9 }
0x12db   :  { %v13834_v25 = vpop.f32.mrb[26].mxu0 }
0x12dc   :  { %v12129_v27 = vpop.f32.mrb[27].mxu0 }
0x12e2   :  { %v13836_v1 = vpop.f32.mrb[28].mxu1 }
0x12e3   :  { %v12136_v3 = vpop.f32.mrb[29].mxu1 }
0x12e6   :  { %v2619_v17 = vpop.f32.mrb[28].mxu0 }
0x12e7   :  { %v2620_v30 = vadd.f32 %v13752_v0, %v2619_v17  ;;  %v12143_v34 = vpop.f32.mrb[29].mxu0 }
0x12e9   :  { %v2705_v36 = vsel %vm1503_vm4, %v2620_v30, -inf }
0x12ea   :  { %v2701_v38 = vpop.f32.mrb[30].mxu1  ;;  %2706 = vmax.xlane.f32.xlu1 %v2705_v36 }
0x12eb   :  { %v2702_v39 = vadd.f32 %v13752_v0, %v2701_v38  ;;  %v12150_v40 = vpop.f32.mrb[31].mxu1 }
0x12ed   :  { %v2708_v43 = vsel %vm1503_vm4, %v2702_v39, -inf }
0x12ee   :  { %2709 = vmax.xlane.f32.xlu0 %v2708_v43 }
0x12fb   :  { %12732 = vrot.lane.b32.xlu1 %v13730_v28, %s13317_s18 }
0x12ff   :  { %12737 = vrot.lane.b32.xlu1 %v13725_v20, %s15846_s22 }
0x1377   :  { %v2707_v44 = vpop.xlane.xlu1 %2706 }
0x1378   :  { %v2711_v18 = vsub.f32 %v2620_v30, %v2707_v44 }
0x137a   :  { %v2713_v45 = vmul.f32 1.442695, %v2711_v18 }
0x137b   :  { %v2710_v46 = vpop.xlane.xlu0 %2709  ;;  %v12733_v33 = vpop.permute.xlu1 %12732 }
0x137c   :  { %13174 = vpow2.f32 %v2713_v45  ;;  %v2712_v47 = vsub.f32 %v2702_v39, %v2710_v46  ;;  %v12735_v48 = vunpack.i.h.bf16 %v12733_v33  ;;  %v12734_v49 = vunpack.i.l.bf16 %v12733_v33 }
0x137e   :  { %v2715_v50 = vmul.f32 1.442695, %v2712_v47  ;;  %v12526_v51 = vpack.c.bf16 %v12735_v48, %v12734_v49 }
0x137f   :  { %v12738_v57 = vpop.permute.xlu1 %12737 }
0x1380   :  { %13176 = vpow2.f32 %v2715_v50  ;;  %12527 = vmatpush3.bf16.msra.mxu1 %v12526_v51  ;;  %v12740_v4 = vunpack.i.h.bf16 %v12738_v57  ;;  %v12739_v7 = vunpack.i.l.bf16 %v12738_v57 }
0x1381   :  { %12532 = vmatprep.subr.bf16.mxu1 %v13327_v6 }
0x1382   :  { %v12529_v15 = vpack.c.bf16 %v12740_v4, %v12739_v7 }
0x1386   :  { %v13175_v53 = vpop.eup %13174 }
0x1387   :  { %v2717_v55 = vsel %vm1503_vm4, %v13175_v53, 0.0 }
0x1388   :  { %2718 = vadd.xlane.f32.xlu0 %v2717_v55 }
0x138a   :  { %v13177_v13 = vpop.eup %13176 }
0x138b   :  { %v2720_v56 = vsel %vm1503_vm4, %v13177_v13, 0.0 }
0x138c   :  { %2721 = vadd.xlane.f32.xlu1 %v2720_v56 }
0x139d   :  { %2885 = vrot.lane.b32.xlu1 %v13735_v21, %s15846_s22 }
0x139e   :  { %12727 = vrot.lane.b32.xlu0 %v13725_v20, %s13317_s18 }
0x13a2   :  { %12742 = vrot.lane.b32.xlu0 %v13730_v28, %s15846_s22 }
0x13a6   :  { %2967 = vrot.lane.b32.xlu0 %v13743_v29, %s15846_s22 }
0x1415   :  { %v2719_v58 = vpop.xlane.xlu0 %2718 }
0x1416   :  { %13178 = vrcp.f32 %v2719_v58 }
0x1419   :  { %v2722_v59 = vpop.xlane.xlu1 %2721  ;;  %v12728_v60 = vpop.permute.xlu0 %12727 }
0x141a   :  { %13180 = vrcp.f32 %v2722_v59  ;;  %v12730_v61 = vunpack.i.h.bf16 %v12728_v60  ;;  %v12729_v62 = vunpack.i.l.bf16 %v12728_v60 }
0x141c   :  { %v12523_v63 = vpack.c.bf16 %v12730_v61, %v12729_v62 }
0x141d   :  { %v12743_v21 = vpop.permute.xlu0 %12742  ;;  %v2886_v22 = vpop.permute.xlu1 %2885 }
0x141e   :  { %12524 = vmatpush3.bf16.msra.mxu0 %v12523_v63  ;;  %v12745_v8 = vunpack.i.h.bf16 %v12743_v21  ;;  %v12744_v10 = vunpack.i.l.bf16 %v12743_v21 }
0x141f   :  { %12528 = vmatprep.subr.bf16.mxu0 %v13327_v6 }
0x1420   :  { %v13179_v2 = vpop.eup %13178  ;;  %v12533_v54 = vpack.c.bf16 %v12745_v8, %v12744_v10 }
0x1421   :  { %v2724_v52 = vmul.f32 %v13179_v2, %v13175_v53  ;;  %v2968_v23 = vpop.permute.xlu0 %2967 }
0x1423   :  { %12156 = vmatmul.mubr.msk.f32.vlgmr.msra.gmra.mrb[30].mxu0 %vm1503_vm4, %v2724_v52 }
0x1424   :  { %v13181_v29 = vpop.eup %13180  ;;  %12169 = vmatprep.mubr.msk.f32.mxu0 %vm13311_vm1, %v13310_v9 }
0x1425   :  { %v2726_v19 = vmul.f32 %v13181_v29, %v13177_v13 }
0x1427   :  { %12163 = vmatmul.mubr.msk.f32.vlgmr.msra.gmra.mrb[32].mxu1 %vm1503_vm4, %v2726_v19  ;;  %12531 = vmatpush3.bf16.xpose.msk.msra.mxu0 %vm13721_vm5, %v12529_v15 }
0x1428   :  { %12535 = vmatpush3.bf16.xpose.msk.msra.mxu1 %vm13721_vm5, %v12533_v54  ;;  %12176 = vmatprep.mubr.msk.f32.mxu1 %vm13311_vm1, %v13310_v9 }
0x1429   :  { %12539 = vmatprep.subr.bf16.mxu1 %v13327_v6  ;;  %12536 = vmatprep.subr.bf16.mxu0 %v13327_v6 }
0x142e   :  { %12170 = vmatmul.mubr.msk.f32.vlgmr.msra.gmra.mrb[32].mxu0 %vm161_vm2, %v2886_v22 }
0x142f   :  { %12177 = vmatmul.mubr.msk.f32.vlgmr.msra.gmra.mrb[34].mxu1 %vm161_vm2, %v2968_v23  ;;  %12183 = vmatprep.mubr.msk.f32.mxu0 %vm13311_vm1, %v13310_v9 }
0x1430   :  { %12190 = vmatprep.mubr.msk.f32.mxu1 %vm13311_vm1, %v13310_v9 }
0x14f6   :  { %v2802_v27 = vpop.f32.mrb[30].mxu0 }
0x14f7   :  { %v12157_v3 = vpop.f32.mrb[31].mxu0 }
0x14fa   :  { %v2881_v17 = vpop.f32.mrb[32].mxu1 }
0x14fb   :  { %v12164_v30 = vpop.f32.mrb[33].mxu1 }
0x1501   :  { %v2963_v34 = vpop.f32.mrb[32].mxu0 }
0x1502   :  { %v3045_v36 = vpop.f32.mrb[34].mxu1  ;;  %v2964_v38 = vadd.f32 %v13752_v0, %v2963_v34  ;;  %v12171_v39 = vpop.f32.mrb[33].mxu0 }
0x1503   :  { %v3046_v40 = vadd.f32 %v13752_v0, %v3045_v36  ;;  %v12178_v43 = vpop.f32.mrb[35].mxu1 }
0x1504   :  { %v3049_v44 = vsel %vm1503_vm4, %v2964_v38, -inf }
0x1505   :  { %v3052_v18 = vsel %vm1503_vm4, %v3046_v40, -inf  ;;  %3050 = vmax.xlane.f32.xlu1 %v3049_v44 }
0x1506   :  { %3053 = vmax.xlane.f32.xlu0 %v3052_v18 }
0x1592   :  { %v3051_v45 = vpop.xlane.xlu1 %3050 }
0x1593   :  { %v3054_v46 = vpop.xlane.xlu0 %3053  ;;  %v3055_v33 = vsub.f32 %v2964_v38, %v3051_v45 }
0x1594   :  { %v3056_v47 = vsub.f32 %v3046_v40, %v3054_v46 }
0x1595   :  { %v3057_v48 = vmul.f32 1.442695, %v3055_v33 }
0x1596   :  { %v3059_v49 = vmul.f32 1.442695, %v3056_v47 }
0x1597   :  { %13182 = vpow2.f32 %v3057_v48 }
0x1598   :  { %13184 = vpow2.f32 %v3059_v49 }
0x15a1   :  { %v13183_v50 = vpop.eup %13182 }
0x15a2   :  { %v13185_v51 = vpop.eup %13184  ;;  %v3061_v53 = vsel %vm1503_vm4, %v13183_v50, 0.0 }
0x15a3   :  { %v3064_v0 = vsel %vm1503_vm4, %v13185_v51, 0.0  ;;  %3062 = vadd.xlane.f32.xlu0 %v3061_v53 }
0x15a4   :  { %3065 = vadd.xlane.f32.xlu1 %v3064_v0 }
0x15b5   :  { %12752 = vrot.lane.b32.xlu1 %v13730_v28, %s13320_s21 }
0x15b9   :  { %12757 = vrot.lane.b32.xlu1 %v13672_v35, %s15848_s24  ;;  %12747 = vrot.lane.b32.xlu0 %v13725_v20, %s13320_s21 }
0x15bd   :  { %3231 = vrot.lane.b32.xlu1 %v13834_v25, %s15844_s20  ;;  %12762 = vrot.lane.b32.xlu0 %v13655_v31, %s15848_s24 }
0x15c1   :  { %3239 = vrot.lane.b32.xlu1 %v2802_v27, %s15852_s0  ;;  %3233 = vrot.lane.b32.xlu0 %v13836_v1, %s15844_s20 }
0x15c5   :  { %3241 = vrot.lane.b32.xlu0 %v2881_v17, %s15852_s0 }
0x1630   :  { %v3063_v28 = vpop.xlane.xlu0 %3062 }
0x1631   :  { %v3066_v55 = vpop.xlane.xlu1 %3065  ;;  %13186 = vrcp.f32 %v3063_v28 }
0x1632   :  { %13188 = vrcp.f32 %v3066_v55  ;;  %v3393_v55 = vld [vmem:[%s15823_s6] sm:$0xff] }
0x1634   :  { %v12748_v35 = vpop.permute.xlu0 %12747 }
0x1635   :  { %v12753_v13 = vpop.permute.xlu1 %12752  ;;  %v12750_v20 = vunpack.i.h.bf16 %v12748_v35  ;;  %v12749_v56 = vunpack.i.l.bf16 %v12748_v35  ;;  %v3401_v35 = vld [vmem:[%s15823_s6 + $0x40] sm:$0xff] }
0x1636   :  { %v12755_v57 = vunpack.i.h.bf16 %v12753_v13  ;;  %v12754_v25 = vunpack.i.l.bf16 %v12753_v13  ;;  %v3394_v13 = vld [vmem:[%s15823_s6 + $0x8] sm:$0xff] }
0x1637   :  { %v12537_v58 = vpack.c.bf16 %v12750_v20, %v12749_v56  ;;  %v10958_v20 = vcombine.low %v3393_v55, %v3401_v35  ;;  %v10959_v56 = vcombine.high %v3393_v55, %v3401_v35  ;;  %v3422_v55 = vld [vmem:[%s15823_s6 + $0xe8] sm:$0xff] }
0x1638   :  { %v12540_v59 = vpack.c.bf16 %v12755_v57, %v12754_v25  ;;  %v12763_v63 = vpop.permute.xlu0 %12762  ;;  %v3402_v57 = vld [vmem:[%s15823_s6 + $0x48] sm:$0xff] }
0x1639   :  { %12538 = vmatpush3.bf16.msra.mxu0 %v12537_v58  ;;  %v12758_v62 = vpop.permute.xlu1 %12757  ;;  %v12765_v4 = vunpack.i.h.bf16 %v12763_v63  ;;  %v12764_v7 = vunpack.i.l.bf16 %v12763_v63  ;;  %v10960_v25 = vcombine.low %v3394_v13, %v3402_v57  ;;  %v10961_v58 = vcombine.high %v3394_v13, %v3402_v57  ;;  %v3399_v57 = vld [vmem:[%s15823_s6 + $0x30] sm:$0xff] }
0x163a   :  { %12541 = vmatpush3.bf16.msra.mxu1 %v12540_v59  ;;  %v12760_v21 = vunpack.i.h.bf16 %v12758_v62  ;;  %v12759_v2 = vunpack.i.l.bf16 %v12758_v62  ;;  %v3409_v59 = vld [vmem:[%s15823_s6 + $0x80] sm:$0xff] }
0x163b   :  { %v13187_v31 = vpop.eup %13186  ;;  %v12546_v8 = vpack.c.bf16 %v12765_v4, %v12764_v7  ;;  %3675 = vmatprep.subr.bf16.mxu1 %v10959_v56  ;;  %v3396_v4 = vld [vmem:[%s15823_s6 + $0x18] sm:$0xff] }
0x163c   :  { %v13189_v60 = vpop.eup %13188  ;;  %v3068_v61 = vmul.f32 %v13187_v31, %v13183_v50  ;;  %v12542_v52 = vpack.c.bf16 %v12760_v21, %v12759_v2  ;;  %v3234_v22 = vpop.permute.xlu0 %3233  ;;  %v3417_v31 = vld [vmem:[%s15823_s6 + $0xc0] sm:$0xff]  ;;  %v3395_v21 = vld [vmem:[%s15823_s6 + $0x10] sm:$0xff] }
0x163d   :  { %v3070_v1 = vmul.f32 %v13189_v60, %v13185_v51  ;;  %v3232_v54 = vpop.permute.xlu1 %3231  ;;  %v3254_v17 = vsel %vm161_vm2, %v13794_v26, %v3234_v22  ;;  %v3410_v60 = vld [vmem:[%s15823_s6 + $0x88] sm:$0xff]  ;;  %v3403_v2 = vld [vmem:[%s15823_s6 + $0x50] sm:$0xff] }
0x163e   :  { %12184 = vmatmul.mubr.msk.f32.vlgmr.msra.gmra.mrb[34].mxu0 %vm1503_vm4, %v3068_v61  ;;  %12543 = vmatprep.subr.bf16.mxu0 %v12542_v52  ;;  %v3253_v3 = vsel %vm161_vm2, %v13792_v24, %v3232_v54  ;;  %v10975_v61 = vcombine.high %v3409_v59, %v3417_v31  ;;  %v10963_v7 = vcombine.high %v3395_v21, %v3403_v2 }
0x163f   :  { %12191 = vmatmul.mubr.msk.f32.vlgmr.msra.gmra.mrb[36].mxu1 %vm1503_vm4, %v3070_v1  ;;  %12545 = vmatpush3.bf16.msra.mxu0 %v12542_v52  ;;  %v10974_v1 = vcombine.low %v3409_v59, %v3417_v31  ;;  %v3404_v52 = vld [vmem:[%s15823_s6 + $0x58] sm:$0xff] }
0x1640   :  { %3707 = vmatprep.mubr.f32.mxu1 %v13310_v9  ;;  %12547 = vmatprep.subr.bf16.mxu0 %v12546_v8  ;;  %v3242_v27 = vpop.permute.xlu0 %3241  ;;  %v3408_v59 = vld [vmem:[%s15823_s6 + $0x78] sm:$0xff] }
0x1641   :  { %v3240_v23 = vpop.permute.xlu1 %3239  ;;  %v3256_v36 = vsel %vm1503_vm4, %v3254_v17, %v3242_v27  ;;  %3676 = vmatpush1.bf16.msra.mxu1 %v10958_v20 }
0x1642   :  { %v3255_v30 = vsel %vm1503_vm4, %v3253_v3, %v3240_v23  ;;  %3677 = vmatprep.subr.bf16.mxu1 %v10975_v61 }
0x1643   :  { %12549 = vmatpush3.bf16.msra.mxu0 %v12546_v8  ;;  %v10962_v8 = vcombine.low %v3395_v21, %v3403_v2  ;;  %v3424_v21 = vld [vmem:[%s15823_s6 + $0xf8] sm:$0xff] }
0x1644   :  { %3720 = vmatprep.subr.bf16.mxu0 %v10961_v58  ;;  %v3400_v58 = vld [vmem:[%s15823_s6 + $0x38] sm:$0xff] }
0x1645   :  { %3678 = vmatpush1.bf16.msra.mxu1 %v10974_v1  ;;  %v3415_v1 = vld [vmem:[%s15823_s6 + $0xb0] sm:$0xff] }
0x1646   :  { %3765 = vmatprep.subr.bf16.mxu1 %v10963_v7 }
0x1711   :  { %v3146_v10 = vpop.f32.mrb[34].mxu0 }
0x1712   :  { %v3225_v29 = vpop.f32.mrb[36].mxu1  ;;  %3247 = vrot.lane.b32.xlu1 %v3146_v10, %s15853_s4  ;;  %v12185_v15 = vpop.f32.mrb[35].mxu0  ;;  %v10964_v10 = vcombine.low %v3396_v4, %v3404_v52 }
0x1713   :  { %3249 = vrot.lane.b32.xlu0 %v3225_v29, %s15853_s4  ;;  %v12192_v19 = vpop.f32.mrb[37].mxu1  ;;  %v10965_v29 = vcombine.high %v3396_v4, %v3404_v52  ;;  %v10972_v4 = vcombine.low %v3400_v58, %v3408_v59 }
0x1716   :  { %3271 = vrot.lane.b32.xlu1 %v13687_v42, %s15848_s24 }
0x1784   :  { %v3248_v34 = vpop.permute.xlu1 %3247 }
0x1785   :  { %v3250_v38 = vpop.permute.xlu0 %3249  ;;  %v3257_v39 = vsel %vm1506_vm3, %v3255_v30, %v3248_v34 }
0x1786   :  { %v3258_v42 = vsel %vm1506_vm3, %v3256_v36, %v3250_v38  ;;  %12201 = vmatprep.mubr.msk.f32.mxu0 %vm70_vm0, %v3257_v39  ;;  %v3411_v36 = vld [vmem:[%s15823_s6 + $0x90] sm:$0xff] }
0x1787   :  { %12202 = vmatmul.mubr.msk.f32.vlgmr.msra.gmra.mrb[36].mxu0 %vm70_vm0, %v3258_v42  ;;  %v3419_v39 = vld [vmem:[%s15823_s6 + $0xd0] sm:$0xff]  ;;  %v3412_v42 = vld [vmem:[%s15823_s6 + $0x98] sm:$0xff] }
0x1788   :  { %3752 = vmatprep.mubr.f32.mxu0 %v13310_v9  ;;  %v3272_v24 = vpop.permute.xlu1 %3271  ;;  %3721 = vmatpush1.bf16.msra.mxu0 %v10960_v25  ;;  %v3407_v25 = vld [vmem:[%s15823_s6 + $0x70] sm:$0xff] }
0x1789   :  { %v10971_v61 = vcombine.high %v3399_v57, %v3407_v25  ;;  %v10970_v2 = vcombine.low %v3399_v57, %v3407_v25 }
0x185a   :  { %v12203_v40 = vpop.f32.mrb[36].mxu0 }
0x185b   :  { %v3352_v43 = vadd.f32 %v12203_v40, %v3272_v24  ;;  %v3346_v26 = vpop.f32.mrb[37].mxu0 }
0x185c   :  { %v3347_v44 = vadd.f32 %v3346_v26, %v3272_v24  ;;  %v3420_v24 = vld [vmem:[%s15823_s6 + $0xd8] sm:$0xff] }
0x185d   :  { %v3356_v18 = vadd.f32 %v3352_v43, %v13706_v5 }
0x185e   :  { %v3355_v45 = vadd.f32 %v3347_v44, %v13704_v14  ;;  %v10979_v44 = vcombine.high %v3411_v36, %v3419_v39 }
0x185f   :  { %v3360_v46 = vsel %vm70_vm0, %v3356_v18, 0.0 }
0x1860   :  { %3361 = vadd.xlane.f32.xlu1 %v3360_v46  ;;  %v3357_v33 = vsel %vm70_vm0, %v3355_v45, 0.0 }
0x1861   :  { %3358 = vadd.xlane.f32.xlu0 %v3357_v33  ;;  %v3405_v33 = vld [vmem:[%s15823_s6 + $0x60] sm:$0xff] }
0x1871   :  { %3383 = vrot.lane.b32.xlu1 %v13670_v37, %s15854_s17 }
0x18ed   :  { %v3362_v47 = vpop.xlane.xlu1 %3361 }
0x18ee   :  { %v3364_v48 = vmul.f32 0.03125, %v3362_v47  ;;  %v3359_v49 = vpop.xlane.xlu0 %3358  ;;  %v3398_v47 = vld [vmem:[%s15823_s6 + $0x28] sm:$0xff] }
0x18ef   :  { %v3363_v50 = vmul.f32 0.03125, %v3359_v49  ;;  %v10978_v49 = vcombine.low %v3411_v36, %v3419_v39  ;;  %v12877_v36 = vld [vmem:[%s15824_s7 + $0x90] sm:$0xff]   ;;  %v12879_v39 = vld [vmem:[%s15824_s7 + $0xd8] sm:$0xff]  }
0x18f0   :  { %v3366_v51 = vsub.f32 %v3356_v18, %v3364_v48  ;;  %v10981_v18 = vcombine.high %v3412_v42, %v3420_v24  ;;  %v3406_v48 = vld [vmem:[%s15823_s6 + $0x68] sm:$0xff] }
0x18f1   :  { %v3365_v53 = vsub.f32 %v3355_v45, %v3363_v50  ;;  %v3384_v17 = vpop.permute.xlu1 %3383  ;;  %v3397_v45 = vld [vmem:[%s15823_s6 + $0x20] sm:$0xff]  ;;  %v10980_v50 = vcombine.low %v3412_v42, %v3420_v24  ;;  %v10968_v13 = vcombine.low %v3398_v47, %v3406_v48  ;;  %v12880_v42 = vld [vmem:[%s15824_s7 + $0x18] sm:$0xff]  }
0x18f2   :  { %v3368_v28 = vmul.f32 %v3366_v51, %v3366_v51  ;;  %v10966_v35 = vcombine.low %v3397_v45, %v3405_v33  ;;  %v12881_v24 = vld [vmem:[%s15824_s7 + $0x98] sm:$0xff]  }
0x18f3   :  { %v3367_v0 = vmul.f32 %v3365_v53, %v3365_v53 }
0x18f4   :  { %v3372_v14 = vsel %vm70_vm0, %v3368_v28, 0.0  ;;  %v3421_v28 = vld [vmem:[%s15823_s6 + $0xe0] sm:$0xff] }
0x18f5   :  { %v3369_v5 = vsel %vm70_vm0, %v3367_v0, 0.0  ;;  %v10969_v0 = vcombine.high %v3398_v47, %v3406_v48  ;;  %v12889_v47 = vld [vmem:[%s15824_s7 + $0xa8] sm:$0xff]   ;;  %v12890_v48 = vld [vmem:[%s15824_s7 + $0x70] sm:$0xff]  }
0x18f6   :  { %3370 = vadd.xlane.f32.xlu0 %v3369_v5  ;;  %v3413_v5 = vld [vmem:[%s15823_s6 + $0xa0] sm:$0xff] }
0x18f7   :  { %v10983_v20 = vcombine.high %v3413_v5, %v3421_v28  ;;  %v10982_v31 = vcombine.low %v3413_v5, %v3421_v28  ;;  %v12895_v5 = vld [vmem:[%s15824_s7 + $0xf8] sm:$0xff]  }
0x18f8   :  { %v12896_v28 = vld [vmem:[%s15824_s7 + $0x38] sm:$0xff]  }
0x18fa   :  { %3373 = vadd.xlane.f32.xlu0 %v3372_v14  ;;  %v3414_v14 = vld [vmem:[%s15823_s6 + $0xa8] sm:$0xff] }
0x18fb   :  { %v10985_v56 = vcombine.high %v3414_v14, %v3422_v55 }
0x1910   :  { %3388 = vrot.lane.b32.xlu0 %v13670_v37, %s15848_s24  ;;  %v3418_v37 = vld [vmem:[%s15823_s6 + $0xc8] sm:$0xff]  ;;  %s15856_s24 = smov 48  }
0x1911   :  { %v10976_v62 = vcombine.low %v3410_v60, %v3418_v37  ;;  %v10977_v63 = vcombine.high %v3410_v60, %v3418_v37  ;;  %v10984_v60 = vcombine.low %v3414_v14, %v3422_v55  ;;  %v10973_v37 = vcombine.high %v3400_v58, %v3408_v59  ;;  %v12897_v14 = vld [vmem:[%s15824_s7 + $0xb8] sm:$0xff]   ;;  %v12898_v55 = vld [vmem:[%s15824_s7 + $0x140] sm:$0xff]  }
0x1913   :  { %3722 = vmatprep.subr.bf16.mxu0 %v10977_v63  ;;  %v3416_v63 = vld [vmem:[%s15823_s6 + $0xb8] sm:$0xff] }
0x1914   :  { %3723 = vmatpush1.bf16.msra.mxu0 %v10976_v62  ;;  %v3423_v62 = vld [vmem:[%s15823_s6 + $0xf0] sm:$0xff]  ;;  %v10989_v52 = vcombine.high %v3416_v63, %v3424_v21 }
0x1915   :  { %3810 = vmatprep.subr.bf16.mxu0 %v10965_v29  ;;  %v10987_v7 = vcombine.high %v3415_v1, %v3423_v62  ;;  %v12866_v29 = vld [vmem:[%s15824_s7 + $0x40] sm:$0xff]  }
0x1983   :  { %v3371_v15 = vpop.xlane.xlu0 %3370 }
0x1984   :  { %v3375_v19 = vmul.f32 0.03125, %v3371_v15  ;;  %v12867_v15 = vld [vmem:[%s15824_s7 + $0xc0] sm:$0xff]  }
0x1986   :  { %v3377_v54 = vadd.f32 1e-05, %v3375_v19  ;;  %v12868_v19 = vld [vmem:[%s15824_s7] sm:$0xff]  }
0x1987   :  { %v3374_v22 = vpop.xlane.xlu0 %3373 }
0x1988   :  { %13190 = vrsqrt.f32 %v3377_v54  ;;  %v3376_v23 = vmul.f32 0.03125, %v3374_v22  ;;  %v12869_v54 = vld [vmem:[%s15824_s7 + $0x80] sm:$0xff]   ;;  %v12870_v22 = vld [vmem:[%s15824_s7 + $0x48] sm:$0xff]  }
0x198a   :  { %v3378_v27 = vadd.f32 1e-05, %v3376_v23  ;;  %v12871_v23 = vld [vmem:[%s15824_s7 + $0xc8] sm:$0xff]  }
0x198b   :  { %v3389_v34 = vpop.permute.xlu0 %3388 }
0x198c   :  { %13192 = vrsqrt.f32 %v3378_v27  ;;  %v12872_v27 = vld [vmem:[%s15824_s7 + $0x8] sm:$0xff]  }
0x1992   :  { %v13191_v3 = vpop.eup %13190 }
0x1993   :  { %v3381_v30 = vmul.f32 %v13191_v3, %v3365_v53  ;;  %v10967_v53 = vcombine.high %v3397_v45, %v3405_v33  ;;  %v12873_v3 = vld [vmem:[%s15824_s7 + $0x88] sm:$0xff]  }
0x1994   :  { %v12886_v45 = vld [vmem:[%s15824_s7 + $0x68] sm:$0xff]  }
0x1995   :  { %v3386_v38 = vmul.f32 %v3384_v17, %v3381_v30  ;;  %v12875_v30 = vld [vmem:[%s15824_s7 + $0xd0] sm:$0xff]   ;;  %v12888_v33 = vld [vmem:[%s15824_s7 + $0x28] sm:$0xff]  }
0x1996   :  { %v13193_v40 = vpop.eup %13192 }
0x1997   :  { %v3382_v43 = vmul.f32 %v13193_v40, %v3366_v51  ;;  %v13972_v26 = vadd.f32 %v3389_v34, %v3386_v38  ;;  %v12878_v38 = vld [vmem:[%s15824_s7 + $0x58] sm:$0xff]   ;;  %v12882_v40 = vld [vmem:[%s15824_s7 + $0x60] sm:$0xff]  }
0x1999   :  { %v3387_v46 = vmul.f32 %v3384_v17, %v3382_v43  ;;  %10990 = vmatmul.mubr.msk.f32.vlgmr.msra.gmra.mrb[38].mxu1 %vm70_vm0, %v13972_v26  ;;  %10992 = vmatmul.mubr.msk.f32.vlgmr.msra.gmra.mrb[38].mxu0 %vm70_vm0, %v13972_v26  ;;  %v12874_v17 = vld [vmem:[%s15824_s7 + $0x50] sm:$0xff]   ;;  %v12883_v43 = vld [vmem:[%s15824_s7 + $0xe0] sm:$0xff]  }
0x199a   :  { %3766 = vmatpush1.bf16.msra.mxu1 %v10962_v8  ;;  %3811 = vmatpush1.bf16.msra.mxu0 %v10964_v10  ;;  %v10986_v8 = vcombine.low %v3415_v1, %v3423_v62  ;;  %v10988_v10 = vcombine.low %v3416_v63, %v3424_v21 }
0x199b   :  { %v13990_v51 = vadd.f32 %v3389_v34, %v3387_v46  ;;  %3713 = vmatprep.mubr.f32.mxu1 %v13310_v9  ;;  %3758 = vmatprep.mubr.f32.mxu0 %v13310_v9  ;;  %v12876_v34 = vld [vmem:[%s15824_s7 + $0x10] sm:$0xff]   ;;  %v12887_v46 = vld [vmem:[%s15824_s7 + $0xe8] sm:$0xff]  }
0x199c   :  { %3767 = vmatprep.subr.bf16.mxu1 %v10979_v44  ;;  %3812 = vmatprep.subr.bf16.mxu0 %v10981_v18  ;;  %v12884_v44 = vld [vmem:[%s15824_s7 + $0x20] sm:$0xff]  }
0x199d   :  { %10991 = vmatmul.mubr.msk.f32.gmra.mrb[40].mxu1 %vm70_vm0, %v13990_v51  ;;  %10993 = vmatmul.mubr.msk.f32.gmra.mrb[40].mxu0 %vm70_vm0, %v13990_v51  ;;  %v12885_v18 = vld [vmem:[%s15824_s7 + $0xa0] sm:$0xff]  }
0x199e   :  { %3768 = vmatpush1.bf16.msra.mxu1 %v10978_v49  ;;  %3813 = vmatpush1.bf16.msra.mxu0 %v10980_v50  ;;  %v12891_v49 = vld [vmem:[%s15824_s7 + $0xf0] sm:$0xff]  }
0x199f   :  { %3797 = vmatprep.mubr.f32.mxu1 %v13310_v9  ;;  %3842 = vmatprep.mubr.f32.mxu0 %v13310_v9  ;;  %v12892_v50 = vld [vmem:[%s15824_s7 + $0x30] sm:$0xff]  }
0x19a0   :  { %3855 = vmatprep.subr.bf16.mxu1 %v10967_v53  ;;  %3900 = vmatprep.subr.bf16.mxu0 %v10969_v0  ;;  %v12893_v53 = vld [vmem:[%s15824_s7 + $0xb0] sm:$0xff]   ;;  %v12894_v0 = vld [vmem:[%s15824_s7 + $0x78] sm:$0xff]  }
0x19a1   :  { %10994 = vmatmul.mubr.msk.f32.vlgmr.msra.gmra.mrb[42].mxu1 %vm70_vm0, %v13972_v26  ;;  %10996 = vmatmul.mubr.msk.f32.vlgmr.msra.gmra.mrb[42].mxu0 %vm70_vm0, %v13972_v26 }
0x19a2   :  { %3856 = vmatpush1.bf16.msra.mxu1 %v10966_v35  ;;  %3901 = vmatpush1.bf16.msra.mxu0 %v10968_v13  ;;  %v12899_v35 = vld [vmem:[%s15824_s7 + $0x1c0] sm:$0xff]  }
0x19a3   :  { %3803 = vmatprep.mubr.f32.mxu1 %v13310_v9  ;;  %3848 = vmatprep.mubr.f32.mxu0 %v13310_v9  ;;  %v14175_v13 = vld [vmem:[%s15825_s8] sm:$0xff] }
0x19a4   :  { %3857 = vmatprep.subr.bf16.mxu1 %v10983_v20  ;;  %3902 = vmatprep.subr.bf16.mxu0 %v10985_v56  ;;  %v14178_v20 = vsub.s32 3, %v13435_v11  ;;  %v3432_v56 = vrot.slane %v14175_v13, %v13442_v12  ;;  %v3440_v57 = vrot.slane %v14175_v13, %v13683_v41  ;;  %v3436_v25 = vrot.slane %v14175_v13, %v13658_v32 }
0x19a5   :  { %10995 = vmatmul.mubr.msk.f32.gmra.mrb[44].mxu1 %vm70_vm0, %v13990_v51  ;;  %10997 = vmatmul.mubr.msk.f32.gmra.mrb[44].mxu0 %vm70_vm0, %v13990_v51 }
0x19a6   :  { %3858 = vmatpush1.bf16.msra.mxu1 %v10982_v31  ;;  %3903 = vmatpush1.bf16.msra.mxu0 %v10984_v60  ;;  %v3444_v58 = vrot.slane %v14175_v13, %v14178_v20  ;;  %v14189_v60 = vsub.s32 5, %v13435_v11 }
0x19a7   :  { %3887 = vmatprep.mubr.f32.mxu1 %v13310_v9  ;;  %3932 = vmatprep.mubr.f32.mxu0 %v13310_v9 }
0x19a8   :  { %3945 = vmatprep.subr.bf16.mxu1 %v10971_v61  ;;  %3990 = vmatprep.subr.bf16.mxu0 %v10973_v37 }
0x19a9   :  { %10998 = vmatmul.mubr.msk.f32.vlgmr.msra.gmra.mrb[46].mxu1 %vm70_vm0, %v13972_v26  ;;  %11000 = vmatmul.mubr.msk.f32.vlgmr.msra.gmra.mrb[46].mxu0 %vm70_vm0, %v13972_v26 }
0x19aa   :  { %3946 = vmatpush1.bf16.msra.mxu1 %v10970_v2  ;;  %3991 = vmatpush1.bf16.msra.mxu0 %v10972_v4  ;;  %v14192_v2 = vsub.s32 7, %v13435_v11 }
0x19ab   :  { %3893 = vmatprep.mubr.f32.mxu1 %v13310_v9  ;;  %3938 = vmatprep.mubr.f32.mxu0 %v13310_v9 }
0x19ac   :  { %3947 = vmatprep.subr.bf16.mxu1 %v10987_v7  ;;  %3992 = vmatprep.subr.bf16.mxu0 %v10989_v52 }
0x19ad   :  { %10999 = vmatmul.mubr.msk.f32.gmra.mrb[48].mxu1 %vm70_vm0, %v13990_v51  ;;  %11001 = vmatmul.mubr.msk.f32.gmra.mrb[48].mxu0 %vm70_vm0, %v13990_v51 }
0x19ae   :  { %3948 = vmatpush1.bf16.msra.mxu1 %v10986_v8  ;;  %3993 = vmatpush1.bf16.msra.mxu0 %v10988_v10  ;;  %v12900_v10 = vld [vmem:[%s15824_s7 + $0x100] sm:$0xff]  }
0x19af   :  { %3977 = vmatprep.mubr.f32.mxu1 %v13310_v9  ;;  %4022 = vmatprep.mubr.f32.mxu0 %v13310_v9 }
0x19b0   :  { %11490 = vmatprep.subr.bf16.mxu1 %v12866_v29  ;;  %11512 = vmatprep.subr.bf16.mxu0 %v12867_v15  ;;  %v12901_v29 = vld [vmem:[%s15824_s7 + $0x180] sm:$0xff]   ;;  %v14202_v15 = vrot.slane %v14175_v13, %v14189_v60 }
0x19b1   :  { %11002 = vmatmul.mubr.msk.f32.vlgmr.msra.gmra.mrb[50].mxu1 %vm70_vm0, %v13972_v26  ;;  %11004 = vmatmul.mubr.msk.f32.vlgmr.msra.gmra.mrb[50].mxu0 %vm70_vm0, %v13972_v26 }
0x19b2   :  { %3983 = vmatprep.mubr.f32.mxu1 %v13310_v9  ;;  %4028 = vmatprep.mubr.f32.mxu0 %v13310_v9 }
0x19b3   :  { %11491 = vmatpush3.bf16.msra.mxu1 %v12868_v19  ;;  %11513 = vmatpush3.bf16.msra.mxu0 %v12869_v54 }
0x19b4   :  { %11492 = vmatprep.subr.bf16.mxu1 %v12870_v22  ;;  %11514 = vmatprep.subr.bf16.mxu0 %v12871_v23 }
0x19b5   :  { %11003 = vmatmul.mubr.msk.f32.gmra.mrb[52].mxu1 %vm70_vm0, %v13990_v51  ;;  %11005 = vmatmul.mubr.msk.f32.gmra.mrb[52].mxu0 %vm70_vm0, %v13990_v51 }
0x19b7   :  { %11493 = vmatpush3.bf16.msra.mxu1 %v12872_v27  ;;  %11515 = vmatpush3.bf16.msra.mxu0 %v12873_v3 }
0x19b8   :  { %11494 = vmatprep.subr.bf16.mxu1 %v12874_v17  ;;  %11516 = vmatprep.subr.bf16.mxu0 %v12875_v30  ;;  %v12902_v17 = vld [vmem:[%s15824_s7 + $0x148] sm:$0xff]  }
0x19b9   :  { %v12903_v30 = vld [vmem:[%s15824_s7 + $0x1c8] sm:$0xff]  }
0x19bb   :  { %11495 = vmatpush3.bf16.msra.mxu1 %v12876_v34  ;;  %11517 = vmatpush3.bf16.msra.mxu0 %v12877_v36 }
0x19bc   :  { %11496 = vmatprep.subr.bf16.mxu1 %v12878_v38  ;;  %11518 = vmatprep.subr.bf16.mxu0 %v12879_v39  ;;  %v14212_v38 = vrot.slane %v14175_v13, %v14192_v2 }
0x19bf   :  { %11497 = vmatpush3.bf16.msra.mxu1 %v12880_v42  ;;  %11519 = vmatpush3.bf16.msra.mxu0 %v12881_v24 }
0x19c0   :  { %11498 = vmatprep.subr.bf16.mxu1 %v12882_v40  ;;  %11520 = vmatprep.subr.bf16.mxu0 %v12883_v43  ;;  %v12904_v43 = vld [vmem:[%s15824_s7 + $0x108] sm:$0xff]  }
0x19c3   :  { %11499 = vmatpush3.bf16.msra.mxu1 %v12884_v44  ;;  %11521 = vmatpush3.bf16.msra.mxu0 %v12885_v18  ;;  %v12905_v44 = vld [vmem:[%s15824_s7 + $0x188] sm:$0xff]  }
0x19c4   :  { %11500 = vmatprep.subr.bf16.mxu1 %v12886_v45  ;;  %11522 = vmatprep.subr.bf16.mxu0 %v12887_v46 }
0x19c7   :  { %11501 = vmatpush3.bf16.msra.mxu1 %v12888_v33  ;;  %11523 = vmatpush3.bf16.msra.mxu0 %v12889_v47  ;;  %v12906_v47 = vld [vmem:[%s15824_s7 + $0x150] sm:$0xff]  }
0x19c8   :  { %11502 = vmatprep.subr.bf16.mxu1 %v12890_v48  ;;  %11524 = vmatprep.subr.bf16.mxu0 %v12891_v49  ;;  %v12907_v48 = vld [vmem:[%s15824_s7 + $0x1d0] sm:$0xff]  }
0x19cb   :  { %11503 = vmatpush3.bf16.msra.mxu1 %v12892_v50  ;;  %11525 = vmatpush3.bf16.msra.mxu0 %v12893_v53 }
0x19cc   :  { %11504 = vmatprep.subr.bf16.mxu1 %v12894_v0  ;;  %11526 = vmatprep.subr.bf16.mxu0 %v12895_v5 }
0x19cf   :  { %11505 = vmatpush3.bf16.msra.mxu1 %v12896_v28  ;;  %11527 = vmatpush3.bf16.msra.mxu0 %v12897_v14  ;;  %v12908_v14 = vld [vmem:[%s15824_s7 + $0x110] sm:$0xff]  }
0x19d0   :  { %11534 = vmatprep.subr.bf16.mxu1 %v12898_v55  ;;  %11556 = vmatprep.subr.bf16.mxu0 %v12899_v35  ;;  %v12909_v55 = vld [vmem:[%s15824_s7 + $0x190] sm:$0xff]  }
0x1a6c   :  { %v3709_v59 = vpop.f32.mrb[38].mxu1  ;;  %v3754_v31 = vpop.f32.mrb[38].mxu0 }
0x1a6d   :  { %v3710_v61 = vadd.f32 %v3709_v59, %v3432_v56  ;;  %v3755_v37 = vadd.f32 %v3754_v31, %v3440_v57  ;;  %v3711_v1 = vpop.f32.mrb[39].mxu1  ;;  %v3756_v62 = vpop.f32.mrb[39].mxu0  ;;  %v12912_v31 = vld [vmem:[%s15824_s7 + $0x118] sm:$0xff]  }
0x1a6e   :  { %v3712_v63 = vadd.f32 %v3711_v1, %v3436_v25  ;;  %v3757_v21 = vadd.f32 %v3756_v62, %v3444_v58  ;;  %v12914_v62 = vld [vmem:[%s15824_s7 + $0x160] sm:$0xff]  }
0x1a6f   :  { %v4035_v19 = vmax.f32 %v3710_v61, 0.0  ;;  %v4037_v54 = vmax.f32 %v3755_v37, 0.0  ;;  %v12913_v61 = vld [vmem:[%s15824_s7 + $0x198] sm:$0xff]  }
0x1a70   :  { %v4036_v4 = vmax.f32 %v3712_v63, 0.0  ;;  %v4038_v7 = vmax.f32 %v3757_v21, 0.0  ;;  %v3715_v52 = vpop.f32.mrb[40].mxu1  ;;  %v3760_v8 = vpop.f32.mrb[40].mxu0  ;;  %v12915_v63 = vld [vmem:[%s15824_s7 + $0x1e0] sm:$0xff]  }
0x1a71   :  { %v3716_v22 = vadd.f32 %v3715_v52, %v3432_v56  ;;  %v3761_v23 = vadd.f32 %v3760_v8, %v3440_v57  ;;  %v3717_v27 = vpop.f32.mrb[41].mxu1  ;;  %v3762_v3 = vpop.f32.mrb[41].mxu0  ;;  %v12910_v57 = vld [vmem:[%s15824_s7 + $0x158] sm:$0xff]   ;;  %v12917_v52 = vld [vmem:[%s15824_s7 + $0x1a0] sm:$0xff]  }
0x1a72   :  { %v3718_v34 = vadd.f32 %v3717_v27, %v3436_v25  ;;  %v3763_v36 = vadd.f32 %v3762_v3, %v3444_v58  ;;  %5127 = vmatprep.mubr.f32.mxu1 %v4036_v4  ;;  %5170 = vmatprep.mubr.f32.mxu0 %v4038_v7  ;;  %v12911_v25 = vld [vmem:[%s15824_s7 + $0x1d8] sm:$0xff]   ;;  %v12916_v7 = vld [vmem:[%s15824_s7 + $0x120] sm:$0xff]   ;;  %v12921_v27 = vld [vmem:[%s15824_s7 + $0x1a8] sm:$0xff]   ;;  %v14303_v3 = vsub.s32 4, %v13435_v11 }
0x1a73   :  { %5128 = vmatmul.mubr.f32.vlgmr.msra.gmra.mrb[54].mxu1 %v4035_v19  ;;  %5171 = vmatmul.mubr.f32.vlgmr.msra.gmra.mrb[54].mxu0 %v4037_v54  ;;  %v4051_v18 = vmax.f32 %v3716_v22, 0.0  ;;  %v4053_v45 = vmax.f32 %v3761_v23, 0.0  ;;  %v12919_v19 = vld [vmem:[%s15824_s7 + $0x1e8] sm:$0xff]  }
0x1a74   :  { %v4052_v39 = vmax.f32 %v3718_v34, 0.0  ;;  %v4054_v42 = vmax.f32 %v3763_v36, 0.0  ;;  %11535 = vmatpush3.bf16.msra.mxu1 %v12900_v10  ;;  %11557 = vmatpush3.bf16.msra.mxu0 %v12901_v29  ;;  %v14214_v24 = vpop.f32.mrb[42].mxu1  ;;  %v14216_v40 = vpop.f32.mrb[42].mxu0  ;;  %v12918_v29 = vld [vmem:[%s15824_s7 + $0x168] sm:$0xff]   ;;  %v12922_v36 = vld [vmem:[%s15824_s7 + $0x170] sm:$0xff]  }
0x1a75   :  { %v3801_v46 = vpop.f32.mrb[43].mxu1  ;;  %v3846_v33 = vpop.f32.mrb[43].mxu0  ;;  %11536 = vmatprep.subr.bf16.mxu1 %v12902_v17  ;;  %11558 = vmatprep.subr.bf16.mxu0 %v12903_v30  ;;  %v12920_v23 = vld [vmem:[%s15824_s7 + $0x128] sm:$0xff]   ;;  %v14306_v17 = vsub.s32 6, %v13435_v11 }
0x1a76   :  { %v3802_v49 = vadd.f32 %v3801_v46, %v14202_v15  ;;  %v3847_v50 = vadd.f32 %v3846_v33, %v14212_v38  ;;  %5132 = vmatprep.mubr.f32.mxu1 %v4052_v39  ;;  %5175 = vmatprep.mubr.f32.mxu0 %v4054_v42  ;;  %v12923_v39 = vld [vmem:[%s15824_s7 + $0x1f0] sm:$0xff]  }
0x1a77   :  { %5133 = vmatmul.mubr.f32.gmra.mrb[56].mxu1 %v4051_v18  ;;  %5176 = vmatmul.mubr.f32.gmra.mrb[56].mxu0 %v4053_v45  ;;  %v3448_v18 = vrot.slane %v14175_v13, %v14303_v3  ;;  %v3456_v45 = vrot.slane %v14175_v13, %v14306_v17  ;;  %v12928_v13 = vld [vmem:[%s15824_s7 + $0x138] sm:$0xff]  }
0x1a78   :  { %v4040_v53 = vmax.f32 %v3802_v49, 0.0  ;;  %v4042_v0 = vmax.f32 %v3847_v50, 0.0  ;;  %11537 = vmatpush3.bf16.msra.mxu1 %v12904_v43  ;;  %11559 = vmatpush3.bf16.msra.mxu0 %v12905_v44  ;;  %v14232_v5 = vpop.f32.mrb[44].mxu1  ;;  %v14234_v28 = vpop.f32.mrb[44].mxu0  ;;  %v12924_v43 = vld [vmem:[%s15824_s7 + $0x130] sm:$0xff]   ;;  %v14345_v49 = vld [vmem:[%s15825_s8 + $0x8] sm:$0xff] }
0x1a79   :  { %v14242_v35 = vpop.f32.mrb[45].mxu1  ;;  %v14244_v56 = vpop.f32.mrb[45].mxu0  ;;  %11538 = vmatprep.subr.bf16.mxu1 %v12906_v47  ;;  %11560 = vmatprep.subr.bf16.mxu0 %v12907_v48  ;;  %v12925_v44 = vld [vmem:[%s15824_s7 + $0x1b0] sm:$0xff]   ;;  %v12926_v47 = vld [vmem:[%s15824_s7 + $0x178] sm:$0xff]  }
0x1a7a   :  { %5213 = vmatprep.mubr.f32.mxu1 %v4040_v53  ;;  %5256 = vmatprep.mubr.f32.mxu0 %v4042_v0  ;;  %v12927_v48 = vld [vmem:[%s15824_s7 + $0x1f8] sm:$0xff]   ;;  %v3800_v53 = vadd.f32 %v14214_v24, %v3448_v18  ;;  %v3845_v0 = vadd.f32 %v14216_v40, %v3456_v45  ;;  %v14367_v24 = vrot.slane %v14345_v49, %v13658_v32 }
0x1a7b   :  { %v12929_v50 = vld [vmem:[%s15824_s7 + $0x1b8] sm:$0xff]   ;;  %v14371_v40 = vrot.slane %v14345_v49, %v14178_v20 }
0x1a7c   :  { %11539 = vmatpush3.bf16.msra.mxu1 %v12908_v14  ;;  %11561 = vmatpush3.bf16.msra.mxu0 %v12909_v55  ;;  %v14252_v58 = vpop.f32.mrb[46].mxu1  ;;  %v14254_v59 = vpop.f32.mrb[46].mxu0  ;;  %v12930_v14 = vld [vmem:[%s15824_s7 + $0x240] sm:$0xff]  }
0x1a7d   :  { %v14262_v37 = vpop.f32.mrb[47].mxu1  ;;  %v14264_v1 = vpop.f32.mrb[47].mxu0  ;;  %11540 = vmatprep.subr.bf16.mxu1 %v12910_v57  ;;  %11562 = vmatprep.subr.bf16.mxu0 %v12911_v25  ;;  %v12931_v55 = vld [vmem:[%s15824_s7 + $0x2c0] sm:$0xff]   ;;  %v3808_v57 = vadd.f32 %v14242_v35, %v14202_v15  ;;  %v3853_v25 = vadd.f32 %v14244_v56, %v14212_v38 }
0x1a7e   :  { %v12932_v15 = vld [vmem:[%s15824_s7 + $0x200] sm:$0xff]  }
0x1a7f   :  { %v12933_v38 = vld [vmem:[%s15824_s7 + $0x280] sm:$0xff]   ;;  %v4056_v35 = vmax.f32 %v3808_v57, 0.0  ;;  %v4058_v56 = vmax.f32 %v3853_v25, 0.0  ;;  %v12952_v57 = vld [vmem:[%s15824_s7 + $0x228] sm:$0xff]  }
0x1a80   :  { %11541 = vmatpush3.bf16.msra.mxu1 %v12912_v31  ;;  %11563 = vmatpush3.bf16.msra.mxu0 %v12913_v61  ;;  %v14272_v21 = vpop.f32.mrb[48].mxu1  ;;  %v14274_v4 = vpop.f32.mrb[48].mxu0  ;;  %v4039_v31 = vmax.f32 %v3800_v53, 0.0  ;;  %v4041_v61 = vmax.f32 %v3845_v0, 0.0  ;;  %v12948_v53 = vld [vmem:[%s15824_s7 + $0x220] sm:$0xff]   ;;  %v12953_v25 = vld [vmem:[%s15824_s7 + $0x2a8] sm:$0xff]  }
0x1a81   :  { %v14282_v8 = vpop.f32.mrb[49].mxu1  ;;  %v14284_v10 = vpop.f32.mrb[49].mxu0  ;;  %11542 = vmatprep.subr.bf16.mxu1 %v12914_v62  ;;  %11564 = vmatprep.subr.bf16.mxu0 %v12915_v63  ;;  %v3806_v62 = vadd.f32 %v14232_v5, %v3448_v18  ;;  %v3851_v63 = vadd.f32 %v14234_v28, %v3456_v45  ;;  %v3937_v5 = vadd.f32 %v14264_v1, %v14371_v40  ;;  %v12934_v28 = vld [vmem:[%s15824_s7 + $0x248] sm:$0xff]   ;;  %v12942_v18 = vld [vmem:[%s15824_s7 + $0x258] sm:$0xff]   ;;  %v12949_v0 = vld [vmem:[%s15824_s7 + $0x2a0] sm:$0xff]  }
0x1a82   :  { %v12937_v1 = vld [vmem:[%s15824_s7 + $0x288] sm:$0xff]   ;;  %v12943_v45 = vld [vmem:[%s15824_s7 + $0x2d8] sm:$0xff]  }
0x1a84   :  { %11543 = vmatpush3.bf16.msra.mxu1 %v12916_v7  ;;  %11565 = vmatpush3.bf16.msra.mxu0 %v12917_v52  ;;  %v14292_v54 = vpop.f32.mrb[50].mxu1  ;;  %v14294_v22 = vpop.f32.mrb[50].mxu0  ;;  %v3892_v7 = vadd.f32 %v14262_v37, %v14367_v24  ;;  %v12935_v52 = vld [vmem:[%s15824_s7 + $0x2c8] sm:$0xff]  }
0x1a85   :  { %v14308_v30 = vpop.f32.mrb[51].mxu1  ;;  %v14310_v34 = vpop.f32.mrb[51].mxu0  ;;  %11544 = vmatprep.subr.bf16.mxu1 %v12918_v29  ;;  %11566 = vmatprep.subr.bf16.mxu0 %v12919_v19  ;;  %v4055_v29 = vmax.f32 %v3806_v62, 0.0  ;;  %v4057_v19 = vmax.f32 %v3851_v63, 0.0  ;;  %v12936_v37 = vld [vmem:[%s15824_s7 + $0x208] sm:$0xff]   ;;  %v12956_v62 = vld [vmem:[%s15824_s7 + $0x230] sm:$0xff]  }
0x1a86   :  { %v12957_v63 = vld [vmem:[%s15824_s7 + $0x2b0] sm:$0xff]  }
0x1a88   :  { %11545 = vmatpush3.bf16.msra.mxu1 %v12920_v23  ;;  %11567 = vmatpush3.bf16.msra.mxu0 %v12921_v27  ;;  %v14318_v42 = vpop.f32.mrb[52].mxu1  ;;  %v14320_v11 = vpop.f32.mrb[52].mxu0  ;;  %v4044_v23 = vmax.f32 %v3892_v7, 0.0  ;;  %v4046_v27 = vmax.f32 %v3937_v5, 0.0  ;;  %v12960_v7 = vld [vmem:[%s15824_s7 + $0x238] sm:$0xff]  }
0x1a89   :  { %v14332_v46 = vpop.f32.mrb[53].mxu1  ;;  %v14334_v33 = vpop.f32.mrb[53].mxu0  ;;  %11546 = vmatprep.subr.bf16.mxu1 %v12922_v36  ;;  %11568 = vmatprep.subr.bf16.mxu0 %v12923_v39  ;;  %v12938_v36 = vld [vmem:[%s15824_s7 + $0x250] sm:$0xff]   ;;  %v12961_v5 = vld [vmem:[%s15824_s7 + $0x2b8] sm:$0xff]  }
0x1a8a   :  { %v12939_v39 = vld [vmem:[%s15824_s7 + $0x2d0] sm:$0xff]  }
0x1a8c   :  { %11547 = vmatpush3.bf16.msra.mxu1 %v12924_v43  ;;  %11569 = vmatpush3.bf16.msra.mxu0 %v12925_v44  ;;  %v12940_v43 = vld [vmem:[%s15824_s7 + $0x210] sm:$0xff]  }
0x1a8d   :  { %11548 = vmatprep.subr.bf16.mxu1 %v12926_v47  ;;  %11570 = vmatprep.subr.bf16.mxu0 %v12927_v48  ;;  %v12941_v44 = vld [vmem:[%s15824_s7 + $0x290] sm:$0xff]   ;;  %v12944_v47 = vld [vmem:[%s15824_s7 + $0x218] sm:$0xff]  }
0x1a8e   :  { %v12945_v48 = vld [vmem:[%s15824_s7 + $0x298] sm:$0xff]  }
0x1a90   :  { %11549 = vmatpush3.bf16.msra.mxu1 %v12928_v13  ;;  %11571 = vmatpush3.bf16.msra.mxu0 %v12929_v50  ;;  %v12946_v13 = vld [vmem:[%s15824_s7 + $0x260] sm:$0xff]  }
0x1a91   :  { %11578 = vmatprep.subr.bf16.mxu1 %v12930_v14  ;;  %11600 = vmatprep.subr.bf16.mxu0 %v12931_v55  ;;  %v12947_v50 = vld [vmem:[%s15824_s7 + $0x2e0] sm:$0xff]   ;;  %v12950_v14 = vld [vmem:[%s15824_s7 + $0x268] sm:$0xff]  }
0x1a92   :  { %v12951_v55 = vld [vmem:[%s15824_s7 + $0x2e8] sm:$0xff]  }
0x1a93   :  { %5214 = vmatmul.mubr.f32.vlgmr.msra.gmra.mrb[58].mxu1 %v4039_v31  ;;  %5257 = vmatmul.mubr.f32.vlgmr.msra.gmra.mrb[58].mxu0 %v4041_v61  ;;  %v12954_v31 = vld [vmem:[%s15824_s7 + $0x270] sm:$0xff]  }
0x1a94   :  { %5218 = vmatprep.mubr.f32.mxu1 %v4056_v35  ;;  %5261 = vmatprep.mubr.f32.mxu0 %v4058_v56  ;;  %v12955_v61 = vld [vmem:[%s15824_s7 + $0x2f0] sm:$0xff]   ;;  %v12958_v35 = vld [vmem:[%s15824_s7 + $0x278] sm:$0xff]  }
0x1a95   :  { %11579 = vmatpush3.bf16.msra.mxu1 %v12932_v15  ;;  %11601 = vmatpush3.bf16.msra.mxu0 %v12933_v38  ;;  %v3464_v15 = vrot.slane %v14345_v49, %v13442_v12  ;;  %v3472_v38 = vrot.slane %v14345_v49, %v13683_v41  ;;  %v12959_v56 = vld [vmem:[%s15824_s7 + $0x2f8] sm:$0xff]  }
0x1a96   :  { %11580 = vmatprep.subr.bf16.mxu1 %v12934_v28  ;;  %11602 = vmatprep.subr.bf16.mxu0 %v12935_v52 }
0x1a97   :  { %5219 = vmatmul.mubr.f32.gmra.mrb[60].mxu1 %v4055_v29  ;;  %5262 = vmatmul.mubr.f32.gmra.mrb[60].mxu0 %v4057_v19  ;;  %v3890_v28 = vadd.f32 %v14252_v58, %v3464_v15  ;;  %v3935_v52 = vadd.f32 %v14254_v59, %v3472_v38  ;;  %v12962_v29 = vld [vmem:[%s15824_s7 + $0x340] sm:$0xff]   ;;  %v14487_v58 = vrot.slane %v14345_v49, %v14189_v60 }
0x1a98   :  { %5299 = vmatprep.mubr.f32.mxu1 %v4044_v23  ;;  %5342 = vmatprep.mubr.f32.mxu0 %v4046_v27  ;;  %v12963_v19 = vld [vmem:[%s15824_s7 + $0x3c0] sm:$0xff]   ;;  %v14491_v59 = vrot.slane %v14345_v49, %v14192_v2 }
0x1a99   :  { %11581 = vmatpush3.bf16.msra.mxu1 %v12936_v37  ;;  %11603 = vmatpush3.bf16.msra.mxu0 %v12937_v1  ;;  %v3898_v37 = vadd.f32 %v14282_v8, %v14367_v24  ;;  %v3943_v1 = vadd.f32 %v14284_v10, %v14371_v40  ;;  %v4043_v23 = vmax.f32 %v3890_v28, 0.0  ;;  %v4045_v27 = vmax.f32 %v3935_v52, 0.0  ;;  %v12964_v8 = vld [vmem:[%s15824_s7 + $0x300] sm:$0xff]   ;;  %v12988_v28 = vld [vmem:[%s15824_s7 + $0x330] sm:$0xff]  }
0x1a9a   :  { %11582 = vmatprep.subr.bf16.mxu1 %v12938_v36  ;;  %11604 = vmatprep.subr.bf16.mxu0 %v12939_v39  ;;  %v3896_v36 = vadd.f32 %v14272_v21, %v3464_v15  ;;  %v3941_v39 = vadd.f32 %v14274_v4, %v3472_v38  ;;  %v12965_v10 = vld [vmem:[%s15824_s7 + $0x380] sm:$0xff]   ;;  %v4027_v21 = vadd.f32 %v14310_v34, %v14491_v59  ;;  %v12966_v4 = vld [vmem:[%s15824_s7 + $0x348] sm:$0xff]   ;;  %v12989_v52 = vld [vmem:[%s15824_s7 + $0x3b0] sm:$0xff]  }
0x1a9b   :  { %v4060_v24 = vmax.f32 %v3898_v37, 0.0  ;;  %v4062_v40 = vmax.f32 %v3943_v1, 0.0  ;;  %v12969_v34 = vld [vmem:[%s15824_s7 + $0x388] sm:$0xff]   ;;  %v12990_v37 = vld [vmem:[%s15824_s7 + $0x378] sm:$0xff]  }
0x1a9c   :  { %v12982_v15 = vld [vmem:[%s15824_s7 + $0x368] sm:$0xff]   ;;  %v12991_v1 = vld [vmem:[%s15824_s7 + $0x3f8] sm:$0xff]  }
0x1a9d   :  { %11583 = vmatpush3.bf16.msra.mxu1 %v12940_v43  ;;  %11605 = vmatpush3.bf16.msra.mxu0 %v12941_v44  ;;  %v3982_v43 = vadd.f32 %v14308_v30, %v14487_v58  ;;  %v12967_v44 = vld [vmem:[%s15824_s7 + $0x3c8] sm:$0xff]  }
0x1a9e   :  { %11584 = vmatprep.subr.bf16.mxu1 %v12942_v18  ;;  %11606 = vmatprep.subr.bf16.mxu0 %v12943_v45  ;;  %v4059_v18 = vmax.f32 %v3896_v36, 0.0  ;;  %v4061_v45 = vmax.f32 %v3941_v39, 0.0  ;;  %v12968_v30 = vld [vmem:[%s15824_s7 + $0x308] sm:$0xff]   ;;  %v3988_v39 = vadd.f32 %v14332_v46, %v14487_v58 }
0x1a9f   :  { %v12983_v38 = vld [vmem:[%s15824_s7 + $0x3e8] sm:$0xff]  }
0x1aa1   :  { %11585 = vmatpush3.bf16.msra.mxu1 %v12944_v47  ;;  %11607 = vmatpush3.bf16.msra.mxu0 %v12945_v48  ;;  %v4048_v47 = vmax.f32 %v3982_v43, 0.0  ;;  %v4050_v48 = vmax.f32 %v4027_v21, 0.0 }
0x1aa2   :  { %11586 = vmatprep.subr.bf16.mxu1 %v12946_v13  ;;  %11608 = vmatprep.subr.bf16.mxu0 %v12947_v50  ;;  %v12970_v13 = vld [vmem:[%s15824_s7 + $0x350] sm:$0xff]  }
0x1aa3   :  { %v12971_v50 = vld [vmem:[%s15824_s7 + $0x3d0] sm:$0xff]  }
0x1aa5   :  { %11587 = vmatpush3.bf16.msra.mxu1 %v12948_v53  ;;  %11609 = vmatpush3.bf16.msra.mxu0 %v12949_v0  ;;  %v12972_v53 = vld [vmem:[%s15824_s7 + $0x310] sm:$0xff]  }
0x1aa6   :  { %11588 = vmatprep.subr.bf16.mxu1 %v12950_v14  ;;  %11610 = vmatprep.subr.bf16.mxu0 %v12951_v55  ;;  %v12973_v0 = vld [vmem:[%s15824_s7 + $0x390] sm:$0xff]   ;;  %v12974_v14 = vld [vmem:[%s15824_s7 + $0x358] sm:$0xff]  }
0x1aa7   :  { %v12975_v55 = vld [vmem:[%s15824_s7 + $0x3d8] sm:$0xff]  }
0x1aa9   :  { %11589 = vmatpush3.bf16.msra.mxu1 %v12952_v57  ;;  %11611 = vmatpush3.bf16.msra.mxu0 %v12953_v25  ;;  %v12976_v57 = vld [vmem:[%s15824_s7 + $0x318] sm:$0xff]  }
0x1aaa   :  { %11590 = vmatprep.subr.bf16.mxu1 %v12954_v31  ;;  %11612 = vmatprep.subr.bf16.mxu0 %v12955_v61  ;;  %v12977_v25 = vld [vmem:[%s15824_s7 + $0x398] sm:$0xff]   ;;  %v12978_v31 = vld [vmem:[%s15824_s7 + $0x360] sm:$0xff]  }
0x1aab   :  { %v12979_v61 = vld [vmem:[%s15824_s7 + $0x3e0] sm:$0xff]  }
0x1aad   :  { %11591 = vmatpush3.bf16.msra.mxu1 %v12956_v62  ;;  %11613 = vmatpush3.bf16.msra.mxu0 %v12957_v63  ;;  %v12980_v62 = vld [vmem:[%s15824_s7 + $0x320] sm:$0xff]  }
0x1aae   :  { %11592 = vmatprep.subr.bf16.mxu1 %v12958_v35  ;;  %11614 = vmatprep.subr.bf16.mxu0 %v12959_v56  ;;  %v12981_v63 = vld [vmem:[%s15824_s7 + $0x3a0] sm:$0xff]   ;;  %v12984_v35 = vld [vmem:[%s15824_s7 + $0x328] sm:$0xff]  }
0x1aaf   :  { %v12985_v56 = vld [vmem:[%s15824_s7 + $0x3a8] sm:$0xff]  }
0x1ab1   :  { %11593 = vmatpush3.bf16.msra.mxu1 %v12960_v7  ;;  %11615 = vmatpush3.bf16.msra.mxu0 %v12961_v5  ;;  %v12986_v7 = vld [vmem:[%s15824_s7 + $0x370] sm:$0xff]  }
0x1ab2   :  { %11622 = vmatprep.subr.bf16.mxu1 %v12962_v29  ;;  %11644 = vmatprep.subr.bf16.mxu0 %v12963_v19  ;;  %v12987_v5 = vld [vmem:[%s15824_s7 + $0x3f0] sm:$0xff]   ;;  %v3480_v29 = vrot.slane %v14345_v49, %v14303_v3  ;;  %v3488_v19 = vrot.slane %v14345_v49, %v14306_v17  ;;  %v12993_v49 = vld [vmem:[%s15824_s7 + $0x3b8] sm:$0xff]  }
0x1ab4   :  { %5300 = vmatmul.mubr.f32.vlgmr.msra.gmra.mrb[62].mxu1 %v4043_v23  ;;  %5343 = vmatmul.mubr.f32.vlgmr.msra.gmra.mrb[62].mxu0 %v4045_v27  ;;  %v12992_v23 = vld [vmem:[%s15824_s7 + $0x338] sm:$0xff]   ;;  %v3980_v27 = vadd.f32 %v14292_v54, %v3480_v29  ;;  %v4025_v36 = vadd.f32 %v14294_v22, %v3488_v19  ;;  %v4031_v43 = vadd.f32 %v14320_v11, %v3488_v19  ;;  %v4064_v54 = vmax.f32 %v3988_v39, 0.0 }
0x1ab5   :  { %5304 = vmatprep.mubr.f32.mxu1 %v4060_v24  ;;  %5347 = vmatprep.mubr.f32.mxu0 %v4062_v40  ;;  %v3986_v40 = vadd.f32 %v14318_v42, %v3480_v29  ;;  %v13278_v42 = vld [vmem:[%s15822_s5] sm:$0xff]  ;;  %s15857_s5 = smov 104  }
0x1ab6   :  { %11623 = vmatpush3.bf16.msra.mxu1 %v12964_v8  ;;  %11645 = vmatpush3.bf16.msra.mxu0 %v12965_v10  ;;  %v4033_v8 = vadd.f32 %v14334_v33, %v14491_v59  ;;  %v4047_v10 = vmax.f32 %v3980_v27, 0.0  ;;  %v4049_v24 = vmax.f32 %v4025_v36, 0.0  ;;  %v4065_v58 = vmax.f32 %v4031_v43, 0.0 }
0x1ab7   :  { %11624 = vmatprep.subr.bf16.mxu1 %v12966_v4  ;;  %11646 = vmatprep.subr.bf16.mxu0 %v12967_v44  ;;  %v4063_v46 = vmax.f32 %v3986_v40, 0.0  ;;  %v14608_v11 = vrot.slane %v13278_v42, %v14178_v20 }
0x1ab8   :  { %5305 = vmatmul.mubr.f32.gmra.mrb[64].mxu1 %v4059_v18  ;;  %5348 = vmatmul.mubr.f32.gmra.mrb[64].mxu0 %v4061_v45  ;;  %v4066_v22 = vmax.f32 %v4033_v8, 0.0 }
0x1ab9   :  { %5385 = vmatprep.mubr.f32.mxu1 %v4048_v47  ;;  %5428 = vmatprep.mubr.f32.mxu0 %v4050_v48 }
0x1aba   :  { %11625 = vmatpush3.bf16.msra.mxu1 %v12968_v30  ;;  %11647 = vmatpush3.bf16.msra.mxu0 %v12969_v34 }
0x1abb   :  { %11626 = vmatprep.subr.bf16.mxu1 %v12970_v13  ;;  %11648 = vmatprep.subr.bf16.mxu0 %v12971_v50 }
0x1abe   :  { %11627 = vmatpush3.bf16.msra.mxu1 %v12972_v53  ;;  %11649 = vmatpush3.bf16.msra.mxu0 %v12973_v0 }
0x1abf   :  { %11628 = vmatprep.subr.bf16.mxu1 %v12974_v14  ;;  %11650 = vmatprep.subr.bf16.mxu0 %v12975_v55 }
0x1ac2   :  { %11629 = vmatpush3.bf16.msra.mxu1 %v12976_v57  ;;  %11651 = vmatpush3.bf16.msra.mxu0 %v12977_v25 }
0x1ac3   :  { %11630 = vmatprep.subr.bf16.mxu1 %v12978_v31  ;;  %11652 = vmatprep.subr.bf16.mxu0 %v12979_v61 }
0x1ac6   :  { %11631 = vmatpush3.bf16.msra.mxu1 %v12980_v62  ;;  %11653 = vmatpush3.bf16.msra.mxu0 %v12981_v63 }
0x1ac7   :  { %11632 = vmatprep.subr.bf16.mxu1 %v12982_v15  ;;  %11654 = vmatprep.subr.bf16.mxu0 %v12983_v38 }
0x1aca   :  { %11633 = vmatpush3.bf16.msra.mxu1 %v12984_v35  ;;  %11655 = vmatpush3.bf16.msra.mxu0 %v12985_v56 }
0x1acb   :  { %11634 = vmatprep.subr.bf16.mxu1 %v12986_v7  ;;  %11656 = vmatprep.subr.bf16.mxu0 %v12987_v5 }
0x1ace   :  { %11635 = vmatpush3.bf16.msra.mxu1 %v12988_v28  ;;  %11657 = vmatpush3.bf16.msra.mxu0 %v12989_v52 }
0x1acf   :  { %11636 = vmatprep.subr.bf16.mxu1 %v12990_v37  ;;  %11658 = vmatprep.subr.bf16.mxu0 %v12991_v1 }
0x1ad2   :  { %11637 = vmatpush3.bf16.msra.mxu1 %v12992_v23  ;;  %11659 = vmatpush3.bf16.msra.mxu0 %v12993_v49 }
0x1ad3   :  { %12220 = vmatprep.subr.mxu0 %v13310_v9 }
0x1ad5   :  { %5386 = vmatmul.mubr.f32.vlgmr.msra.gmra.mrb[66].mxu1 %v4047_v10  ;;  %5429 = vmatmul.mubr.f32.vlgmr.msra.gmra.mrb[66].mxu0 %v4049_v24 }
0x1ad6   :  { %5390 = vmatprep.mubr.f32.mxu1 %v4064_v54  ;;  %5433 = vmatprep.mubr.f32.mxu0 %v4066_v22 }
0x1ad9   :  { %5391 = vmatmul.mubr.f32.gmra.mrb[68].mxu1 %v4063_v46  ;;  %5434 = vmatmul.mubr.f32.gmra.mrb[68].mxu0 %v4065_v58 }
0x1ada   :  { %12222 = vmatprep.mubr.msk.f32.mxu0 %vm13311_vm1, %v13310_v9 }
0x1b46   :  { %v11506_v33 = vpop.f32.mrb[54].mxu1  ;;  %v11528_v59 = vpop.f32.mrb[54].mxu0 }
0x1b47   :  { %v11507_v21 = vpop.f32.mrb[55].mxu1  ;;  %v11529_v4 = vpop.f32.mrb[55].mxu0 }
0x1b48   :  { %v11508_v44 = vadd.f32 %v11507_v21, %v11506_v33  ;;  %v11530_v18 = vadd.f32 %v11529_v4, %v11528_v59 }
0x1b4a   :  { %v5130_v45 = vadd.f32 %v11508_v44, %v14608_v11  ;;  %v11509_v30 = vpop.f32.mrb[56].mxu1  ;;  %v11531_v34 = vpop.f32.mrb[56].mxu0 }
0x1b4b   :  { %v11510_v47 = vpop.f32.mrb[57].mxu1  ;;  %v11532_v48 = vpop.f32.mrb[57].mxu0 }
0x1b4c   :  { %v5173_v13 = vadd.f32 %v11530_v18, %v5130_v45  ;;  %v11511_v50 = vadd.f32 %v11510_v47, %v11509_v30  ;;  %v11533_v53 = vadd.f32 %v11532_v48, %v11531_v34 }
0x1b4e   :  { %v5135_v0 = vadd.f32 %v11511_v50, %v14608_v11 }
0x1b50   :  { %v5178_v14 = vadd.f32 %v11533_v53, %v5135_v0 }
0x1b66   :  { %v11550_v55 = vpop.f32.mrb[58].mxu1  ;;  %v11572_v57 = vpop.f32.mrb[58].mxu0 }
0x1b67   :  { %v11551_v25 = vpop.f32.mrb[59].mxu1  ;;  %v11573_v31 = vpop.f32.mrb[59].mxu0 }
0x1b68   :  { %v11552_v61 = vadd.f32 %v11551_v25, %v11550_v55  ;;  %v11574_v62 = vadd.f32 %v11573_v31, %v11572_v57 }
0x1b6a   :  { %v5216_v63 = vadd.f32 %v11552_v61, %v5173_v13  ;;  %v11553_v15 = vpop.f32.mrb[60].mxu1  ;;  %v11575_v38 = vpop.f32.mrb[60].mxu0 }
0x1b6b   :  { %v11554_v35 = vpop.f32.mrb[61].mxu1  ;;  %v11576_v56 = vpop.f32.mrb[61].mxu0 }
0x1b6c   :  { %v5259_v7 = vadd.f32 %v11574_v62, %v5216_v63  ;;  %v11555_v5 = vadd.f32 %v11554_v35, %v11553_v15  ;;  %v11577_v28 = vadd.f32 %v11576_v56, %v11575_v38 }
0x1b6e   :  { %v5221_v52 = vadd.f32 %v11555_v5, %v5178_v14 }
0x1b70   :  { %v5264_v29 = vadd.f32 %v11577_v28, %v5221_v52  ;;  %v14637_v28 = vld [vmem:[%s15826_s9 + $0x10] sm:$0xff] }
0x1b87   :  { %v11594_v19 = vpop.f32.mrb[62].mxu1  ;;  %v11616_v37 = vpop.f32.mrb[62].mxu0 }
0x1b88   :  { %v11595_v1 = vpop.f32.mrb[63].mxu1  ;;  %v11617_v23 = vpop.f32.mrb[63].mxu0 }
0x1b89   :  { %v11596_v49 = vadd.f32 %v11595_v1, %v11594_v19  ;;  %v11618_v27 = vadd.f32 %v11617_v23, %v11616_v37 }
0x1b8b   :  { %v5302_v36 = vadd.f32 %v11596_v49, %v5259_v7  ;;  %v11597_v39 = vpop.f32.mrb[64].mxu1  ;;  %v11619_v8 = vpop.f32.mrb[64].mxu0  ;;  %v14630_v7 = vld [vmem:[%s15826_s9 + $0x8] sm:$0xff] }
0x1b8c   :  { %v11598_v10 = vpop.f32.mrb[65].mxu1  ;;  %v11620_v24 = vpop.f32.mrb[65].mxu0 }
0x1b8d   :  { %v5345_v40 = vadd.f32 %v11618_v27, %v5302_v36  ;;  %v11599_v43 = vadd.f32 %v11598_v10, %v11597_v39  ;;  %v11621_v54 = vadd.f32 %v11620_v24, %v11619_v8 }
0x1b8f   :  { %v5307_v22 = vadd.f32 %v11599_v43, %v5264_v29 }
0x1b91   :  { %v5350_v46 = vadd.f32 %v11621_v54, %v5307_v22 }
0x1ba8   :  { %v11638_v58 = vpop.f32.mrb[66].mxu1  ;;  %v11660_v33 = vpop.f32.mrb[66].mxu0 }
0x1ba9   :  { %v11639_v59 = vpop.f32.mrb[67].mxu1  ;;  %v11661_v42 = vpop.f32.mrb[67].mxu0 }
0x1baa   :  { %v11640_v21 = vadd.f32 %v11639_v59, %v11638_v58  ;;  %v11662_v4 = vadd.f32 %v11661_v42, %v11660_v33  ;;  %v14664_v33 = vld [vmem:[%s15827_s10] sm:$0xff] }
0x1bab   :  { %v14668_v59 = vrot.slane %v14664_v33, %v13442_v12 }
0x1bac   :  { %v5388_v44 = vadd.f32 %v11640_v21, %v5345_v40  ;;  %v11641_v18 = vpop.f32.mrb[68].mxu1  ;;  %v11663_v45 = vpop.f32.mrb[68].mxu0 }
0x1bad   :  { %v11642_v30 = vpop.f32.mrb[69].mxu1  ;;  %v11664_v34 = vpop.f32.mrb[69].mxu0 }
0x1bae   :  { %v5431_v47 = vadd.f32 %v11662_v4, %v5388_v44  ;;  %v11643_v48 = vadd.f32 %v11642_v30, %v11641_v18  ;;  %v11665_v13 = vadd.f32 %v11664_v34, %v11663_v45  ;;  %v14695_v34 = vld [vmem:[%s15819_s2] ss:$0 sm:$0xff]  ;;  %s15855_s2 = smov 56  }
0x1bb0   :  { %v5393_v50 = vadd.f32 %v11643_v48, %v5350_v46  ;;  %v5439_v53 = vadd.f32 %v5431_v47, %v13972_v26 }
0x1bb2   :  { %v5436_v0 = vadd.f32 %v11665_v13, %v5393_v50  ;;  %v5441_v14 = vsel %vm70_vm0, %v5439_v53, 0.0 }
0x1bb3   :  { %5442 = vadd.xlane.f32.xlu1 %v5441_v14 }
0x1bb4   :  { %v5440_v55 = vadd.f32 %v5436_v0, %v13990_v51  ;;  %v14625_v51 = vld [vmem:[%s15826_s9] sm:$0xff] }
0x1bb5   :  { %v12550_v5 = vpack.c.bf16 %v14630_v7, %v14625_v51  ;;  %v12766_v29 = vpack.i.bf16 %v14630_v7, %v14625_v51 }
0x1bb6   :  { %v5444_v57 = vsel %vm70_vm0, %v5440_v55, 0.0 }
0x1bb7   :  { %5445 = vadd.xlane.f32.xlu0 %v5444_v57  ;;  %12551 = vmatprep.subr.bf16.mxu1 %v12550_v5 }
0x1bb8   :  { %12553 = vmatpush3.bf16.msra.mxu1 %v12550_v5 }
0x1c40   :  { %v5443_v25 = vpop.xlane.xlu1 %5442 }
0x1c41   :  { %v5447_v31 = vmul.f32 0.03125, %v5443_v25 }
0x1c43   :  { %v5449_v61 = vsub.f32 %v5439_v53, %v5447_v31 }
0x1c44   :  { %v5446_v62 = vpop.xlane.xlu0 %5445 }
0x1c45   :  { %v5448_v63 = vmul.f32 0.03125, %v5446_v62  ;;  %v5451_v15 = vmul.f32 %v5449_v61, %v5449_v61 }
0x1c47   :  { %v5450_v38 = vsub.f32 %v5440_v55, %v5448_v63  ;;  %v5453_v35 = vsel %vm70_vm0, %v5451_v15, 0.0 }
0x1c48   :  { %5454 = vadd.xlane.f32.xlu1 %v5453_v35 }
0x1c49   :  { %v5452_v26 = vmul.f32 %v5450_v38, %v5450_v38 }
0x1c4b   :  { %v5456_v56 = vsel %vm70_vm0, %v5452_v26, 0.0 }
0x1c4c   :  { %5457 = vadd.xlane.f32.xlu0 %v5456_v56 }
0x1c59   :  { %5468 = vrot.lane.b32.xlu1 %v14608_v11, %s13312_s27 }
0x1c62   :  { %5473 = vrot.lane.b32.xlu0 %v14608_v11, %s15854_s17  ;;  %v14642_v11 = vld [vmem:[%s15826_s9 + $0x18] sm:$0xff] }
0x1c63   :  { %v12554_v52 = vpack.c.bf16 %v14642_v11, %v14637_v28  ;;  %v12771_v19 = vpack.i.bf16 %v14642_v11, %v14637_v28 }
0x1c65   :  { %12555 = vmatprep.subr.bf16.mxu1 %v12554_v52 }
0x1c66   :  { %12557 = vmatpush3.bf16.msra.mxu1 %v12554_v52 }
0x1c67   :  { %12215 = vmatprep.subr.mxu1 %v13310_v9 }
0x1cd5   :  { %v5455_v37 = vpop.xlane.xlu1 %5454 }
0x1cd6   :  { %v5459_v1 = vmul.f32 0.03125, %v5455_v37 }
0x1cd8   :  { %v5461_v23 = vadd.f32 1e-05, %v5459_v1 }
0x1cd9   :  { %v5458_v49 = vpop.xlane.xlu0 %5457  ;;  %v5469_v8 = vpop.permute.xlu1 %5468 }
0x1cda   :  { %13194 = vrsqrt.f32 %v5461_v23  ;;  %v5460_v27 = vmul.f32 0.03125, %v5458_v49 }
0x1cdc   :  { %v5462_v36 = vadd.f32 1e-05, %v5460_v27 }
0x1cdd   :  { %v5474_v24 = vpop.permute.xlu0 %5473 }
0x1cde   :  { %13196 = vrsqrt.f32 %v5462_v36 }
0x1ce4   :  { %v13195_v39 = vpop.eup %13194 }
0x1ce5   :  { %v5465_v10 = vmul.f32 %v13195_v39, %v5449_v61 }
0x1ce7   :  { %v5471_v40 = vmul.f32 %v5469_v8, %v5465_v10 }
0x1ce8   :  { %v13197_v43 = vpop.eup %13196 }
0x1ce9   :  { %v5466_v54 = vmul.f32 %v13197_v43, %v5450_v38  ;;  %v14651_v22 = vadd.f32 %v5474_v24, %v5471_v40 }
0x1ceb   :  { %v5472_v46 = vmul.f32 %v5469_v8, %v5466_v54  ;;  %12212 = vmatprep.mubr.msk.f32.mxu1 %vm70_vm0, %v14651_v22 }
0x1ced   :  { %v14655_v58 = vadd.f32 %v5474_v24, %v5472_v46 }
0x1cef   :  { %12213 = vmatmul.mubr.msk.f32.vlgmr.msra.gmra.mrb[70].mxu1 %vm70_vm0, %v14655_v58 }
0x1cf0   :  { %12217 = vmatprep.mubr.msk.f32.mxu1 %vm13311_vm1, %v13310_v9 }
0x1dc2   :  { %v12214_v42 = vpop.f32.mrb[70].mxu1 }
0x1dc3   :  { %v5563_v21 = vpop.f32.mrb[71].mxu1  ;;  %v14676_v44 = vadd.f32 %v12214_v42, %v14668_v59 }
0x1dc4   :  { %v14671_v4 = vadd.f32 %v5563_v21, %v14668_v59 }
0x1dc6   :  { %5573 = vrot.lane.b32.xlu1 %v14671_v4, %s13312_s27 }
0x1dca   :  { %5650 = vrot.lane.b32.xlu1 %v14676_v44, %s13312_s27 }
0x1e38   :  { %v5574_v18 = vpop.permute.xlu1 %5573 }
0x1e39   :  { %12216 = vmatpush3.xpose.msk.msra.mxu1 %vm161_vm2, %v5574_v18 }
0x1e3a   :  { %12225 = vmatprep.subr.mxu1 %v13310_v9 }
0x1e3c   :  { %12218 = vmatmul.mubr.msk.f32.vlgmr.msra.gmra.mrb[72].mxu1 %vm161_vm2, %v14671_v4  ;;  %v5651_v45 = vpop.permute.xlu1 %5650 }
0x1e3d   :  { %12221 = vmatpush3.xpose.msk.msra.mxu0 %vm161_vm2, %v5651_v45  ;;  %12227 = vmatprep.mubr.msk.f32.mxu1 %vm13311_vm1, %v13310_v9 }
0x1e3e   :  { %12230 = vmatprep.subr.mxu0 %v13310_v9 }
0x1e40   :  { %12223 = vmatmul.mubr.msk.f32.vlgmr.msra.gmra.mrb[70].mxu0 %vm161_vm2, %v14676_v44 }
0x1e41   :  { %12232 = vmatprep.mubr.msk.f32.mxu0 %vm13311_vm1, %v13310_v9 }
0x1f0f   :  { %v5645_v30 = vpop.f32.mrb[72].mxu1 }
0x1f10   :  { %v5646_v47 = vadd.f32 %v14695_v34, %v5645_v30  ;;  %v12219_v48 = vpop.f32.mrb[73].mxu1 }
0x1f12   :  { %v5726_v13 = vsel %vm161_vm2, %v5646_v47, -inf }
0x1f13   :  { %5727 = vmax.xlane.f32.xlu0 %v5726_v13  ;;  %v5722_v50 = vpop.f32.mrb[70].mxu0 }
0x1f14   :  { %v5723_v53 = vadd.f32 %v14695_v34, %v5722_v50  ;;  %v12224_v0 = vpop.f32.mrb[71].mxu0 }
0x1f16   :  { %v5729_v14 = vsel %vm161_vm2, %v5723_v53, -inf }
0x1f17   :  { %5730 = vmax.xlane.f32.xlu1 %v5729_v14 }
0x1f28   :  { %5748 = vrot.lane.b32.xlu1 %v14671_v4, %s15854_s17 }
0x1f29   :  { %5824 = vrot.lane.b32.xlu0 %v14676_v44, %s15854_s17 }
0x1f2c   :  { %5902 = vrot.lane.b32.xlu1 %v14671_v4, %s13314_s15 }
0x1f30   :  { %5980 = vrot.lane.b32.xlu1 %v14676_v44, %s13314_s15 }
0x1f34   :  { %5978 = vrot.lane.b32.xlu1 %v14676_v44, %s13315_s16 }
0x1fa0   :  { %v5728_v55 = vpop.xlane.xlu0 %5727 }
0x1fa1   :  { %v5732_v57 = vsub.f32 %v5646_v47, %v5728_v55 }
0x1fa3   :  { %v5734_v62 = vmul.f32 1.442695, %v5732_v57 }
0x1fa4   :  { %v5825_v25 = vpop.permute.xlu0 %5824  ;;  %v5731_v31 = vpop.xlane.xlu1 %5730 }
0x1fa5   :  { %v5733_v61 = vsub.f32 %v5723_v53, %v5731_v31  ;;  %12231 = vmatpush3.msra.mxu0 %v5825_v25 }
0x1fa6   :  { %12240 = vmatprep.subr.mxu0 %v13310_v9 }
0x1fa7   :  { %v5736_v63 = vmul.f32 1.442695, %v5733_v61 }
0x1fa8   :  { %v5749_v15 = vpop.permute.xlu1 %5748 }
0x1fa9   :  { %13198 = vpow2.f32 %v5736_v63  ;;  %12226 = vmatpush3.msra.mxu1 %v5749_v15 }
0x1faa   :  { %12235 = vmatprep.subr.mxu1 %v13310_v9  ;;  %13200 = vpow2.f32 %v5734_v62 }
0x1fac   :  { %v5903_v37 = vpop.permute.xlu1 %5902 }
0x1fb0   :  { %v5981_v23 = vpop.permute.xlu1 %5980 }
0x1fb3   :  { %v13199_v38 = vpop.eup %13198 }
0x1fb4   :  { %v5741_v35 = vsel %vm161_vm2, %v13199_v38, 0.0  ;;  %v13201_v26 = vpop.eup %13200  ;;  %v5979_v39 = vpop.permute.xlu1 %5978 }
0x1fb5   :  { %5742 = vadd.xlane.f32.xlu0 %v5741_v35  ;;  %v5738_v56 = vsel %vm161_vm2, %v13201_v26, 0.0 }
0x1fb9   :  { %5739 = vadd.xlane.f32.xlu0 %v5738_v56 }
0x1fcf   :  { %5900 = vrot.lane.b32.xlu0 %v14671_v4, %s13315_s16 }
0x2042   :  { %v5743_v5 = vpop.xlane.xlu0 %5742 }
0x2043   :  { %13202 = vrcp.f32 %v5743_v5 }
0x2046   :  { %v5740_v52 = vpop.xlane.xlu0 %5739 }
0x2047   :  { %13204 = vrcp.f32 %v5740_v52 }
0x204a   :  { %v5901_v8 = vpop.permute.xlu0 %5900 }
0x204d   :  { %v13203_v1 = vpop.eup %13202 }
0x204e   :  { %v5747_v49 = vmul.f32 %v13203_v1, %v13199_v38 }
0x2050   :  { %12233 = vmatmul.mubr.msk.f32.vlgmr.msra.gmra.mrb[72].mxu0 %vm161_vm2, %v5747_v49 }
0x2051   :  { %v13205_v27 = vpop.eup %13204  ;;  %12241 = vmatpush3.xpose.msk.msra.mxu0 %vm161_vm2, %v5981_v23  ;;  %12242 = vmatprep.mubr.msk.f32.mxu0 %vm13311_vm1, %v13310_v9 }
0x2052   :  { %v5745_v36 = vmul.f32 %v13205_v27, %v13201_v26  ;;  %12250 = vmatprep.subr.mxu0 %v13310_v9 }
0x2054   :  { %12228 = vmatmul.mubr.msk.f32.vlgmr.msra.gmra.mrb[74].mxu1 %vm161_vm2, %v5745_v36  ;;  %12243 = vmatmul.mubr.msk.f32.vlgmr.msra.gmra.mrb[74].mxu0 %vm161_vm2, %v5979_v39 }
0x2055   :  { %12236 = vmatpush3.xpose.msk.msra.mxu1 %vm161_vm2, %v5903_v37  ;;  %12237 = vmatprep.mubr.msk.f32.mxu1 %vm13311_vm1, %v13310_v9 }
0x2056   :  { %12245 = vmatprep.subr.mxu1 %v13310_v9  ;;  %12252 = vmatprep.mubr.msk.f32.mxu0 %vm13311_vm1, %v13310_v9 }
0x2058   :  { %12238 = vmatmul.mubr.msk.f32.vlgmr.msra.gmra.mrb[76].mxu1 %vm161_vm2, %v5901_v8 }
0x2059   :  { %12247 = vmatprep.mubr.msk.f32.mxu1 %vm13311_vm1, %v13310_v9 }
0x2123   :  { %v14733_v10 = vpop.f32.mrb[72].mxu0 }
0x2124   :  { %v12234_v24 = vpop.f32.mrb[73].mxu0 }
0x2127   :  { %v14735_v40 = vpop.f32.mrb[74].mxu1  ;;  %v6052_v43 = vpop.f32.mrb[74].mxu0 }
0x2128   :  { %v6053_v54 = vadd.f32 %v14695_v34, %v6052_v43  ;;  %v12229_v46 = vpop.f32.mrb[75].mxu1  ;;  %v12244_v42 = vpop.f32.mrb[75].mxu0 }
0x212a   :  { %v6059_v21 = vsel %vm161_vm2, %v6053_v54, -inf }
0x212b   :  { %v5974_v18 = vpop.f32.mrb[76].mxu1  ;;  %6060 = vmax.xlane.f32.xlu1 %v6059_v21 }
0x212c   :  { %v5975_v45 = vadd.f32 %v14695_v34, %v5974_v18  ;;  %v12239_v30 = vpop.f32.mrb[77].mxu1 }
0x212e   :  { %v6056_v47 = vsel %vm161_vm2, %v5975_v45, -inf }
0x212f   :  { %6057 = vmax.xlane.f32.xlu0 %v6056_v47 }
0x213c   :  { %6078 = vrot.lane.b32.xlu1 %v14671_v4, %s15855_s2 }
0x2140   :  { %6232 = vrot.lane.b32.xlu1 %v14671_v4, %s13317_s18 }
0x2144   :  { %6310 = vrot.lane.b32.xlu1 %v14676_v44, %s13317_s18 }
0x2145   :  { %6154 = vrot.lane.b32.xlu0 %v14676_v44, %s15855_s2 }
0x2148   :  { %6308 = vrot.lane.b32.xlu1 %v14676_v44, %s13318_s19 }
0x21b8   :  { %v6061_v48 = vpop.xlane.xlu1 %6060 }
0x21b9   :  { %v6063_v13 = vsub.f32 %v6053_v54, %v6061_v48 }
0x21bb   :  { %v6066_v50 = vmul.f32 1.442695, %v6063_v13 }
0x21bc   :  { %v6058_v53 = vpop.xlane.xlu0 %6057  ;;  %v6079_v0 = vpop.permute.xlu1 %6078 }
0x21bd   :  { %13206 = vpow2.f32 %v6066_v50  ;;  %v6062_v14 = vsub.f32 %v5975_v45, %v6058_v53  ;;  %12246 = vmatpush3.msra.mxu1 %v6079_v0 }
0x21be   :  { %12255 = vmatprep.subr.mxu1 %v13310_v9 }
0x21bf   :  { %v6064_v55 = vmul.f32 1.442695, %v6062_v14 }
0x21c0   :  { %v6155_v57 = vpop.permute.xlu0 %6154  ;;  %v6233_v38 = vpop.permute.xlu1 %6232 }
0x21c1   :  { %13208 = vpow2.f32 %v6064_v55  ;;  %12251 = vmatpush3.msra.mxu0 %v6155_v57 }
0x21c2   :  { %12260 = vmatprep.subr.mxu0 %v13310_v9 }
0x21c4   :  { %v6311_v26 = vpop.permute.xlu1 %6310 }
0x21c7   :  { %v13207_v25 = vpop.eup %13206 }
0x21c8   :  { %v6071_v31 = vsel %vm161_vm2, %v13207_v25, 0.0  ;;  %v6309_v37 = vpop.permute.xlu1 %6308 }
0x21c9   :  { %6072 = vadd.xlane.f32.xlu0 %v6071_v31 }
0x21cb   :  { %v13209_v61 = vpop.eup %13208 }
0x21cc   :  { %v6068_v62 = vsel %vm161_vm2, %v13209_v61, 0.0 }
0x21cd   :  { %6069 = vadd.xlane.f32.xlu0 %v6068_v62 }
0x21e3   :  { %6230 = vrot.lane.b32.xlu0 %v14671_v4, %s13318_s19 }
0x2256   :  { %v6073_v63 = vpop.xlane.xlu0 %6072 }
0x2257   :  { %13210 = vrcp.f32 %v6073_v63 }
0x225a   :  { %v6070_v15 = vpop.xlane.xlu0 %6069 }
0x225b   :  { %13212 = vrcp.f32 %v6070_v15 }
0x225e   :  { %v6231_v1 = vpop.permute.xlu0 %6230 }
0x2261   :  { %v13211_v35 = vpop.eup %13210 }
0x2262   :  { %v6077_v56 = vmul.f32 %v13211_v35, %v13207_v25 }
0x2264   :  { %12253 = vmatmul.mubr.msk.f32.vlgmr.msra.gmra.mrb[76].mxu0 %vm161_vm2, %v6077_v56 }
0x2265   :  { %v13213_v5 = vpop.eup %13212  ;;  %12261 = vmatpush3.xpose.msk.msra.mxu0 %vm161_vm2, %v6311_v26  ;;  %12262 = vmatprep.mubr.msk.f32.mxu0 %vm13311_vm1, %v13310_v9 }
0x2266   :  { %v6075_v52 = vmul.f32 %v13213_v5, %v13209_v61  ;;  %12270 = vmatprep.subr.mxu0 %v13310_v9 }
0x2268   :  { %12248 = vmatmul.mubr.msk.f32.vlgmr.msra.gmra.mrb[78].mxu1 %vm161_vm2, %v6075_v52  ;;  %12263 = vmatmul.mubr.msk.f32.vlgmr.msra.gmra.mrb[78].mxu0 %vm161_vm2, %v6309_v37 }
0x2269   :  { %12256 = vmatpush3.xpose.msk.msra.mxu1 %vm161_vm2, %v6233_v38  ;;  %12257 = vmatprep.mubr.msk.f32.mxu1 %vm13311_vm1, %v13310_v9 }
0x226a   :  { %12265 = vmatprep.subr.mxu1 %v13310_v9  ;;  %12272 = vmatprep.mubr.msk.f32.mxu0 %vm13311_vm1, %v13310_v9 }
0x226c   :  { %12258 = vmatmul.mubr.msk.f32.vlgmr.msra.gmra.mrb[80].mxu1 %vm161_vm2, %v6231_v1 }
0x226d   :  { %12267 = vmatprep.mubr.msk.f32.mxu1 %vm13311_vm1, %v13310_v9 }
0x2337   :  { %v14773_v23 = vpop.f32.mrb[76].mxu0 }
0x2338   :  { %v12254_v49 = vpop.f32.mrb[77].mxu0 }
0x233b   :  { %v14775_v27 = vpop.f32.mrb[78].mxu1  ;;  %v6382_v36 = vpop.f32.mrb[78].mxu0 }
0x233c   :  { %v6383_v39 = vadd.f32 %v14695_v34, %v6382_v36  ;;  %v12249_v8 = vpop.f32.mrb[79].mxu1  ;;  %v12264_v24 = vpop.f32.mrb[79].mxu0 }
0x233e   :  { %v6389_v43 = vsel %vm161_vm2, %v6383_v39, -inf }
0x233f   :  { %v6304_v54 = vpop.f32.mrb[80].mxu1  ;;  %6390 = vmax.xlane.f32.xlu1 %v6389_v43 }
0x2340   :  { %v6305_v46 = vadd.f32 %v14695_v34, %v6304_v54  ;;  %v12259_v42 = vpop.f32.mrb[81].mxu1 }
0x2342   :  { %v6386_v21 = vsel %vm161_vm2, %v6305_v46, -inf }
0x2343   :  { %6387 = vmax.xlane.f32.xlu0 %v6386_v21 }
0x2350   :  { %6408 = vrot.lane.b32.xlu1 %v14671_v4, %s15856_s24 }
0x2354   :  { %6562 = vrot.lane.b32.xlu1 %v14671_v4, %s13320_s21 }
0x2358   :  { %6640 = vrot.lane.b32.xlu1 %v14676_v44, %s13320_s21 }
0x2359   :  { %6484 = vrot.lane.b32.xlu0 %v14676_v44, %s15856_s24 }
0x235c   :  { %6638 = vrot.lane.b32.xlu1 %v14676_v44, %s15857_s5 }
0x23cc   :  { %v6391_v18 = vpop.xlane.xlu1 %6390 }
0x23cd   :  { %v6393_v45 = vsub.f32 %v6383_v39, %v6391_v18 }
0x23cf   :  { %v6396_v30 = vmul.f32 1.442695, %v6393_v45 }
0x23d0   :  { %v6388_v47 = vpop.xlane.xlu0 %6387  ;;  %v6409_v48 = vpop.permute.xlu1 %6408 }
0x23d1   :  { %13214 = vpow2.f32 %v6396_v30  ;;  %v6392_v13 = vsub.f32 %v6305_v46, %v6388_v47  ;;  %12266 = vmatpush3.msra.mxu1 %v6409_v48 }
0x23d2   :  { %12275 = vmatprep.subr.mxu1 %v13310_v9 }
0x23d3   :  { %v6394_v50 = vmul.f32 1.442695, %v6392_v13 }
0x23d4   :  { %v6485_v53 = vpop.permute.xlu0 %6484  ;;  %v6563_v61 = vpop.permute.xlu1 %6562 }
0x23d5   :  { %13216 = vpow2.f32 %v6394_v50  ;;  %12271 = vmatpush3.msra.mxu0 %v6485_v53 }
0x23d6   :  { %12280 = vmatprep.subr.mxu0 %v13310_v9 }
0x23d8   :  { %v6641_v63 = vpop.permute.xlu1 %6640 }
0x23db   :  { %v13215_v0 = vpop.eup %13214 }
0x23dc   :  { %v6401_v14 = vsel %vm161_vm2, %v13215_v0, 0.0  ;;  %v6639_v26 = vpop.permute.xlu1 %6638 }
0x23dd   :  { %6402 = vadd.xlane.f32.xlu0 %v6401_v14 }
0x23df   :  { %v13217_v55 = vpop.eup %13216 }
0x23e0   :  { %v6398_v57 = vsel %vm161_vm2, %v13217_v55, 0.0 }
0x23e1   :  { %6399 = vadd.xlane.f32.xlu0 %v6398_v57 }
0x23f7   :  { %6560 = vrot.lane.b32.xlu0 %v14671_v4, %s15857_s5 }
0x246a   :  { %v6403_v25 = vpop.xlane.xlu0 %6402 }
0x246b   :  { %13218 = vrcp.f32 %v6403_v25 }
0x246e   :  { %v6400_v31 = vpop.xlane.xlu0 %6399 }
0x246f   :  { %13220 = vrcp.f32 %v6400_v31 }
0x2472   :  { %v6561_v56 = vpop.permute.xlu0 %6560 }
0x2475   :  { %v13219_v62 = vpop.eup %13218 }
0x2476   :  { %v6407_v15 = vmul.f32 %v13219_v62, %v13215_v0 }
0x2478   :  { %12273 = vmatmul.mubr.msk.f32.vlgmr.msra.gmra.mrb[80].mxu0 %vm161_vm2, %v6407_v15 }
0x2479   :  { %v13221_v38 = vpop.eup %13220  ;;  %12281 = vmatpush3.xpose.msk.msra.mxu0 %vm161_vm2, %v6641_v63  ;;  %12282 = vmatprep.mubr.msk.f32.mxu0 %vm13311_vm1, %v13310_v9 }
0x247a   :  { %v6405_v35 = vmul.f32 %v13221_v38, %v13217_v55  ;;  %12290 = vmatprep.subr.mxu0 %v13310_v9 }
0x247c   :  { %12268 = vmatmul.mubr.msk.f32.vlgmr.msra.gmra.mrb[82].mxu1 %vm161_vm2, %v6405_v35  ;;  %12283 = vmatmul.mubr.msk.f32.vlgmr.msra.gmra.mrb[82].mxu0 %vm161_vm2, %v6639_v26 }
0x247d   :  { %12276 = vmatpush3.xpose.msk.msra.mxu1 %vm161_vm2, %v6563_v61  ;;  %12277 = vmatprep.mubr.msk.f32.mxu1 %vm13311_vm1, %v13310_v9 }
0x247e   :  { %12285 = vmatprep.subr.mxu1 %v13310_v9  ;;  %12292 = vmatprep.mubr.msk.f32.mxu0 %vm13311_vm1, %v13310_v9 }
0x2480   :  { %12278 = vmatmul.mubr.msk.f32.vlgmr.msra.gmra.mrb[84].mxu1 %vm161_vm2, %v6561_v56 }
0x2481   :  { %12287 = vmatprep.mubr.msk.f32.mxu1 %vm13311_vm1, %v13310_v9 }
0x254b   :  { %v6556_v5 = vpop.f32.mrb[80].mxu0 }
0x254c   :  { %v12274_v52 = vpop.f32.mrb[81].mxu0 }
0x254f   :  { %v6480_v37 = vpop.f32.mrb[82].mxu1  ;;  %v6712_v1 = vpop.f32.mrb[82].mxu0 }
0x2550   :  { %v6713_v49 = vadd.f32 %v14695_v34, %v6712_v1  ;;  %v12269_v36 = vpop.f32.mrb[83].mxu1  ;;  %v12284_v39 = vpop.f32.mrb[83].mxu0 }
0x2552   :  { %v6719_v8 = vsel %vm161_vm2, %v6713_v49, -inf }
0x2553   :  { %v6634_v24 = vpop.f32.mrb[84].mxu1  ;;  %6720 = vmax.xlane.f32.xlu1 %v6719_v8 }
0x2554   :  { %v6635_v43 = vadd.f32 %v14695_v34, %v6634_v24  ;;  %v12279_v54 = vpop.f32.mrb[85].mxu1 }
0x2556   :  { %v6716_v46 = vsel %vm161_vm2, %v6635_v43, -inf }
0x2557   :  { %6717 = vmax.xlane.f32.xlu0 %v6716_v46 }
0x2564   :  { %6738 = vrot.lane.b32.xlu1 %v14671_v4, %s15858_s25 }
0x2568   :  { %12767 = vrot.lane.b32.xlu1 %v12766_v29, %s15859_s23 }
0x256c   :  { %12772 = vrot.lane.b32.xlu1 %v12771_v19, %s15859_s23 }
0x2570   :  { %6894 = vrot.lane.b32.xlu1 %v14773_v23, %s15860_s26 }
0x2574   :  { %6902 = vrot.lane.b32.xlu1 %v6556_v5, %s15852_s0 }
0x25e0   :  { %v6721_v34 = vpop.xlane.xlu1 %6720 }
0x25e1   :  { %v6723_v42 = vsub.f32 %v6713_v49, %v6721_v34 }
0x25e3   :  { %v6726_v21 = vmul.f32 1.442695, %v6723_v42 }
0x25e4   :  { %v6718_v18 = vpop.xlane.xlu0 %6717  ;;  %v6739_v4 = vpop.permute.xlu1 %6738 }
0x25e5   :  { %13222 = vpow2.f32 %v6726_v21  ;;  %v6722_v45 = vsub.f32 %v6635_v43, %v6718_v18  ;;  %12286 = vmatpush3.msra.mxu1 %v6739_v4 }
0x25e7   :  { %v6724_v51 = vmul.f32 1.442695, %v6722_v45 }
0x25e8   :  { %v12768_v7 = vpop.permute.xlu1 %12767 }
0x25e9   :  { %13224 = vpow2.f32 %v6724_v51  ;;  %v12770_v29 = vunpack.i.h.bf16 %v12768_v7  ;;  %v12769_v30 = vunpack.i.l.bf16 %v12768_v7 }
0x25eb   :  { %v12558_v28 = vpack.c.bf16 %v12770_v29, %v12769_v30 }
0x25ec   :  { %v12773_v0 = vpop.permute.xlu1 %12772 }
0x25ed   :  { %12559 = vmatprep.subr.bf16.mxu1 %v12558_v28  ;;  %v12775_v14 = vunpack.i.h.bf16 %v12773_v0  ;;  %v12774_v55 = vunpack.i.l.bf16 %v12773_v0  ;;  %v14892_v0 = vrot.slane %v14664_v33, %v13683_v41 }
0x25ef   :  { %v13223_v11 = vpop.eup %13222 }
0x25f0   :  { %v6731_v19 = vsel %vm161_vm2, %v13223_v11, 0.0  ;;  %v6895_v15 = vpop.permute.xlu1 %6894 }
0x25f1   :  { %6732 = vadd.xlane.f32.xlu0 %v6731_v19  ;;  %v6915_v52 = vsel %vm161_vm2, %v14733_v10, %v6895_v15 }
0x25f3   :  { %v13225_v23 = vpop.eup %13224 }
0x25f4   :  { %v6728_v47 = vsel %vm161_vm2, %v13225_v23, 0.0  ;;  %v6903_v35 = vpop.permute.xlu1 %6902 }
0x25f5   :  { %6729 = vadd.xlane.f32.xlu0 %v6728_v47  ;;  %v6917_v49 = vsel %vm1503_vm4, %v6915_v52, %v6903_v35  ;;  %v5483_v47 = vld [vmem:[%s15826_s9 + $0x28] sm:$0xff] }
0x260b   :  { %6814 = vrot.lane.b32.xlu0 %v14676_v44, %s15858_s25  ;;  %v12562_v44 = vpack.c.bf16 %v12775_v14, %v12774_v55 }
0x260f   :  { %6892 = vrot.lane.b32.xlu0 %v14775_v27, %s15860_s26 }
0x2613   :  { %6900 = vrot.lane.b32.xlu0 %v6480_v37, %s15852_s0 }
0x267e   :  { %v6733_v48 = vpop.xlane.xlu0 %6732 }
0x267f   :  { %13226 = vrcp.f32 %v6733_v48  ;;  %v14881_v48 = vrot.slane %v14664_v33, %v13658_v32 }
0x2682   :  { %v6730_v13 = vpop.xlane.xlu0 %6729 }
0x2683   :  { %13228 = vrcp.f32 %v6730_v13 }
0x2686   :  { %v6815_v50 = vpop.permute.xlu0 %6814 }
0x2687   :  { %12291 = vmatpush3.msra.mxu0 %v6815_v50 }
0x2689   :  { %v13227_v53 = vpop.eup %13226 }
0x268a   :  { %v6737_v57 = vmul.f32 %v13227_v53, %v13223_v11  ;;  %v6893_v38 = vpop.permute.xlu0 %6892  ;;  %v5485_v11 = vld [vmem:[%s15826_s9 + $0x38] sm:$0xff] }
0x268b   :  { %v6914_v56 = vsel %vm161_vm2, %v14735_v40, %v6893_v38  ;;  %v13280_v40 = vld [vmem:[%s15818_s1] sm:$0xff] }
0x268c   :  { %12293 = vmatmul.mubr.msk.f32.vlgmr.msra.gmra.mrb[84].mxu0 %vm161_vm2, %v6737_v57 }
0x268d   :  { %v13229_v25 = vpop.eup %13228 }
0x268e   :  { %v6735_v31 = vmul.f32 %v13229_v25, %v13225_v23  ;;  %v6901_v26 = vpop.permute.xlu0 %6900  ;;  %v5482_v23 = vld [vmem:[%s15826_s9 + $0x20] sm:$0xff] }
0x268f   :  { %v6916_v37 = vsel %vm1503_vm4, %v6914_v56, %v6901_v26  ;;  %v14883_v13 = vpack.i.bf16 %v5483_v47, %v5482_v23  ;;  %v12566_v50 = vpack.c.bf16 %v5483_v47, %v5482_v23 }
0x2690   :  { %12288 = vmatmul.mubr.msk.f32.vlgmr.msra.gmra.mrb[86].mxu1 %vm161_vm2, %v6735_v31 }
0x2691   :  { %12561 = vmatpush3.bf16.msra.mxu1 %v12558_v28  ;;  %12567 = vmatprep.subr.bf16.mxu0 %v12566_v50 }
0x2692   :  { %12563 = vmatprep.subr.bf16.mxu1 %v12562_v44  ;;  %12569 = vmatpush3.bf16.msra.mxu0 %v12566_v50 }
0x2695   :  { %12565 = vmatpush3.bf16.msra.mxu1 %v12562_v44 }
0x275f   :  { %v6886_v27 = vpop.f32.mrb[84].mxu0 }
0x2760   :  { %6910 = vrot.lane.b32.xlu1 %v6886_v27, %s15853_s4  ;;  %v12294_v61 = vpop.f32.mrb[85].mxu0 }
0x2763   :  { %v6810_v62 = vpop.f32.mrb[86].mxu1 }
0x2764   :  { %6908 = vrot.lane.b32.xlu0 %v6810_v62, %s15853_s4  ;;  %v12289_v63 = vpop.f32.mrb[87].mxu1 }
0x2768   :  { %6937 = vrot.lane.b32.xlu0 %v14668_v59, %s15859_s23 }
0x27d2   :  { %v6911_v5 = vpop.permute.xlu1 %6910 }
0x27d3   :  { %v6919_v59 = vsel %vm1506_vm3, %v6917_v49, %v6911_v5 }
0x27d6   :  { %v6909_v1 = vpop.permute.xlu0 %6908 }
0x27d7   :  { %v6918_v36 = vsel %vm1506_vm3, %v6916_v37, %v6909_v1  ;;  %v13281_v37 = vld [vmem:[%s15818_s1 + $0x8] sm:$0xff] }
0x27d8   :  { %12303 = vmatprep.mubr.msk.f32.mxu1 %vm70_vm0, %v6918_v36 }
0x27d9   :  { %12304 = vmatmul.mubr.msk.f32.vlgmr.msra.gmra.mrb[88].mxu1 %vm70_vm0, %v6919_v59  ;;  %v13282_v59 = vld [vmem:[%s15818_s1 + $0x10] sm:$0xff] }
0x27da   :  { %12325 = vmatprep.mubr.msk.f32.mxu1 %vm70_vm0, %v13280_v40  ;;  %v6938_v10 = vpop.permute.xlu0 %6937 }
0x28ac   :  { %v12305_v39 = vpop.f32.mrb[88].mxu1 }
0x28ad   :  { %v7018_v8 = vadd.f32 %v12305_v39, %v6938_v10  ;;  %v7012_v24 = vpop.f32.mrb[89].mxu1  ;;  %v13283_v39 = vld [vmem:[%s15818_s1 + $0x18] sm:$0xff] }
0x28ae   :  { %v7013_v43 = vadd.f32 %v7012_v24, %v6938_v10 }
0x28af   :  { %v7022_v54 = vadd.f32 %v7018_v8, %v14655_v58 }
0x28b0   :  { %v7021_v46 = vadd.f32 %v7013_v43, %v14651_v22  ;;  %v5484_v22 = vld [vmem:[%s15826_s9 + $0x30] sm:$0xff] }
0x28b1   :  { %v7026_v34 = vsel %vm70_vm0, %v7022_v54, 0.0  ;;  %v14869_v19 = vpack.i.bf16 %v5485_v11, %v5484_v22  ;;  %v12570_v53 = vpack.c.bf16 %v5485_v11, %v5484_v22  ;;  %v14950_v11 = vld [vmem:[%s15820_s3] ss:$0 sm:$0xff] }
0x28b2   :  { %7027 = vadd.xlane.f32.xlu0 %v7026_v34  ;;  %v7023_v42 = vsel %vm70_vm0, %v7021_v46, 0.0 }
0x28b3   :  { %7024 = vadd.xlane.f32.xlu1 %v7023_v42  ;;  %12571 = vmatprep.subr.bf16.mxu0 %v12570_v53 }
0x28b4   :  { %12573 = vmatpush3.bf16.msra.mxu0 %v12570_v53 }
0x28b5   :  { %12582 = vmatprep.subr.bf16.mxu0 %v13327_v6 }
0x293f   :  { %v7028_v21 = vpop.xlane.xlu0 %7027 }
0x2940   :  { %v7030_v18 = vmul.f32 0.03125, %v7028_v21  ;;  %v7025_v4 = vpop.xlane.xlu1 %7024 }
0x2941   :  { %v7029_v45 = vmul.f32 0.03125, %v7025_v4 }
0x2942   :  { %v7032_v51 = vsub.f32 %v7022_v54, %v7030_v18 }
0x2943   :  { %v7031_v7 = vsub.f32 %v7021_v46, %v7029_v45 }
0x2944   :  { %v7034_v29 = vmul.f32 %v7032_v51, %v7032_v51 }
0x2945   :  { %v7033_v30 = vmul.f32 %v7031_v7, %v7031_v7 }
0x2946   :  { %v7038_v28 = vsel %vm70_vm0, %v7034_v29, 0.0 }
0x2947   :  { %7039 = vadd.xlane.f32.xlu1 %v7038_v28  ;;  %v7035_v58 = vsel %vm70_vm0, %v7033_v30, 0.0 }
0x2948   :  { %7036 = vadd.xlane.f32.xlu0 %v7035_v58 }
0x2958   :  { %12782 = vrot.lane.b32.xlu1 %v14869_v19, %s13312_s27 }
0x295c   :  { %7056 = vrot.lane.b32.xlu1 %v14881_v48, %s13312_s27 }
0x295e   :  { %12777 = vrot.lane.b32.xlu0 %v14883_v13, %s13312_s27 }
0x2962   :  { %7163 = vrot.lane.b32.xlu0 %v14892_v0, %s13312_s27 }
0x29d4   :  { %v7040_v14 = vpop.xlane.xlu1 %7039 }
0x29d5   :  { %v7042_v55 = vmul.f32 0.03125, %v7040_v14  ;;  %v7037_v57 = vpop.xlane.xlu0 %7036 }
0x29d6   :  { %v7041_v25 = vmul.f32 0.03125, %v7037_v57 }
0x29d7   :  { %v7044_v44 = vadd.f32 1e-05, %v7042_v55 }
0x29d8   :  { %v7043_v31 = vadd.f32 1e-05, %v7041_v25  ;;  %v12783_v27 = vpop.permute.xlu1 %12782 }
0x29d9   :  { %13230 = vrsqrt.f32 %v7044_v44  ;;  %v12778_v61 = vpop.permute.xlu0 %12777  ;;  %v12785_v62 = vunpack.i.h.bf16 %v12783_v27  ;;  %v12784_v63 = vunpack.i.l.bf16 %v12783_v27 }
0x29da   :  { %13232 = vrsqrt.f32 %v7043_v31  ;;  %v12780_v15 = vunpack.i.h.bf16 %v12778_v61  ;;  %v12779_v38 = vunpack.i.l.bf16 %v12778_v61 }
0x29db   :  { %v12578_v33 = vpack.c.bf16 %v12785_v62, %v12784_v63 }
0x29dc   :  { %v12574_v35 = vpack.c.bf16 %v12780_v15, %v12779_v38  ;;  %v7057_v49 = vpop.permute.xlu1 %7056 }
0x29dd   :  { %v7164_v8 = vpop.permute.xlu0 %7163 }
0x29de   :  { %12575 = vmatprep.subr.bf16.mxu1 %v12574_v35 }
0x29df   :  { %12577 = vmatpush3.bf16.msra.mxu1 %v12574_v35 }
0x29e0   :  { %12579 = vmatprep.subr.bf16.mxu1 %v12578_v33 }
0x29e3   :  { %v13231_v26 = vpop.eup %13230  ;;  %12581 = vmatpush3.bf16.msra.mxu1 %v12578_v33 }
0x29e4   :  { %v13233_v56 = vpop.eup %13232  ;;  %v7048_v5 = vmul.f32 %v13231_v26, %v7032_v51  ;;  %12586 = vmatprep.subr.bf16.mxu1 %v13327_v6 }
0x29e5   :  { %v7047_v52 = vmul.f32 %v13233_v56, %v7031_v7 }
0x29e6   :  { %12326 = vmatmul.mubr.msk.f32.vlgmr.msra.gmra.mrb[90].mxu1 %vm70_vm0, %v13281_v37  ;;  %v7054_v1 = vmul.f32 %v14881_v48, %v7048_v5 }
0x29e7   :  { %v7053_v36 = vmul.f32 %v14881_v48, %v7047_v52  ;;  %12328 = vmatprep.mubr.msk.f32.mxu1 %vm70_vm0, %v13282_v59 }
0x29e8   :  { %v14909_v10 = vadd.f32 %v7057_v49, %v7054_v1 }
0x29e9   :  { %v14907_v40 = vadd.f32 %v7057_v49, %v7053_v36 }
0x29ea   :  { %12329 = vmatmul.mubr.msk.f32.gmra.mrb[92].mxu1 %vm70_vm0, %v13283_v39 }
0x29eb   :  { %12314 = vmatprep.mubr.msk.f32.mxu0 %vm70_vm0, %v14907_v40  ;;  %12342 = vmatprep.mubr.msk.f32.mxu1 %vm13311_vm1, %v13310_v9 }
0x29ec   :  { %12315 = vmatmul.mubr.msk.f32.vlgmr.msra.gmra.mrb[86].mxu0 %vm70_vm0, %v14909_v10 }
0x29ed   :  { %12335 = vmatprep.mubr.msk.f32.mxu0 %vm13311_vm1, %v13310_v9 }
0x2ab9   :  { %v12327_v24 = vpop.f32.mrb[90].mxu1 }
0x2aba   :  { %v7238_v43 = vadd.f32 %v12327_v24, %v7164_v8  ;;  %v7232_v54 = vpop.f32.mrb[91].mxu1 }
0x2abb   :  { %v7233_v46 = vadd.f32 %v7232_v54, %v7164_v8 }
0x2abd   :  { %v12330_v34 = vpop.f32.mrb[92].mxu1  ;;  %v12583_v42 = vpack.c.bf16 %v7238_v43, %v7233_v46  ;;  %v14923_v21 = vpack.i.bf16 %v7238_v43, %v7233_v46 }
0x2abe   :  { %v7248_v18 = vadd.f32 %v12330_v34, %v7164_v8  ;;  %v7242_v4 = vpop.f32.mrb[93].mxu1 }
0x2abf   :  { %v7243_v45 = vadd.f32 %v7242_v4, %v7164_v8  ;;  %v12316_v51 = vpop.f32.mrb[86].mxu0  ;;  %12585 = vmatpush3.bf16.xpose.msk.msra.mxu0 %vm13721_vm5, %v12583_v42 }
0x2ac0   :  { %v7137_v7 = vpop.f32.mrb[87].mxu0  ;;  %12590 = vmatprep.subr.bf16.mxu0 %v13327_v6  ;;  %v14941_v58 = vadd.f32 %v12316_v51, %v14892_v0 }
0x2ac1   :  { %v12587_v29 = vpack.c.bf16 %v7248_v18, %v7243_v45  ;;  %v14928_v30 = vpack.i.bf16 %v7248_v18, %v7243_v45  ;;  %v14933_v28 = vadd.f32 %v7137_v7, %v14892_v0 }
0x2ac3   :  { %12589 = vmatpush3.bf16.xpose.msk.msra.mxu1 %vm13721_vm5, %v12587_v29 }
0x2ac4   :  { %12596 = vmatprep.subr.bf16.mxu1 %v13327_v6 }
0x2ac6   :  { %12336 = vmatmul.mubr.msk.f32.vlgmr.msra.gmra.mrb[88].mxu0 %vm161_vm2, %v14933_v28 }
0x2ac7   :  { %12349 = vmatprep.mubr.msk.f32.mxu0 %vm13311_vm1, %v13310_v9 }
0x2aca   :  { %12343 = vmatmul.mubr.msk.f32.vlgmr.msra.gmra.mrb[94].mxu1 %vm161_vm2, %v14941_v58 }
0x2acb   :  { %12363 = vmatprep.mubr.msk.f32.mxu1 %vm13311_vm1, %v13310_v9 }
0x2b99   :  { %v7326_v22 = vpop.f32.mrb[88].mxu0 }
0x2b9a   :  { %v7327_v23 = vadd.f32 %v14950_v11, %v7326_v22  ;;  %v12337_v47 = vpop.f32.mrb[89].mxu0 }
0x2b9c   :  { %v7409_v50 = vsel %vm1503_vm4, %v7327_v23, -inf }
0x2b9d   :  { %v7405_v53 = vpop.f32.mrb[94].mxu1  ;;  %7410 = vmax.xlane.f32.xlu1 %v7409_v50 }
0x2b9e   :  { %v7406_v14 = vadd.f32 %v14950_v11, %v7405_v53  ;;  %v12344_v55 = vpop.f32.mrb[95].mxu1 }
0x2ba0   :  { %v7412_v57 = vsel %vm1503_vm4, %v7406_v14, -inf }
0x2ba1   :  { %7413 = vmax.xlane.f32.xlu0 %v7412_v57 }
0x2c2a   :  { %v7411_v25 = vpop.xlane.xlu1 %7410 }
0x2c2b   :  { %v7415_v44 = vsub.f32 %v7327_v23, %v7411_v25 }
0x2c2d   :  { %v7417_v31 = vmul.f32 1.442695, %v7415_v44 }
0x2c2e   :  { %v7414_v27 = vpop.xlane.xlu0 %7413 }
0x2c2f   :  { %13234 = vpow2.f32 %v7417_v31  ;;  %v7416_v61 = vsub.f32 %v7406_v14, %v7414_v27 }
0x2c31   :  { %v7419_v62 = vmul.f32 1.442695, %v7416_v61 }
0x2c33   :  { %13236 = vpow2.f32 %v7419_v62 }
0x2c39   :  { %v13235_v63 = vpop.eup %13234 }
0x2c3a   :  { %v7421_v15 = vsel %vm1503_vm4, %v13235_v63, 0.0 }
0x2c3b   :  { %7422 = vadd.xlane.f32.xlu0 %v7421_v15 }
0x2c3d   :  { %v13237_v38 = vpop.eup %13236 }
0x2c3e   :  { %v7424_v35 = vsel %vm1503_vm4, %v13237_v38, 0.0 }
0x2c3f   :  { %7425 = vadd.xlane.f32.xlu1 %v7424_v35 }
0x2c50   :  { %12792 = vrot.lane.b32.xlu1 %v14928_v30, %s13312_s27 }
0x2c51   :  { %12787 = vrot.lane.b32.xlu0 %v14923_v21, %s13312_s27 }
0x2c54   :  { %12797 = vrot.lane.b32.xlu1 %v14923_v21, %s13315_s16 }
0x2c55   :  { %12802 = vrot.lane.b32.xlu0 %v14928_v30, %s13315_s16 }
0x2c58   :  { %7589 = vrot.lane.b32.xlu1 %v14933_v28, %s13315_s16 }
0x2c59   :  { %7671 = vrot.lane.b32.xlu0 %v14941_v58, %s13315_s16 }
0x2cc8   :  { %v7423_v33 = vpop.xlane.xlu0 %7422 }
0x2cc9   :  { %13238 = vrcp.f32 %v7423_v33 }
0x2ccc   :  { %v12788_v26 = vpop.permute.xlu0 %12787  ;;  %v7426_v56 = vpop.xlane.xlu1 %7425 }
0x2ccd   :  { %v12790_v5 = vunpack.i.h.bf16 %v12788_v26  ;;  %v12789_v52 = vunpack.i.l.bf16 %v12788_v26  ;;  %13240 = vrcp.f32 %v7426_v56 }
0x2ccf   :  { %v12591_v37 = vpack.c.bf16 %v12790_v5, %v12789_v52 }
0x2cd0   :  { %v12793_v1 = vpop.permute.xlu1 %12792  ;;  %v12803_v34 = vpop.permute.xlu0 %12802 }
0x2cd1   :  { %v12795_v49 = vunpack.i.h.bf16 %v12793_v1  ;;  %v12794_v36 = vunpack.i.l.bf16 %v12793_v1  ;;  %12592 = vmatpush3.bf16.msra.mxu0 %v12591_v37  ;;  %v12805_v4 = vunpack.i.h.bf16 %v12803_v34  ;;  %v12804_v45 = vunpack.i.l.bf16 %v12803_v34 }
0x2cd2   :  { %12593 = vmatprep.subr.bf16.mxu0 %v13327_v6 }
0x2cd3   :  { %v13239_v59 = vpop.eup %13238  ;;  %v12594_v39 = vpack.c.bf16 %v12795_v49, %v12794_v36  ;;  %v12601_v51 = vpack.c.bf16 %v12805_v4, %v12804_v45 }
0x2cd4   :  { %v7428_v8 = vmul.f32 %v13239_v59, %v13235_v63  ;;  %v12798_v24 = vpop.permute.xlu1 %12797  ;;  %v7672_v29 = vpop.permute.xlu0 %7671 }
0x2cd5   :  { %v12800_v43 = vunpack.i.h.bf16 %v12798_v24  ;;  %v12799_v54 = vunpack.i.l.bf16 %v12798_v24 }
0x2cd6   :  { %12350 = vmatmul.mubr.msk.f32.vlgmr.msra.gmra.mrb[90].mxu0 %vm1503_vm4, %v7428_v8 }
0x2cd7   :  { %v13241_v46 = vpop.eup %13240  ;;  %v12597_v42 = vpack.c.bf16 %v12800_v43, %v12799_v54  ;;  %12595 = vmatpush3.bf16.msra.mxu0 %v12594_v39  ;;  %12356 = vmatprep.mubr.msk.f32.mxu0 %vm13311_vm1, %v13310_v9 }
0x2cd8   :  { %v7430_v18 = vmul.f32 %v13241_v46, %v13237_v38  ;;  %12600 = vmatprep.subr.bf16.mxu0 %v13327_v6  ;;  %v7590_v7 = vpop.permute.xlu1 %7589 }
0x2cd9   :  { %12599 = vmatpush3.bf16.xpose.msk.msra.mxu1 %vm13721_vm5, %v12597_v42 }
0x2cda   :  { %12357 = vmatmul.mubr.msk.f32.vlgmr.msra.gmra.mrb[92].mxu0 %vm1503_vm4, %v7430_v18  ;;  %12604 = vmatprep.subr.bf16.mxu1 %v13327_v6 }
0x2cdb   :  { %12370 = vmatprep.mubr.msk.f32.mxu0 %vm13311_vm1, %v13310_v9 }
0x2ce0   :  { %12603 = vmatpush3.bf16.xpose.msk.msra.mxu0 %vm13721_vm5, %v12601_v51  ;;  %12364 = vmatmul.mubr.msk.f32.vlgmr.msra.gmra.mrb[96].mxu1 %vm161_vm2, %v7590_v7 }
0x2ce1   :  { %12607 = vmatprep.subr.bf16.mxu0 %v13327_v6  ;;  %12377 = vmatprep.mubr.msk.f32.mxu1 %vm13311_vm1, %v13310_v9 }
0x2ce7   :  { %12371 = vmatmul.mubr.msk.f32.vlgmr.msra.gmra.mrb[94].mxu0 %vm161_vm2, %v7672_v29 }
0x2ce8   :  { %12384 = vmatprep.mubr.msk.f32.mxu0 %vm13311_vm1, %v13310_v9 }
0x2da9   :  { %v14990_v22 = vpop.f32.mrb[90].mxu0 }
0x2daa   :  { %v12351_v23 = vpop.f32.mrb[91].mxu0 }
0x2dad   :  { %v14992_v47 = vpop.f32.mrb[92].mxu0 }
0x2dae   :  { %v12358_v50 = vpop.f32.mrb[93].mxu0 }
0x2db3   :  { %v7667_v53 = vpop.f32.mrb[96].mxu1 }
0x2db4   :  { %v7668_v14 = vadd.f32 %v14950_v11, %v7667_v53  ;;  %v12365_v55 = vpop.f32.mrb[97].mxu1 }
0x2db6   :  { %v7753_v57 = vsel %vm1503_vm4, %v7668_v14, -inf }
0x2db7   :  { %7754 = vmax.xlane.f32.xlu1 %v7753_v57 }
0x2dba   :  { %v7749_v25 = vpop.f32.mrb[94].mxu0 }
0x2dbb   :  { %v7750_v44 = vadd.f32 %v14950_v11, %v7749_v25  ;;  %v12372_v31 = vpop.f32.mrb[95].mxu0 }
0x2dbd   :  { %v7756_v27 = vsel %vm1503_vm4, %v7750_v44, -inf }
0x2dbe   :  { %7757 = vmax.xlane.f32.xlu0 %v7756_v27 }
0x2dc8   :  { %12812 = vrot.lane.b32.xlu1 %v14928_v30, %s13314_s15 }
0x2dcc   :  { %12817 = vrot.lane.b32.xlu1 %v14923_v21, %s13318_s19 }
0x2e44   :  { %v7755_v61 = vpop.xlane.xlu1 %7754 }
0x2e45   :  { %v7759_v62 = vsub.f32 %v7668_v14, %v7755_v61 }
0x2e47   :  { %v7761_v63 = vmul.f32 1.442695, %v7759_v62 }
0x2e48   :  { %v12813_v15 = vpop.permute.xlu1 %12812 }
0x2e49   :  { %13242 = vpow2.f32 %v7761_v63  ;;  %v12815_v38 = vunpack.i.h.bf16 %v12813_v15  ;;  %v12814_v35 = vunpack.i.l.bf16 %v12813_v15 }
0x2e4b   :  { %v12608_v33 = vpack.c.bf16 %v12815_v38, %v12814_v35  ;;  %v7758_v26 = vpop.xlane.xlu0 %7757 }
0x2e4c   :  { %v7760_v56 = vsub.f32 %v7750_v44, %v7758_v26  ;;  %v12818_v59 = vpop.permute.xlu1 %12817 }
0x2e4d   :  { %12609 = vmatpush3.bf16.msra.mxu0 %v12608_v33  ;;  %v12820_v34 = vunpack.i.h.bf16 %v12818_v59  ;;  %v12819_v42 = vunpack.i.l.bf16 %v12818_v59 }
0x2e4e   :  { %v7763_v5 = vmul.f32 1.442695, %v7760_v56  ;;  %12614 = vmatprep.subr.bf16.mxu0 %v13327_v6 }
0x2e4f   :  { %v12611_v45 = vpack.c.bf16 %v12820_v34, %v12819_v42 }
0x2e50   :  { %13244 = vpow2.f32 %v7763_v5 }
0x2e53   :  { %v13243_v52 = vpop.eup %13242 }
0x2e54   :  { %v7765_v37 = vsel %vm1503_vm4, %v13243_v52, 0.0 }
0x2e55   :  { %7766 = vadd.xlane.f32.xlu0 %v7765_v37 }
0x2e5a   :  { %v13245_v1 = vpop.eup %13244 }
0x2e5b   :  { %v7768_v49 = vsel %vm1503_vm4, %v13245_v1, 0.0 }
0x2e5c   :  { %7769 = vadd.xlane.f32.xlu1 %v7768_v49 }
0x2e6b   :  { %12807 = vrot.lane.b32.xlu0 %v14923_v21, %s13314_s15 }
0x2e6d   :  { %7933 = vrot.lane.b32.xlu1 %v14933_v28, %s13318_s19 }
0x2e6f   :  { %12822 = vrot.lane.b32.xlu0 %v14928_v30, %s13318_s19 }
0x2e73   :  { %8015 = vrot.lane.b32.xlu0 %v14941_v58, %s13318_s19 }
0x2ee2   :  { %v7767_v36 = vpop.xlane.xlu0 %7766 }
0x2ee3   :  { %13246 = vrcp.f32 %v7767_v36 }
0x2ee6   :  { %v12808_v39 = vpop.permute.xlu0 %12807 }
0x2ee7   :  { %v12810_v8 = vunpack.i.h.bf16 %v12808_v39  ;;  %v12809_v24 = vunpack.i.l.bf16 %v12808_v39 }
0x2ee9   :  { %v12605_v43 = vpack.c.bf16 %v12810_v8, %v12809_v24  ;;  %v7770_v54 = vpop.xlane.xlu1 %7769 }
0x2eea   :  { %13248 = vrcp.f32 %v7770_v54  ;;  %v12823_v4 = vpop.permute.xlu0 %12822 }
0x2eeb   :  { %12606 = vmatpush3.bf16.msra.mxu1 %v12605_v43  ;;  %v12825_v51 = vunpack.i.h.bf16 %v12823_v4  ;;  %v12824_v7 = vunpack.i.l.bf16 %v12823_v4 }
0x2eec   :  { %12610 = vmatprep.subr.bf16.mxu1 %v13327_v6 }
0x2eed   :  { %v13247_v46 = vpop.eup %13246  ;;  %v12615_v50 = vpack.c.bf16 %v12825_v51, %v12824_v7  ;;  %v7934_v53 = vpop.permute.xlu1 %7933 }
0x2eee   :  { %v7772_v18 = vmul.f32 %v13247_v46, %v13243_v52  ;;  %v8016_v14 = vpop.permute.xlu0 %8015 }
0x2ef0   :  { %12378 = vmatmul.mubr.msk.f32.vlgmr.msra.gmra.mrb[98].mxu1 %vm1503_vm4, %v7772_v18 }
0x2ef1   :  { %12391 = vmatprep.mubr.msk.f32.mxu1 %vm13311_vm1, %v13310_v9 }
0x2ef4   :  { %v13249_v29 = vpop.eup %13248  ;;  %12613 = vmatpush3.bf16.xpose.msk.msra.mxu1 %vm13721_vm5, %v12611_v45 }
0x2ef5   :  { %v7774_v23 = vmul.f32 %v13249_v29, %v13245_v1  ;;  %12618 = vmatprep.subr.bf16.mxu1 %v13327_v6 }
0x2ef7   :  { %12385 = vmatmul.mubr.msk.f32.vlgmr.msra.gmra.mrb[96].mxu0 %vm1503_vm4, %v7774_v23 }
0x2ef8   :  { %12617 = vmatpush3.bf16.xpose.msk.msra.mxu0 %vm13721_vm5, %v12615_v50  ;;  %12398 = vmatprep.mubr.msk.f32.mxu0 %vm13311_vm1, %v13310_v9 }
0x2ef9   :  { %12621 = vmatprep.subr.bf16.mxu0 %v13327_v6 }
0x2efb   :  { %12392 = vmatmul.mubr.msk.f32.vlgmr.msra.gmra.mrb[100].mxu1 %vm161_vm2, %v7934_v53 }
0x2efc   :  { %12405 = vmatprep.mubr.msk.f32.mxu1 %vm13311_vm1, %v13310_v9 }
0x2eff   :  { %12399 = vmatmul.mubr.msk.f32.vlgmr.msra.gmra.mrb[98].mxu0 %vm161_vm2, %v8016_v14 }
0x2f00   :  { %12412 = vmatprep.mubr.msk.f32.mxu0 %vm13311_vm1, %v13310_v9 }
0x2fc3   :  { %v15032_v55 = vpop.f32.mrb[98].mxu1 }
0x2fc4   :  { %v12379_v57 = vpop.f32.mrb[99].mxu1 }
0x2fca   :  { %v15034_v25 = vpop.f32.mrb[96].mxu0 }
0x2fcb   :  { %v12386_v44 = vpop.f32.mrb[97].mxu0 }
0x2fce   :  { %v8011_v31 = vpop.f32.mrb[100].mxu1 }
0x2fcf   :  { %v8012_v27 = vadd.f32 %v14950_v11, %v8011_v31  ;;  %v12393_v61 = vpop.f32.mrb[101].mxu1 }
0x2fd1   :  { %v8097_v62 = vsel %vm1503_vm4, %v8012_v27, -inf }
0x2fd2   :  { %v8093_v63 = vpop.f32.mrb[98].mxu0  ;;  %8098 = vmax.xlane.f32.xlu1 %v8097_v62 }
0x2fd3   :  { %v8094_v15 = vadd.f32 %v14950_v11, %v8093_v63  ;;  %v12400_v38 = vpop.f32.mrb[99].mxu0 }
0x2fd5   :  { %v8100_v35 = vsel %vm1503_vm4, %v8094_v15, -inf }
0x2fd6   :  { %8101 = vmax.xlane.f32.xlu0 %v8100_v35 }
0x2fe3   :  { %12832 = vrot.lane.b32.xlu1 %v14928_v30, %s13317_s18 }
0x2fe7   :  { %12837 = vrot.lane.b32.xlu1 %v14923_v21, %s15857_s5 }
0x305f   :  { %v8099_v33 = vpop.xlane.xlu1 %8098 }
0x3060   :  { %v8103_v26 = vsub.f32 %v8012_v27, %v8099_v33 }
0x3062   :  { %v8105_v56 = vmul.f32 1.442695, %v8103_v26 }
0x3063   :  { %v8102_v5 = vpop.xlane.xlu0 %8101  ;;  %v12833_v52 = vpop.permute.xlu1 %12832 }
0x3064   :  { %13250 = vpow2.f32 %v8105_v56  ;;  %v8104_v37 = vsub.f32 %v8094_v15, %v8102_v5  ;;  %v12835_v1 = vunpack.i.h.bf16 %v12833_v52  ;;  %v12834_v49 = vunpack.i.l.bf16 %v12833_v52 }
0x3066   :  { %v8107_v36 = vmul.f32 1.442695, %v8104_v37  ;;  %v12622_v59 = vpack.c.bf16 %v12835_v1, %v12834_v49 }
0x3067   :  { %v12838_v54 = vpop.permute.xlu1 %12837 }
0x3068   :  { %13252 = vpow2.f32 %v8107_v36  ;;  %12623 = vmatpush3.bf16.msra.mxu0 %v12622_v59  ;;  %v12840_v7 = vunpack.i.h.bf16 %v12838_v54  ;;  %v12839_v29 = vunpack.i.l.bf16 %v12838_v54 }
0x3069   :  { %12628 = vmatprep.subr.bf16.mxu0 %v13327_v6 }
0x306a   :  { %v12625_v14 = vpack.c.bf16 %v12840_v7, %v12839_v29 }
0x306e   :  { %v13251_v39 = vpop.eup %13250 }
0x306f   :  { %v8109_v8 = vsel %vm1503_vm4, %v13251_v39, 0.0 }
0x3070   :  { %8110 = vadd.xlane.f32.xlu0 %v8109_v8 }
0x3072   :  { %v13253_v24 = vpop.eup %13252 }
0x3073   :  { %v8112_v43 = vsel %vm1503_vm4, %v13253_v24, 0.0 }
0x3074   :  { %8113 = vadd.xlane.f32.xlu1 %v8112_v43 }
0x3085   :  { %8277 = vrot.lane.b32.xlu1 %v14933_v28, %s15857_s5 }
0x3086   :  { %12827 = vrot.lane.b32.xlu0 %v14923_v21, %s13317_s18 }
0x308a   :  { %12842 = vrot.lane.b32.xlu0 %v14928_v30, %s15857_s5 }
0x308e   :  { %8359 = vrot.lane.b32.xlu0 %v14941_v58, %s15857_s5 }
0x30fd   :  { %v8111_v46 = vpop.xlane.xlu0 %8110 }
0x30fe   :  { %13254 = vrcp.f32 %v8111_v46 }
0x3101   :  { %v8114_v34 = vpop.xlane.xlu1 %8113  ;;  %v12828_v42 = vpop.permute.xlu0 %12827 }
0x3102   :  { %13256 = vrcp.f32 %v8114_v34  ;;  %v12830_v18 = vunpack.i.h.bf16 %v12828_v42  ;;  %v12829_v4 = vunpack.i.l.bf16 %v12828_v42 }
0x3104   :  { %v12619_v45 = vpack.c.bf16 %v12830_v18, %v12829_v4 }
0x3105   :  { %v12843_v28 = vpop.permute.xlu0 %12842  ;;  %v8278_v31 = vpop.permute.xlu1 %8277 }
0x3106   :  { %12620 = vmatpush3.bf16.msra.mxu1 %v12619_v45  ;;  %v12845_v50 = vunpack.i.h.bf16 %v12843_v28  ;;  %v12844_v53 = vunpack.i.l.bf16 %v12843_v28 }
0x3107   :  { %12624 = vmatprep.subr.bf16.mxu1 %v13327_v6 }
0x3108   :  { %v13255_v51 = vpop.eup %13254  ;;  %v12629_v44 = vpack.c.bf16 %v12845_v50, %v12844_v53 }
0x3109   :  { %v8116_v23 = vmul.f32 %v13255_v51, %v13251_v39  ;;  %v8360_v27 = vpop.permute.xlu0 %8359 }
0x310b   :  { %12406 = vmatmul.mubr.msk.f32.vlgmr.msra.gmra.mrb[102].mxu1 %vm1503_vm4, %v8116_v23 }
0x310c   :  { %v13257_v58 = vpop.eup %13256  ;;  %12419 = vmatprep.mubr.msk.f32.mxu1 %vm13311_vm1, %v13310_v9 }
0x310d   :  { %v8118_v57 = vmul.f32 %v13257_v58, %v13253_v24 }
0x310f   :  { %12413 = vmatmul.mubr.msk.f32.vlgmr.msra.gmra.mrb[100].mxu0 %vm1503_vm4, %v8118_v57  ;;  %12627 = vmatpush3.bf16.xpose.msk.msra.mxu1 %vm13721_vm5, %v12625_v14 }
0x3110   :  { %12631 = vmatpush3.bf16.xpose.msk.msra.mxu0 %vm13721_vm5, %v12629_v44  ;;  %12426 = vmatprep.mubr.msk.f32.mxu0 %vm13311_vm1, %v13310_v9 }
0x3111   :  { %12635 = vmatprep.subr.bf16.mxu0 %v13327_v6  ;;  %12632 = vmatprep.subr.bf16.mxu1 %v13327_v6 }
0x3116   :  { %12420 = vmatmul.mubr.msk.f32.vlgmr.msra.gmra.mrb[104].mxu1 %vm161_vm2, %v8278_v31 }
0x3117   :  { %12427 = vmatmul.mubr.msk.f32.vlgmr.msra.gmra.mrb[102].mxu0 %vm161_vm2, %v8360_v27  ;;  %12433 = vmatprep.mubr.msk.f32.mxu1 %vm13311_vm1, %v13310_v9 }
0x3118   :  { %12440 = vmatprep.mubr.msk.f32.mxu0 %vm13311_vm1, %v13310_v9 }
0x31de   :  { %v8194_v16 = vpop.f32.mrb[102].mxu1 }
0x31df   :  { %v12407_v61 = vpop.f32.mrb[103].mxu1 }
0x31e2   :  { %v8273_v62 = vpop.f32.mrb[100].mxu0 }
0x31e3   :  { %v12414_v63 = vpop.f32.mrb[101].mxu0 }
0x31e9   :  { %v8355_v15 = vpop.f32.mrb[104].mxu1 }
0x31ea   :  { %v8437_v38 = vpop.f32.mrb[102].mxu0  ;;  %v8356_v6 = vadd.f32 %v14950_v11, %v8355_v15  ;;  %v12421_v35 = vpop.f32.mrb[105].mxu1 }
0x31eb   :  { %v8438_v33 = vadd.f32 %v14950_v11, %v8437_v38  ;;  %v12428_v26 = vpop.f32.mrb[103].mxu0 }
0x31ec   :  { %v8441_v56 = vsel %vm1503_vm4, %v8356_v6, -inf }
0x31ed   :  { %v8444_v5 = vsel %vm1503_vm4, %v8438_v33, -inf  ;;  %8442 = vmax.xlane.f32.xlu1 %v8441_v56 }
0x31ee   :  { %8445 = vmax.xlane.f32.xlu0 %v8444_v5 }
0x327a   :  { %v8443_v52 = vpop.xlane.xlu1 %8442 }
0x327b   :  { %v8446_v37 = vpop.xlane.xlu0 %8445  ;;  %v8447_v1 = vsub.f32 %v8356_v6, %v8443_v52 }
0x327c   :  { %v8448_v49 = vsub.f32 %v8438_v33, %v8446_v37 }
0x327d   :  { %v8449_v36 = vmul.f32 1.442695, %v8447_v1 }
0x327e   :  { %v8451_v59 = vmul.f32 1.442695, %v8448_v49 }
0x327f   :  { %13258 = vpow2.f32 %v8449_v36 }
0x3280   :  { %13260 = vpow2.f32 %v8451_v59 }
0x3289   :  { %v13259_v39 = vpop.eup %13258 }
0x328a   :  { %v13261_v8 = vpop.eup %13260  ;;  %v8453_v24 = vsel %vm1503_vm4, %v13259_v39, 0.0 }
0x328b   :  { %v8456_v11 = vsel %vm1503_vm4, %v13261_v8, 0.0  ;;  %8454 = vadd.xlane.f32.xlu0 %v8453_v24 }
0x328c   :  { %8457 = vadd.xlane.f32.xlu1 %v8456_v11 }
0x329d   :  { %12852 = vrot.lane.b32.xlu1 %v14928_v30, %s13320_s21 }
0x32a1   :  { %12857 = vrot.lane.b32.xlu1 %v14883_v13, %s15859_s23  ;;  %12847 = vrot.lane.b32.xlu0 %v14923_v21, %s13320_s21 }
0x32a5   :  { %8623 = vrot.lane.b32.xlu1 %v15032_v55, %s15860_s26  ;;  %12862 = vrot.lane.b32.xlu0 %v14869_v19, %s15859_s23 }
0x32a9   :  { %8631 = vrot.lane.b32.xlu1 %v8194_v16, %s15852_s0  ;;  %8625 = vrot.lane.b32.xlu0 %v15034_v25, %s15860_s26 }
0x32ad   :  { %8633 = vrot.lane.b32.xlu0 %v8273_v62, %s15852_s0 }
0x3318   :  { %v8455_v30 = vpop.xlane.xlu0 %8454 }
0x3319   :  { %v8458_v43 = vpop.xlane.xlu1 %8457  ;;  %13262 = vrcp.f32 %v8455_v30 }
0x331a   :  { %13264 = vrcp.f32 %v8458_v43 }
0x331c   :  { %v12848_v13 = vpop.permute.xlu0 %12847 }
0x331d   :  { %v12853_v54 = vpop.permute.xlu1 %12852  ;;  %v12850_v21 = vunpack.i.h.bf16 %v12848_v13  ;;  %v12849_v46 = vunpack.i.l.bf16 %v12848_v13 }
0x331e   :  { %v12855_v34 = vunpack.i.h.bf16 %v12853_v54  ;;  %v12854_v55 = vunpack.i.l.bf16 %v12853_v54  ;;  %v8785_v54 = vld [vmem:[%s15828_s11] sm:$0xff] }
0x331f   :  { %v12633_v42 = vpack.c.bf16 %v12850_v21, %v12849_v46  ;;  %v8793_v21 = vld [vmem:[%s15828_s11 + $0x40] sm:$0xff]  ;;  %v8786_v46 = vld [vmem:[%s15828_s11 + $0x8] sm:$0xff] }
0x3320   :  { %v12636_v18 = vpack.c.bf16 %v12855_v34, %v12854_v55  ;;  %v12863_v19 = vpop.permute.xlu0 %12862  ;;  %v11202_v34 = vcombine.low %v8785_v54, %v8793_v21  ;;  %v11203_v55 = vcombine.high %v8785_v54, %v8793_v21  ;;  %v8813_v54 = vld [vmem:[%s15828_s11 + $0xe0] sm:$0xff]  ;;  %v8806_v21 = vld [vmem:[%s15828_s11 + $0xa8] sm:$0xff] }
0x3321   :  { %v12858_v4 = vpop.permute.xlu1 %12857  ;;  %v12865_v45 = vunpack.i.h.bf16 %v12863_v19  ;;  %v12864_v28 = vunpack.i.l.bf16 %v12863_v19  ;;  %12634 = vmatpush3.bf16.msra.mxu1 %v12633_v42  ;;  %v8794_v42 = vld [vmem:[%s15828_s11 + $0x48] sm:$0xff] }
0x3322   :  { %v12860_v25 = vunpack.i.h.bf16 %v12858_v4  ;;  %v12859_v51 = vunpack.i.l.bf16 %v12858_v4  ;;  %12637 = vmatpush3.bf16.msra.mxu0 %v12636_v18  ;;  %v11204_v18 = vcombine.low %v8786_v46, %v8794_v42  ;;  %v11205_v19 = vcombine.high %v8786_v46, %v8794_v42  ;;  %v8801_v4 = vld [vmem:[%s15828_s11 + $0x80] sm:$0xff]  ;;  %v8814_v46 = vld [vmem:[%s15828_s11 + $0xe8] sm:$0xff] }
0x3323   :  { %v13263_v7 = vpop.eup %13262  ;;  %v12642_v53 = vpack.c.bf16 %v12865_v45, %v12864_v28  ;;  %9067 = vmatprep.subr.bf16.mxu0 %v11203_v55  ;;  %v8809_v45 = vld [vmem:[%s15828_s11 + $0xc0] sm:$0xff]  ;;  %v8802_v28 = vld [vmem:[%s15828_s11 + $0x88] sm:$0xff] }
0x3324   :  { %v13265_v29 = vpop.eup %13264  ;;  %v8460_v23 = vmul.f32 %v13263_v7, %v13259_v39  ;;  %v12638_v50 = vpack.c.bf16 %v12860_v25, %v12859_v51  ;;  %v8626_v16 = vpop.permute.xlu0 %8625  ;;  %v11219_v25 = vcombine.high %v8801_v4, %v8809_v45  ;;  %v11218_v51 = vcombine.low %v8801_v4, %v8809_v45  ;;  %v8799_v4 = vld [vmem:[%s15828_s11 + $0x70] sm:$0xff]  ;;  %v8792_v45 = vld [vmem:[%s15828_s11 + $0x38] sm:$0xff] }
0x3325   :  { %v8462_v58 = vmul.f32 %v13265_v29, %v13261_v8  ;;  %v8624_v27 = vpop.permute.xlu1 %8623  ;;  %v8646_v15 = vsel %vm161_vm2, %v14992_v47, %v8626_v16 }
0x3326   :  { %12434 = vmatmul.mubr.msk.f32.vlgmr.msra.gmra.mrb[106].mxu1 %vm1503_vm4, %v8460_v23  ;;  %12639 = vmatprep.subr.bf16.mxu1 %v12638_v50  ;;  %v8645_v63 = vsel %vm161_vm2, %v14990_v22, %v8624_v27  ;;  %v8787_v23 = vld [vmem:[%s15828_s11 + $0x10] sm:$0xff] }
0x3327   :  { %12441 = vmatmul.mubr.msk.f32.vlgmr.msra.gmra.mrb[104].mxu0 %vm1503_vm4, %v8462_v58  ;;  %12641 = vmatpush3.bf16.msra.mxu1 %v12638_v50  ;;  %v8795_v50 = vld [vmem:[%s15828_s11 + $0x50] sm:$0xff] }
0x3328   :  { %12643 = vmatprep.subr.bf16.mxu1 %v12642_v53  ;;  %9099 = vmatprep.mubr.f32.mxu0 %v13310_v9  ;;  %v8634_v62 = vpop.permute.xlu0 %8633  ;;  %v11207_v58 = vcombine.high %v8787_v23, %v8795_v50 }
0x3329   :  { %v8632_v61 = vpop.permute.xlu1 %8631  ;;  %v8648_v35 = vsel %vm1503_vm4, %v8646_v15, %v8634_v62  ;;  %9068 = vmatpush1.bf16.msra.mxu0 %v11202_v34 }
0x332a   :  { %v8647_v38 = vsel %vm1503_vm4, %v8645_v63, %v8632_v61  ;;  %9069 = vmatprep.subr.bf16.mxu0 %v11219_v25 }
0x332b   :  { %12645 = vmatpush3.bf16.msra.mxu1 %v12642_v53  ;;  %v8788_v53 = vld [vmem:[%s15828_s11 + $0x18] sm:$0xff] }
0x332c   :  { %9112 = vmatprep.subr.bf16.mxu1 %v11205_v19  ;;  %v8791_v19 = vld [vmem:[%s15828_s11 + $0x30] sm:$0xff] }
0x332d   :  { %9070 = vmatpush1.bf16.msra.mxu0 %v11218_v51  ;;  %v11215_v51 = vcombine.high %v8791_v19, %v8799_v4 }
0x332e   :  { %9157 = vmatprep.subr.bf16.mxu0 %v11207_v58  ;;  %v11214_v58 = vcombine.low %v8791_v19, %v8799_v4 }
0x33f9   :  { %v8538_v14 = vpop.f32.mrb[106].mxu1 }
0x33fa   :  { %v8617_v57 = vpop.f32.mrb[104].mxu0  ;;  %8639 = vrot.lane.b32.xlu1 %v8538_v14, %s15853_s4  ;;  %v12435_v44 = vpop.f32.mrb[107].mxu1  ;;  %v8796_v14 = vld [vmem:[%s15828_s11 + $0x58] sm:$0xff] }
0x33fb   :  { %8641 = vrot.lane.b32.xlu0 %v8617_v57, %s15853_s4  ;;  %v12442_v31 = vpop.f32.mrb[105].mxu0  ;;  %v11206_v57 = vcombine.low %v8787_v23, %v8795_v50  ;;  %v11208_v44 = vcombine.low %v8788_v53, %v8796_v14  ;;  %v8815_v23 = vld [vmem:[%s15828_s11 + $0xf0] sm:$0xff]  ;;  %v8808_v50 = vld [vmem:[%s15828_s11 + $0xb8] sm:$0xff] }
0x33fc   :  { %v11209_v31 = vcombine.high %v8788_v53, %v8796_v14  ;;  %v8816_v53 = vld [vmem:[%s15828_s11 + $0xf8] sm:$0xff] }
0x33fe   :  { %8663 = vrot.lane.b32.xlu1 %v14892_v0, %s15859_s23 }
0x346c   :  { %v8640_v6 = vpop.permute.xlu1 %8639 }
0x346d   :  { %v8642_v33 = vpop.permute.xlu0 %8641  ;;  %v8649_v26 = vsel %vm1506_vm3, %v8647_v38, %v8640_v6 }
0x346e   :  { %v8650_v0 = vsel %vm1506_vm3, %v8648_v35, %v8642_v33  ;;  %12451 = vmatprep.mubr.msk.f32.mxu1 %vm70_vm0, %v8649_v26  ;;  %v8803_v26 = vld [vmem:[%s15828_s11 + $0x90] sm:$0xff] }
0x346f   :  { %12452 = vmatmul.mubr.msk.f32.vlgmr.msra.gmra.mrb[108].mxu1 %vm70_vm0, %v8650_v0 }
0x3470   :  { %9144 = vmatprep.mubr.f32.mxu1 %v13310_v9  ;;  %v8664_v22 = vpop.permute.xlu1 %8663  ;;  %9113 = vmatpush1.bf16.msra.mxu1 %v11204_v18  ;;  %v11229_v18 = vcombine.high %v8806_v21, %v8814_v46 }
0x3542   :  { %v12453_v56 = vpop.f32.mrb[108].mxu1 }
0x3543   :  { %v8744_v5 = vadd.f32 %v12453_v56, %v8664_v22  ;;  %v8738_v47 = vpop.f32.mrb[109].mxu1  ;;  %v8804_v56 = vld [vmem:[%s15828_s11 + $0x98] sm:$0xff] }
0x3544   :  { %v8739_v52 = vadd.f32 %v8738_v47, %v8664_v22  ;;  %v8811_v22 = vld [vmem:[%s15828_s11 + $0xd0] sm:$0xff] }
0x3545   :  { %v8748_v37 = vadd.f32 %v8744_v5, %v14909_v10  ;;  %v8812_v5 = vld [vmem:[%s15828_s11 + $0xd8] sm:$0xff] }
0x3546   :  { %v8747_v1 = vadd.f32 %v8739_v52, %v14907_v40 }
0x3547   :  { %v8752_v49 = vsel %vm70_vm0, %v8748_v37, 0.0 }
0x3548   :  { %8753 = vadd.xlane.f32.xlu1 %v8752_v49  ;;  %v8749_v36 = vsel %vm70_vm0, %v8747_v1, 0.0  ;;  %v11225_v49 = vcombine.high %v8804_v56, %v8812_v5 }
0x3549   :  { %8750 = vadd.xlane.f32.xlu0 %v8749_v36  ;;  %v8789_v36 = vld [vmem:[%s15828_s11 + $0x20] sm:$0xff] }
0x3559   :  { %8775 = vrot.lane.b32.xlu1 %v14881_v48, %s15854_s17 }
0x35d5   :  { %v8754_v59 = vpop.xlane.xlu1 %8753 }
0x35d6   :  { %v8756_v39 = vmul.f32 0.03125, %v8754_v59  ;;  %v8751_v8 = vpop.xlane.xlu0 %8750 }
0x35d7   :  { %v8755_v24 = vmul.f32 0.03125, %v8751_v8  ;;  %v8790_v8 = vld [vmem:[%s15828_s11 + $0x28] sm:$0xff] }
0x35d8   :  { %v8758_v11 = vsub.f32 %v8748_v37, %v8756_v39  ;;  %v8797_v39 = vld [vmem:[%s15828_s11 + $0x60] sm:$0xff] }
0x35d9   :  { %v8757_v30 = vsub.f32 %v8747_v1, %v8755_v24  ;;  %v8776_v6 = vpop.permute.xlu1 %8775  ;;  %v11223_v1 = vcombine.high %v8803_v26, %v8811_v22  ;;  %v8798_v24 = vld [vmem:[%s15828_s11 + $0x68] sm:$0xff]  ;;  %v11210_v34 = vcombine.low %v8789_v36, %v8797_v39 }
0x35da   :  { %v8760_v13 = vmul.f32 %v8758_v11, %v8758_v11  ;;  %v11212_v55 = vcombine.low %v8790_v8, %v8798_v24 }
0x35db   :  { %v8759_v43 = vmul.f32 %v8757_v30, %v8757_v30 }
0x35dc   :  { %v8764_v40 = vsel %vm70_vm0, %v8760_v13, 0.0  ;;  %v11213_v13 = vcombine.high %v8790_v8, %v8798_v24  ;;  %v13016_v8 = vld [vmem:[%s15829_s12 + $0x28] sm:$0xff]  }
0x35dd   :  { %v8761_v10 = vsel %vm70_vm0, %v8759_v43, 0.0  ;;  %v13017_v24 = vld [vmem:[%s15829_s12 + $0xa8] sm:$0xff]  }
0x35de   :  { %8762 = vadd.xlane.f32.xlu0 %v8761_v10  ;;  %v11211_v10 = vcombine.high %v8789_v36, %v8797_v39  ;;  %v13013_v36 = vld [vmem:[%s15829_s12 + $0xa0] sm:$0xff]   ;;  %v13015_v39 = vld [vmem:[%s15829_s12 + $0xe8] sm:$0xff]  }
0x35e2   :  { %8765 = vadd.xlane.f32.xlu0 %v8764_v40  ;;  %v8805_v40 = vld [vmem:[%s15828_s11 + $0xa0] sm:$0xff] }
0x35e3   :  { %v11227_v42 = vcombine.high %v8805_v40, %v8813_v54  ;;  %v11226_v25 = vcombine.low %v8805_v40, %v8813_v54  ;;  %v13022_v40 = vld [vmem:[%s15829_s12 + $0x78] sm:$0xff]  }
0x35e4   :  { %v13023_v54 = vld [vmem:[%s15829_s12 + $0xf8] sm:$0xff]  }
0x35f8   :  { %8780 = vrot.lane.b32.xlu0 %v14881_v48, %s15859_s23  ;;  %v8810_v48 = vld [vmem:[%s15828_s11 + $0xc8] sm:$0xff] }
0x35f9   :  { %v11220_v7 = vcombine.low %v8802_v28, %v8810_v48  ;;  %v11221_v29 = vcombine.high %v8802_v28, %v8810_v48  ;;  %v8800_v28 = vld [vmem:[%s15828_s11 + $0x78] sm:$0xff]  ;;  %v11228_v48 = vcombine.low %v8806_v21, %v8814_v46 }
0x35fa   :  { %v11216_v14 = vcombine.low %v8792_v45, %v8800_v28  ;;  %v13024_v21 = vld [vmem:[%s15829_s12 + $0x38] sm:$0xff]  }
0x35fb   :  { %9114 = vmatprep.subr.bf16.mxu1 %v11221_v29  ;;  %v8807_v29 = vld [vmem:[%s15828_s11 + $0xb0] sm:$0xff]  ;;  %v13025_v46 = vld [vmem:[%s15829_s12 + $0xb8] sm:$0xff]  }
0x35fc   :  { %9115 = vmatpush1.bf16.msra.mxu1 %v11220_v7  ;;  %v11217_v7 = vcombine.high %v8792_v45, %v8800_v28 }
0x35fd   :  { %9202 = vmatprep.subr.bf16.mxu1 %v11209_v31  ;;  %v11230_v31 = vcombine.low %v8807_v29, %v8815_v23 }
0x366b   :  { %v8763_v27 = vpop.xlane.xlu0 %8762 }
0x366c   :  { %v8767_v16 = vmul.f32 0.03125, %v8763_v27  ;;  %v11232_v27 = vcombine.low %v8808_v50, %v8816_v53 }
0x366e   :  { %v8769_v61 = vadd.f32 1e-05, %v8767_v16  ;;  %v12994_v16 = vld [vmem:[%s15829_s12 + $0x40] sm:$0xff]  }
0x366f   :  { %v8766_v62 = vpop.xlane.xlu0 %8765 }
0x3670   :  { %13266 = vrsqrt.f32 %v8769_v61  ;;  %v8768_v63 = vmul.f32 0.03125, %v8766_v62  ;;  %v12995_v61 = vld [vmem:[%s15829_s12 + $0xc0] sm:$0xff]  }
0x3671   :  { %v12996_v62 = vld [vmem:[%s15829_s12] sm:$0xff]  }
0x3672   :  { %v8770_v15 = vadd.f32 1e-05, %v8768_v63  ;;  %v12997_v63 = vld [vmem:[%s15829_s12 + $0x80] sm:$0xff]  }
0x3673   :  { %v8781_v33 = vpop.permute.xlu0 %8780 }
0x3674   :  { %13268 = vrsqrt.f32 %v8770_v15  ;;  %v12998_v15 = vld [vmem:[%s15829_s12 + $0x48] sm:$0xff]  }
0x367a   :  { %v13267_v38 = vpop.eup %13266 }
0x367b   :  { %v8773_v35 = vmul.f32 %v13267_v38, %v8757_v30  ;;  %v11224_v30 = vcombine.low %v8804_v56, %v8812_v5  ;;  %v12999_v38 = vld [vmem:[%s15829_s12 + $0xc8] sm:$0xff]   ;;  %v13007_v56 = vld [vmem:[%s15829_s12 + $0xd8] sm:$0xff]  }
0x367c   :  { %v13008_v5 = vld [vmem:[%s15829_s12 + $0x18] sm:$0xff]  }
0x367d   :  { %v8778_v0 = vmul.f32 %v8776_v6, %v8773_v35  ;;  %v13001_v35 = vld [vmem:[%s15829_s12 + $0x88] sm:$0xff]  }
0x367e   :  { %v13269_v47 = vpop.eup %13268 }
0x367f   :  { %v8774_v52 = vmul.f32 %v13269_v47, %v8758_v11  ;;  %v15170_v37 = vadd.f32 %v8781_v33, %v8778_v0  ;;  %v11222_v11 = vcombine.low %v8803_v26, %v8811_v22  ;;  %v13004_v26 = vld [vmem:[%s15829_s12 + $0x10] sm:$0xff]   ;;  %v13006_v22 = vld [vmem:[%s15829_s12 + $0x58] sm:$0xff]  }
0x3680   :  { %v13005_v0 = vld [vmem:[%s15829_s12 + $0x90] sm:$0xff]   ;;  %v13009_v47 = vld [vmem:[%s15829_s12 + $0x98] sm:$0xff]  }
0x3681   :  { %v8779_v59 = vmul.f32 %v8776_v6, %v8774_v52  ;;  %11234 = vmatmul.mubr.msk.f32.vlgmr.msra.gmra.mrb[106].mxu0 %vm70_vm0, %v15170_v37  ;;  %11236 = vmatmul.mubr.msk.f32.vlgmr.msra.gmra.mrb[110].mxu1 %vm70_vm0, %v15170_v37  ;;  %v13000_v6 = vld [vmem:[%s15829_s12 + $0x8] sm:$0xff]   ;;  %v13010_v52 = vld [vmem:[%s15829_s12 + $0x60] sm:$0xff]  }
0x3682   :  { %9158 = vmatpush1.bf16.msra.mxu0 %v11206_v57  ;;  %9203 = vmatpush1.bf16.msra.mxu1 %v11208_v44  ;;  %v11231_v57 = vcombine.high %v8807_v29, %v8815_v23  ;;  %v11233_v44 = vcombine.high %v8808_v50, %v8816_v53 }
0x3683   :  { %v15188_v43 = vadd.f32 %v8781_v33, %v8779_v59  ;;  %9105 = vmatprep.mubr.f32.mxu0 %v13310_v9  ;;  %9150 = vmatprep.mubr.f32.mxu1 %v13310_v9  ;;  %v13002_v33 = vld [vmem:[%s15829_s12 + $0x50] sm:$0xff]   ;;  %v13014_v59 = vld [vmem:[%s15829_s12 + $0x68] sm:$0xff]  }
0x3684   :  { %9159 = vmatprep.subr.bf16.mxu0 %v11223_v1  ;;  %9204 = vmatprep.subr.bf16.mxu1 %v11225_v49  ;;  %v13011_v1 = vld [vmem:[%s15829_s12 + $0xe0] sm:$0xff]  }
0x3685   :  { %11235 = vmatmul.mubr.msk.f32.gmra.mrb[108].mxu0 %vm70_vm0, %v15188_v43  ;;  %11237 = vmatmul.mubr.msk.f32.gmra.mrb[112].mxu1 %vm70_vm0, %v15188_v43  ;;  %v13012_v49 = vld [vmem:[%s15829_s12 + $0x20] sm:$0xff]  }
0x3686   :  { %9160 = vmatpush1.bf16.msra.mxu0 %v11222_v11  ;;  %9205 = vmatpush1.bf16.msra.mxu1 %v11224_v30  ;;  %v13018_v11 = vld [vmem:[%s15829_s12 + $0x70] sm:$0xff]  }
0x3687   :  { %9189 = vmatprep.mubr.f32.mxu0 %v13310_v9  ;;  %9234 = vmatprep.mubr.f32.mxu1 %v13310_v9  ;;  %v13019_v30 = vld [vmem:[%s15829_s12 + $0xf0] sm:$0xff]  }
0x3688   :  { %9247 = vmatprep.subr.bf16.mxu0 %v11211_v10  ;;  %9292 = vmatprep.subr.bf16.mxu1 %v11213_v13  ;;  %v13020_v10 = vld [vmem:[%s15829_s12 + $0x30] sm:$0xff]  }
0x3689   :  { %11238 = vmatmul.mubr.msk.f32.vlgmr.msra.gmra.mrb[110].mxu0 %vm70_vm0, %v15170_v37  ;;  %11240 = vmatmul.mubr.msk.f32.vlgmr.msra.gmra.mrb[114].mxu1 %vm70_vm0, %v15170_v37  ;;  %v13021_v13 = vld [vmem:[%s15829_s12 + $0xb0] sm:$0xff]  }
0x368a   :  { %9248 = vmatpush1.bf16.msra.mxu0 %v11210_v34  ;;  %9293 = vmatpush1.bf16.msra.mxu1 %v11212_v55  ;;  %v13026_v34 = vld [vmem:[%s15829_s12 + $0x140] sm:$0xff]  }
0x368b   :  { %9195 = vmatprep.mubr.f32.mxu0 %v13310_v9  ;;  %9240 = vmatprep.mubr.f32.mxu1 %v13310_v9  ;;  %v13027_v55 = vld [vmem:[%s15829_s12 + $0x1c0] sm:$0xff]  }
0x368c   :  { %9249 = vmatprep.subr.bf16.mxu0 %v11227_v42  ;;  %9294 = vmatprep.subr.bf16.mxu1 %v11229_v18  ;;  %v15373_v42 = vld [vmem:[%s15830_s13] sm:$0xff] }
0x368d   :  { %11239 = vmatmul.mubr.msk.f32.gmra.mrb[112].mxu0 %vm70_vm0, %v15188_v43  ;;  %11241 = vmatmul.mubr.msk.f32.gmra.mrb[116].mxu1 %vm70_vm0, %v15188_v43  ;;  %v8824_v18 = vrot.slane %v15373_v42, %v13442_v12  ;;  %v8832_v19 = vrot.slane %v15373_v42, %v13683_v41  ;;  %v8828_v4 = vrot.slane %v15373_v42, %v13658_v32 }
0x368e   :  { %9250 = vmatpush1.bf16.msra.mxu0 %v11226_v25  ;;  %9295 = vmatpush1.bf16.msra.mxu1 %v11228_v48  ;;  %v8836_v45 = vrot.slane %v15373_v42, %v14178_v20 }
0x368f   :  { %9279 = vmatprep.mubr.f32.mxu0 %v13310_v9  ;;  %9324 = vmatprep.mubr.f32.mxu1 %v13310_v9 }
0x3690   :  { %9337 = vmatprep.subr.bf16.mxu0 %v11215_v51  ;;  %9382 = vmatprep.subr.bf16.mxu1 %v11217_v7 }
0x3691   :  { %11242 = vmatmul.mubr.msk.f32.vlgmr.msra.gmra.mrb[114].mxu0 %vm70_vm0, %v15170_v37  ;;  %11244 = vmatmul.mubr.msk.f32.vlgmr.msra.gmra.mrb[118].mxu1 %vm70_vm0, %v15170_v37 }
0x3692   :  { %9338 = vmatpush1.bf16.msra.mxu0 %v11214_v58  ;;  %9383 = vmatpush1.bf16.msra.mxu1 %v11216_v14 }
0x3693   :  { %9285 = vmatprep.mubr.f32.mxu0 %v13310_v9  ;;  %9330 = vmatprep.mubr.f32.mxu1 %v13310_v9 }
0x3694   :  { %9339 = vmatprep.subr.bf16.mxu0 %v11231_v57  ;;  %9384 = vmatprep.subr.bf16.mxu1 %v11233_v44  ;;  %v13028_v44 = vld [vmem:[%s15829_s12 + $0x100] sm:$0xff]  }
0x3695   :  { %11243 = vmatmul.mubr.msk.f32.gmra.mrb[116].mxu0 %vm70_vm0, %v15188_v43  ;;  %11245 = vmatmul.mubr.msk.f32.gmra.mrb[120].mxu1 %vm70_vm0, %v15188_v43 }
0x3696   :  { %9340 = vmatpush1.bf16.msra.mxu0 %v11230_v31  ;;  %9385 = vmatpush1.bf16.msra.mxu1 %v11232_v27  ;;  %v13029_v31 = vld [vmem:[%s15829_s12 + $0x180] sm:$0xff]   ;;  %v15391_v27 = vrot.slane %v15373_v42, %v14189_v60 }
0x3697   :  { %9369 = vmatprep.mubr.f32.mxu0 %v13310_v9  ;;  %9414 = vmatprep.mubr.f32.mxu1 %v13310_v9 }
0x3698   :  { %11778 = vmatprep.subr.bf16.mxu0 %v12994_v16  ;;  %11800 = vmatprep.subr.bf16.mxu1 %v12995_v61 }
0x3699   :  { %11246 = vmatmul.mubr.msk.f32.vlgmr.msra.gmra.mrb[118].mxu0 %vm70_vm0, %v15170_v37  ;;  %11248 = vmatmul.mubr.msk.f32.vlgmr.msra.gmra.mrb[122].mxu1 %vm70_vm0, %v15170_v37 }
0x369a   :  { %9375 = vmatprep.mubr.f32.mxu0 %v13310_v9  ;;  %9420 = vmatprep.mubr.f32.mxu1 %v13310_v9  ;;  %v13003_v9 = vld [vmem:[%s15829_s12 + $0xd0] sm:$0xff]  }
0x369b   :  { %11779 = vmatpush3.bf16.msra.mxu0 %v12996_v62  ;;  %11801 = vmatpush3.bf16.msra.mxu1 %v12997_v63 }
0x369c   :  { %11780 = vmatprep.subr.bf16.mxu0 %v12998_v15  ;;  %11802 = vmatprep.subr.bf16.mxu1 %v12999_v38 }
0x369d   :  { %11247 = vmatmul.mubr.msk.f32.gmra.mrb[120].mxu0 %vm70_vm0, %v15188_v43  ;;  %11249 = vmatmul.mubr.msk.f32.gmra.mrb[124].mxu1 %vm70_vm0, %v15188_v43 }
0x369f   :  { %11781 = vmatpush3.bf16.msra.mxu0 %v13000_v6  ;;  %11803 = vmatpush3.bf16.msra.mxu1 %v13001_v35  ;;  %v13030_v6 = vld [vmem:[%s15829_s12 + $0x148] sm:$0xff]  }
0x36a0   :  { %11782 = vmatprep.subr.bf16.mxu0 %v13002_v33  ;;  %11804 = vmatprep.subr.bf16.mxu1 %v13003_v9  ;;  %v13031_v35 = vld [vmem:[%s15829_s12 + $0x1c8] sm:$0xff]  }
0x36a3   :  { %11783 = vmatpush3.bf16.msra.mxu0 %v13004_v26  ;;  %11805 = vmatpush3.bf16.msra.mxu1 %v13005_v0  ;;  %v15401_v26 = vrot.slane %v15373_v42, %v14192_v2 }
0x36a4   :  { %11784 = vmatprep.subr.bf16.mxu0 %v13006_v22  ;;  %11806 = vmatprep.subr.bf16.mxu1 %v13007_v56 }
0x36a7   :  { %11785 = vmatpush3.bf16.msra.mxu0 %v13008_v5  ;;  %11807 = vmatpush3.bf16.msra.mxu1 %v13009_v47  ;;  %v13032_v47 = vld [vmem:[%s15829_s12 + $0x108] sm:$0xff]  }
0x36a8   :  { %11786 = vmatprep.subr.bf16.mxu0 %v13010_v52  ;;  %11808 = vmatprep.subr.bf16.mxu1 %v13011_v1  ;;  %v13033_v52 = vld [vmem:[%s15829_s12 + $0x188] sm:$0xff]  }
0x36ab   :  { %11787 = vmatpush3.bf16.msra.mxu0 %v13012_v49  ;;  %11809 = vmatpush3.bf16.msra.mxu1 %v13013_v36 }
0x36ac   :  { %11788 = vmatprep.subr.bf16.mxu0 %v13014_v59  ;;  %11810 = vmatprep.subr.bf16.mxu1 %v13015_v39  ;;  %v13034_v39 = vld [vmem:[%s15829_s12 + $0x150] sm:$0xff]  }
0x36af   :  { %11789 = vmatpush3.bf16.msra.mxu0 %v13016_v8  ;;  %11811 = vmatpush3.bf16.msra.mxu1 %v13017_v24  ;;  %v13035_v8 = vld [vmem:[%s15829_s12 + $0x1d0] sm:$0xff]  }
0x36b0   :  { %11790 = vmatprep.subr.bf16.mxu0 %v13018_v11  ;;  %11812 = vmatprep.subr.bf16.mxu1 %v13019_v30 }
0x36b3   :  { %11791 = vmatpush3.bf16.msra.mxu0 %v13020_v10  ;;  %11813 = vmatpush3.bf16.msra.mxu1 %v13021_v13 }
0x36b4   :  { %11792 = vmatprep.subr.bf16.mxu0 %v13022_v40  ;;  %11814 = vmatprep.subr.bf16.mxu1 %v13023_v54  ;;  %v13036_v54 = vld [vmem:[%s15829_s12 + $0x110] sm:$0xff]  }
0x36b7   :  { %11793 = vmatpush3.bf16.msra.mxu0 %v13024_v21  ;;  %11815 = vmatpush3.bf16.msra.mxu1 %v13025_v46  ;;  %v13037_v21 = vld [vmem:[%s15829_s12 + $0x190] sm:$0xff]  }
0x36b8   :  { %11822 = vmatprep.subr.bf16.mxu0 %v13026_v34  ;;  %11844 = vmatprep.subr.bf16.mxu1 %v13027_v55  ;;  %v13038_v55 = vld [vmem:[%s15829_s12 + $0x158] sm:$0xff]  }
0x3754   :  { %v9101_v28 = vpop.f32.mrb[106].mxu0  ;;  %v9146_v25 = vpop.f32.mrb[110].mxu1 }
0x3755   :  { %v9102_v48 = vadd.f32 %v9101_v28, %v8824_v18  ;;  %v9147_v51 = vadd.f32 %v9146_v25, %v8832_v19  ;;  %v9103_v7 = vpop.f32.mrb[107].mxu0  ;;  %v9148_v29 = vpop.f32.mrb[111].mxu1  ;;  %v13041_v28 = vld [vmem:[%s15829_s12 + $0x198] sm:$0xff]  }
0x3756   :  { %v9104_v23 = vadd.f32 %v9103_v7, %v8828_v4  ;;  %v9149_v50 = vadd.f32 %v9148_v29, %v8836_v45  ;;  %v13043_v7 = vld [vmem:[%s15829_s12 + $0x1e0] sm:$0xff]  }
0x3757   :  { %v9427_v16 = vmax.f32 %v9102_v48, 0.0  ;;  %v9429_v61 = vmax.f32 %v9147_v51, 0.0  ;;  %v13042_v51 = vld [vmem:[%s15829_s12 + $0x160] sm:$0xff]  }
0x3758   :  { %v9428_v53 = vmax.f32 %v9104_v23, 0.0  ;;  %v9430_v58 = vmax.f32 %v9149_v50, 0.0  ;;  %v9107_v14 = vpop.f32.mrb[108].mxu0  ;;  %v9152_v57 = vpop.f32.mrb[112].mxu1  ;;  %v13044_v50 = vld [vmem:[%s15829_s12 + $0x120] sm:$0xff]  }
0x3759   :  { %v9108_v62 = vadd.f32 %v9107_v14, %v8824_v18  ;;  %v9153_v63 = vadd.f32 %v9152_v57, %v8832_v19  ;;  %v9109_v15 = vpop.f32.mrb[109].mxu0  ;;  %v9154_v38 = vpop.f32.mrb[113].mxu1  ;;  %v13039_v18 = vld [vmem:[%s15829_s12 + $0x1d8] sm:$0xff]   ;;  %v13046_v57 = vld [vmem:[%s15829_s12 + $0x168] sm:$0xff]  }
0x375a   :  { %v9110_v33 = vadd.f32 %v9109_v15, %v8828_v4  ;;  %v9155_v9 = vadd.f32 %v9154_v38, %v8836_v45  ;;  %10519 = vmatprep.mubr.f32.mxu0 %v9428_v53  ;;  %10562 = vmatprep.mubr.f32.mxu1 %v9430_v58  ;;  %v13040_v45 = vld [vmem:[%s15829_s12 + $0x118] sm:$0xff]   ;;  %v13045_v53 = vld [vmem:[%s15829_s12 + $0x1a0] sm:$0xff]   ;;  %v13050_v38 = vld [vmem:[%s15829_s12 + $0x170] sm:$0xff]  }
0x375b   :  { %10520 = vmatmul.mubr.f32.vlgmr.msra.gmra.mrb[122].mxu0 %v9427_v16  ;;  %10563 = vmatmul.mubr.f32.vlgmr.msra.gmra.mrb[126].mxu1 %v9429_v61  ;;  %v9443_v1 = vmax.f32 %v9108_v62, 0.0  ;;  %v9445_v49 = vmax.f32 %v9153_v63, 0.0  ;;  %v13048_v61 = vld [vmem:[%s15829_s12 + $0x128] sm:$0xff]  }
0x375c   :  { %v9444_v0 = vmax.f32 %v9110_v33, 0.0  ;;  %v9446_v22 = vmax.f32 %v9155_v9, 0.0  ;;  %11823 = vmatpush3.bf16.msra.mxu0 %v13028_v44  ;;  %11845 = vmatpush3.bf16.msra.mxu1 %v13029_v31  ;;  %v15403_v56 = vpop.f32.mrb[110].mxu0  ;;  %v15405_v5 = vpop.f32.mrb[114].mxu1  ;;  %v13047_v44 = vld [vmem:[%s15829_s12 + $0x1e8] sm:$0xff]   ;;  %v13052_v9 = vld [vmem:[%s15829_s12 + $0x130] sm:$0xff]  }
0x375d   :  { %v9193_v36 = vpop.f32.mrb[111].mxu0  ;;  %v9238_v59 = vpop.f32.mrb[115].mxu1  ;;  %11824 = vmatprep.subr.bf16.mxu0 %v13030_v6  ;;  %11846 = vmatprep.subr.bf16.mxu1 %v13031_v35  ;;  %v13049_v62 = vld [vmem:[%s15829_s12 + $0x1a8] sm:$0xff]   ;;  %v13051_v6 = vld [vmem:[%s15829_s12 + $0x1f0] sm:$0xff]  }
0x375e   :  { %v9194_v24 = vadd.f32 %v9193_v36, %v15391_v27  ;;  %v9239_v11 = vadd.f32 %v9238_v59, %v15401_v26  ;;  %10524 = vmatprep.mubr.f32.mxu0 %v9444_v0  ;;  %10567 = vmatprep.mubr.f32.mxu1 %v9446_v22  ;;  %v13053_v0 = vld [vmem:[%s15829_s12 + $0x1b0] sm:$0xff]   ;;  %v8840_v22 = vrot.slane %v15373_v42, %v14303_v3  ;;  %v13055_v36 = vld [vmem:[%s15829_s12 + $0x1f8] sm:$0xff]   ;;  %v15528_v59 = vld [vmem:[%s15830_s13 + $0x8] sm:$0xff] }
0x375f   :  { %10525 = vmatmul.mubr.f32.gmra.mrb[124].mxu0 %v9443_v1  ;;  %10568 = vmatmul.mubr.f32.gmra.mrb[128].mxu1 %v9445_v49  ;;  %v13054_v49 = vld [vmem:[%s15829_s12 + $0x178] sm:$0xff]  }
0x3760   :  { %v9432_v30 = vmax.f32 %v9194_v24, 0.0  ;;  %v9434_v10 = vmax.f32 %v9239_v11, 0.0  ;;  %11825 = vmatpush3.bf16.msra.mxu0 %v13032_v47  ;;  %11847 = vmatpush3.bf16.msra.mxu1 %v13033_v52  ;;  %v15421_v13 = vpop.f32.mrb[112].mxu0  ;;  %v15423_v40 = vpop.f32.mrb[116].mxu1  ;;  %v8848_v47 = vrot.slane %v15373_v42, %v14306_v17  ;;  %v13056_v42 = vld [vmem:[%s15829_s12 + $0x138] sm:$0xff]   ;;  %v13058_v11 = vld [vmem:[%s15829_s12 + $0x240] sm:$0xff]  }
0x3761   :  { %v15431_v46 = vpop.f32.mrb[113].mxu0  ;;  %v15433_v34 = vpop.f32.mrb[117].mxu1  ;;  %11826 = vmatprep.subr.bf16.mxu0 %v13034_v39  ;;  %11848 = vmatprep.subr.bf16.mxu1 %v13035_v8  ;;  %v13057_v39 = vld [vmem:[%s15829_s12 + $0x1b8] sm:$0xff]   ;;  %v9192_v8 = vadd.f32 %v15403_v56, %v8840_v22  ;;  %v15550_v56 = vrot.slane %v15528_v59, %v13658_v32  ;;  %v13061_v32 = vld [vmem:[%s15829_s12 + $0x280] sm:$0xff]  }
0x3762   :  { %10605 = vmatprep.mubr.f32.mxu0 %v9432_v30  ;;  %10648 = vmatprep.mubr.f32.mxu1 %v9434_v10  ;;  %v9237_v24 = vadd.f32 %v15405_v5, %v8848_v47  ;;  %v13059_v30 = vld [vmem:[%s15829_s12 + $0x2c0] sm:$0xff]   ;;  %v9200_v10 = vadd.f32 %v15431_v46, %v15391_v27  ;;  %v15554_v5 = vrot.slane %v15528_v59, %v14178_v20 }
0x3763   :  { %v13060_v27 = vld [vmem:[%s15829_s12 + $0x200] sm:$0xff]  }
0x3764   :  { %11827 = vmatpush3.bf16.msra.mxu0 %v13036_v54  ;;  %11849 = vmatpush3.bf16.msra.mxu1 %v13037_v21  ;;  %v15441_v19 = vpop.f32.mrb[114].mxu0  ;;  %v15443_v4 = vpop.f32.mrb[118].mxu1  ;;  %v9245_v54 = vadd.f32 %v15433_v34, %v15401_v26  ;;  %v9431_v21 = vmax.f32 %v9192_v8, 0.0  ;;  %v9448_v26 = vmax.f32 %v9200_v10, 0.0  ;;  %v13080_v8 = vld [vmem:[%s15829_s12 + $0x228] sm:$0xff]   ;;  %v13084_v10 = vld [vmem:[%s15829_s12 + $0x230] sm:$0xff]  }
0x3765   :  { %v15451_v25 = vpop.f32.mrb[115].mxu0  ;;  %v15453_v48 = vpop.f32.mrb[119].mxu1  ;;  %11828 = vmatprep.subr.bf16.mxu0 %v13038_v55  ;;  %11850 = vmatprep.subr.bf16.mxu1 %v13039_v18  ;;  %v9433_v55 = vmax.f32 %v9237_v24, 0.0  ;;  %v9198_v18 = vadd.f32 %v15421_v13, %v8840_v22  ;;  %v13074_v22 = vld [vmem:[%s15829_s12 + $0x260] sm:$0xff]   ;;  %v13081_v24 = vld [vmem:[%s15829_s12 + $0x2a8] sm:$0xff]  }
0x3766   :  { %v9450_v46 = vmax.f32 %v9245_v54, 0.0  ;;  %v9284_v34 = vadd.f32 %v15451_v25, %v15550_v56  ;;  %v9329_v13 = vadd.f32 %v15453_v48, %v15554_v5  ;;  %v13064_v25 = vld [vmem:[%s15829_s12 + $0x208] sm:$0xff]   ;;  %v13085_v54 = vld [vmem:[%s15829_s12 + $0x2b0] sm:$0xff]  }
0x3767   :  { %v13065_v48 = vld [vmem:[%s15829_s12 + $0x288] sm:$0xff]  }
0x3768   :  { %11829 = vmatpush3.bf16.msra.mxu0 %v13040_v45  ;;  %11851 = vmatpush3.bf16.msra.mxu1 %v13041_v28  ;;  %v15461_v29 = vpop.f32.mrb[116].mxu0  ;;  %v15463_v23 = vpop.f32.mrb[120].mxu1  ;;  %v9243_v45 = vadd.f32 %v15423_v40, %v8848_v47  ;;  %v13062_v40 = vld [vmem:[%s15829_s12 + $0x248] sm:$0xff]   ;;  %v13075_v47 = vld [vmem:[%s15829_s12 + $0x2e0] sm:$0xff]  }
0x3769   :  { %v15471_v58 = vpop.f32.mrb[117].mxu0  ;;  %v15473_v14 = vpop.f32.mrb[121].mxu1  ;;  %11830 = vmatprep.subr.bf16.mxu0 %v13042_v51  ;;  %11852 = vmatprep.subr.bf16.mxu1 %v13043_v7  ;;  %v13063_v28 = vld [vmem:[%s15829_s12 + $0x2c8] sm:$0xff]   ;;  %v9447_v51 = vmax.f32 %v9198_v18, 0.0  ;;  %v13086_v18 = vld [vmem:[%s15829_s12 + $0x278] sm:$0xff]  }
0x376a   :  { %v9449_v7 = vmax.f32 %v9243_v45, 0.0  ;;  %v13087_v45 = vld [vmem:[%s15829_s12 + $0x2f8] sm:$0xff]  }
0x376c   :  { %11831 = vmatpush3.bf16.msra.mxu0 %v13044_v50  ;;  %11853 = vmatpush3.bf16.msra.mxu1 %v13045_v53  ;;  %v15481_v31 = vpop.f32.mrb[118].mxu0  ;;  %v15483_v16 = vpop.f32.mrb[122].mxu1  ;;  %v9436_v50 = vmax.f32 %v9284_v34, 0.0  ;;  %v9438_v53 = vmax.f32 %v9329_v13, 0.0  ;;  %v9290_v34 = vadd.f32 %v15471_v58, %v15550_v56  ;;  %v9335_v13 = vadd.f32 %v15473_v14, %v15554_v5  ;;  %v13092_v58 = vld [vmem:[%s15829_s12 + $0x300] sm:$0xff]   ;;  %v13095_v5 = vld [vmem:[%s15829_s12 + $0x3c8] sm:$0xff]  }
0x376d   :  { %v15491_v63 = vpop.f32.mrb[119].mxu0  ;;  %v15493_v15 = vpop.f32.mrb[123].mxu1  ;;  %11832 = vmatprep.subr.bf16.mxu0 %v13046_v57  ;;  %11854 = vmatprep.subr.bf16.mxu1 %v13047_v44  ;;  %v13066_v57 = vld [vmem:[%s15829_s12 + $0x250] sm:$0xff]  }
0x376e   :  { %v13067_v44 = vld [vmem:[%s15829_s12 + $0x2d0] sm:$0xff]   ;;  %v9454_v14 = vmax.f32 %v9335_v13, 0.0 }
0x3770   :  { %11833 = vmatpush3.bf16.msra.mxu0 %v13048_v61  ;;  %11855 = vmatpush3.bf16.msra.mxu1 %v13049_v62  ;;  %v15501_v35 = vpop.f32.mrb[120].mxu0  ;;  %v15503_v33 = vpop.f32.mrb[124].mxu1  ;;  %v13068_v61 = vld [vmem:[%s15829_s12 + $0x210] sm:$0xff]  }
0x3771   :  { %v15515_v52 = vpop.f32.mrb[121].mxu0  ;;  %v15517_v1 = vpop.f32.mrb[125].mxu1  ;;  %11834 = vmatprep.subr.bf16.mxu0 %v13050_v38  ;;  %11856 = vmatprep.subr.bf16.mxu1 %v13051_v6  ;;  %v13069_v62 = vld [vmem:[%s15829_s12 + $0x290] sm:$0xff]   ;;  %v13070_v38 = vld [vmem:[%s15829_s12 + $0x258] sm:$0xff]  }
0x3772   :  { %v13071_v6 = vld [vmem:[%s15829_s12 + $0x2d8] sm:$0xff]  }
0x3774   :  { %11835 = vmatpush3.bf16.msra.mxu0 %v13052_v9  ;;  %11857 = vmatpush3.bf16.msra.mxu1 %v13053_v0  ;;  %v13072_v9 = vld [vmem:[%s15829_s12 + $0x218] sm:$0xff]  }
0x3775   :  { %11836 = vmatprep.subr.bf16.mxu0 %v13054_v49  ;;  %11858 = vmatprep.subr.bf16.mxu1 %v13055_v36  ;;  %v13073_v0 = vld [vmem:[%s15829_s12 + $0x298] sm:$0xff]   ;;  %v13076_v49 = vld [vmem:[%s15829_s12 + $0x220] sm:$0xff]  }
0x3776   :  { %v13077_v36 = vld [vmem:[%s15829_s12 + $0x2a0] sm:$0xff]  }
0x3778   :  { %11837 = vmatpush3.bf16.msra.mxu0 %v13056_v42  ;;  %11859 = vmatpush3.bf16.msra.mxu1 %v13057_v39  ;;  %v13078_v42 = vld [vmem:[%s15829_s12 + $0x268] sm:$0xff]  }
0x3779   :  { %11866 = vmatprep.subr.bf16.mxu0 %v13058_v11  ;;  %11888 = vmatprep.subr.bf16.mxu1 %v13059_v30  ;;  %v13079_v39 = vld [vmem:[%s15829_s12 + $0x2e8] sm:$0xff]   ;;  %v13082_v11 = vld [vmem:[%s15829_s12 + $0x270] sm:$0xff]  }
0x377a   :  { %v13083_v30 = vld [vmem:[%s15829_s12 + $0x2f0] sm:$0xff]  }
0x377b   :  { %10606 = vmatmul.mubr.f32.vlgmr.msra.gmra.mrb[126].mxu0 %v9431_v21  ;;  %10649 = vmatmul.mubr.f32.vlgmr.msra.gmra.mrb[130].mxu1 %v9433_v55  ;;  %v8856_v21 = vrot.slane %v15528_v59, %v13442_v12  ;;  %v8864_v55 = vrot.slane %v15528_v59, %v13683_v41  ;;  %v13089_v12 = vld [vmem:[%s15829_s12 + $0x2b8] sm:$0xff]  }
0x377c   :  { %10610 = vmatprep.mubr.f32.mxu0 %v9448_v26  ;;  %10653 = vmatprep.mubr.f32.mxu1 %v9450_v46  ;;  %v13090_v26 = vld [vmem:[%s15829_s12 + $0x340] sm:$0xff]  }
0x377d   :  { %11867 = vmatpush3.bf16.msra.mxu0 %v13060_v27  ;;  %11889 = vmatpush3.bf16.msra.mxu1 %v13061_v32  ;;  %v13088_v27 = vld [vmem:[%s15829_s12 + $0x238] sm:$0xff]   ;;  %v9282_v41 = vadd.f32 %v15441_v19, %v8856_v21  ;;  %v9327_v32 = vadd.f32 %v15443_v4, %v8864_v55  ;;  %v13091_v46 = vld [vmem:[%s15829_s12 + $0x3c0] sm:$0xff]   ;;  %v15670_v19 = vrot.slane %v15528_v59, %v14189_v60 }
0x377e   :  { %11868 = vmatprep.subr.bf16.mxu0 %v13062_v40  ;;  %11890 = vmatprep.subr.bf16.mxu1 %v13063_v28  ;;  %v15674_v4 = vrot.slane %v15528_v59, %v14192_v2  ;;  %v13093_v60 = vld [vmem:[%s15829_s12 + $0x380] sm:$0xff]   ;;  %v9452_v2 = vmax.f32 %v9290_v34, 0.0 }
0x377f   :  { %10611 = vmatmul.mubr.f32.gmra.mrb[128].mxu0 %v9447_v51  ;;  %10654 = vmatmul.mubr.f32.gmra.mrb[132].mxu1 %v9449_v7  ;;  %v9435_v40 = vmax.f32 %v9282_v41, 0.0  ;;  %v9437_v28 = vmax.f32 %v9327_v32, 0.0  ;;  %v9288_v51 = vadd.f32 %v15461_v29, %v8856_v21  ;;  %v9333_v7 = vadd.f32 %v15463_v23, %v8864_v55  ;;  %v13094_v23 = vld [vmem:[%s15829_s12 + $0x348] sm:$0xff]  }
0x3780   :  { %10691 = vmatprep.mubr.f32.mxu0 %v9436_v50  ;;  %10734 = vmatprep.mubr.f32.mxu1 %v9438_v53  ;;  %v9374_v56 = vadd.f32 %v15491_v63, %v15670_v19  ;;  %v9419_v29 = vadd.f32 %v15493_v15, %v15674_v4  ;;  %v13096_v63 = vld [vmem:[%s15829_s12 + $0x308] sm:$0xff]   ;;  %v8872_v21 = vrot.slane %v15528_v59, %v14303_v3  ;;  %v13121_v3 = vld [vmem:[%s15829_s12 + $0x3b8] sm:$0xff]  }
0x3781   :  { %11869 = vmatpush3.bf16.msra.mxu0 %v13064_v25  ;;  %11891 = vmatpush3.bf16.msra.mxu1 %v13065_v48  ;;  %v9451_v25 = vmax.f32 %v9288_v51, 0.0  ;;  %v9453_v48 = vmax.f32 %v9333_v7, 0.0  ;;  %v13097_v15 = vld [vmem:[%s15829_s12 + $0x388] sm:$0xff]   ;;  %v8880_v55 = vrot.slane %v15528_v59, %v14306_v17  ;;  %v9425_v41 = vadd.f32 %v15517_v1, %v15674_v4 }
0x3782   :  { %11870 = vmatprep.subr.bf16.mxu0 %v13066_v57  ;;  %11892 = vmatprep.subr.bf16.mxu1 %v13067_v44  ;;  %v9440_v50 = vmax.f32 %v9374_v56, 0.0  ;;  %v9442_v53 = vmax.f32 %v9419_v29, 0.0  ;;  %v13098_v57 = vld [vmem:[%s15829_s12 + $0x350] sm:$0xff]   ;;  %v9372_v17 = vadd.f32 %v15481_v31, %v8872_v21 }
0x3783   :  { %v13099_v44 = vld [vmem:[%s15829_s12 + $0x3d0] sm:$0xff]   ;;  %v9417_v59 = vadd.f32 %v15483_v16, %v8880_v55  ;;  %v9423_v34 = vadd.f32 %v15503_v33, %v8880_v55  ;;  %v9458_v31 = vmax.f32 %v9425_v41, 0.0 }
0x3784   :  { %v9439_v32 = vmax.f32 %v9372_v17, 0.0 }
0x3785   :  { %11871 = vmatpush3.bf16.msra.mxu0 %v13068_v61  ;;  %11893 = vmatpush3.bf16.msra.mxu1 %v13069_v62  ;;  %v13100_v61 = vld [vmem:[%s15829_s12 + $0x310] sm:$0xff]  }
0x3786   :  { %11872 = vmatprep.subr.bf16.mxu0 %v13070_v38  ;;  %11894 = vmatprep.subr.bf16.mxu1 %v13071_v6  ;;  %v13101_v62 = vld [vmem:[%s15829_s12 + $0x390] sm:$0xff]   ;;  %v13102_v38 = vld [vmem:[%s15829_s12 + $0x358] sm:$0xff]  }
0x3787   :  { %v13103_v6 = vld [vmem:[%s15829_s12 + $0x3d8] sm:$0xff]  }
0x3789   :  { %11873 = vmatpush3.bf16.msra.mxu0 %v13072_v9  ;;  %11895 = vmatpush3.bf16.msra.mxu1 %v13073_v0  ;;  %v13104_v9 = vld [vmem:[%s15829_s12 + $0x318] sm:$0xff]  }
0x378a   :  { %11874 = vmatprep.subr.bf16.mxu0 %v13074_v22  ;;  %11896 = vmatprep.subr.bf16.mxu1 %v13075_v47  ;;  %v13105_v0 = vld [vmem:[%s15829_s12 + $0x398] sm:$0xff]   ;;  %v13106_v22 = vld [vmem:[%s15829_s12 + $0x360] sm:$0xff]  }
0x378b   :  { %v13107_v47 = vld [vmem:[%s15829_s12 + $0x3e0] sm:$0xff]  }
0x378d   :  { %11875 = vmatpush3.bf16.msra.mxu0 %v13076_v49  ;;  %11897 = vmatpush3.bf16.msra.mxu1 %v13077_v36  ;;  %v13108_v49 = vld [vmem:[%s15829_s12 + $0x320] sm:$0xff]  }
0x378e   :  { %11876 = vmatprep.subr.bf16.mxu0 %v13078_v42  ;;  %11898 = vmatprep.subr.bf16.mxu1 %v13079_v39  ;;  %v13109_v36 = vld [vmem:[%s15829_s12 + $0x3a0] sm:$0xff]   ;;  %v13110_v42 = vld [vmem:[%s15829_s12 + $0x368] sm:$0xff]  }
0x378f   :  { %v13111_v39 = vld [vmem:[%s15829_s12 + $0x3e8] sm:$0xff]  }
0x3791   :  { %11877 = vmatpush3.bf16.msra.mxu0 %v13080_v8  ;;  %11899 = vmatpush3.bf16.msra.mxu1 %v13081_v24  ;;  %v13112_v8 = vld [vmem:[%s15829_s12 + $0x328] sm:$0xff]  }
0x3792   :  { %11878 = vmatprep.subr.bf16.mxu0 %v13082_v11  ;;  %11900 = vmatprep.subr.bf16.mxu1 %v13083_v30  ;;  %v13113_v24 = vld [vmem:[%s15829_s12 + $0x3a8] sm:$0xff]   ;;  %v13114_v11 = vld [vmem:[%s15829_s12 + $0x370] sm:$0xff]  }
0x3793   :  { %v13115_v30 = vld [vmem:[%s15829_s12 + $0x3f0] sm:$0xff]  }
0x3795   :  { %11879 = vmatpush3.bf16.msra.mxu0 %v13084_v10  ;;  %11901 = vmatpush3.bf16.msra.mxu1 %v13085_v54  ;;  %v13116_v10 = vld [vmem:[%s15829_s12 + $0x330] sm:$0xff]  }
0x3796   :  { %11880 = vmatprep.subr.bf16.mxu0 %v13086_v18  ;;  %11902 = vmatprep.subr.bf16.mxu1 %v13087_v45  ;;  %v13117_v54 = vld [vmem:[%s15829_s12 + $0x3b0] sm:$0xff]   ;;  %v13118_v18 = vld [vmem:[%s15829_s12 + $0x378] sm:$0xff]  }
0x3797   :  { %v13119_v45 = vld [vmem:[%s15829_s12 + $0x3f8] sm:$0xff]  }
0x3799   :  { %11881 = vmatpush3.bf16.msra.mxu0 %v13088_v27  ;;  %11903 = vmatpush3.bf16.msra.mxu1 %v13089_v12  ;;  %v13120_v27 = vld [vmem:[%s15829_s12 + $0x338] sm:$0xff]   ;;  %v9380_v12 = vadd.f32 %v15515_v52, %v15670_v19  ;;  %v13285_v19 = vld [vmem:[%s15827_s10] sm:$0xff]  ;;  %s13328_s10 = smov [#allocation2]  }
0x379a   :  { %11910 = vmatprep.subr.bf16.mxu0 %v13090_v26  ;;  %11932 = vmatprep.subr.bf16.mxu1 %v13091_v46  ;;  %v9441_v26 = vmax.f32 %v9417_v59, 0.0  ;;  %v9378_v46 = vadd.f32 %v15501_v35, %v8872_v21  ;;  %v15788_v35 = vrot.slane %v13285_v19, %v14178_v20 }
0x379b   :  { %v9456_v13 = vmax.f32 %v9380_v12, 0.0 }
0x379c   :  { %10692 = vmatmul.mubr.f32.vlgmr.msra.gmra.mrb[130].mxu0 %v9435_v40  ;;  %10735 = vmatmul.mubr.f32.vlgmr.msra.gmra.mrb[134].mxu1 %v9437_v28  ;;  %v9455_v16 = vmax.f32 %v9378_v46, 0.0  ;;  %v9457_v40 = vmax.f32 %v9423_v34, 0.0 }
0x379d   :  { %10696 = vmatprep.mubr.f32.mxu0 %v9452_v2  ;;  %10739 = vmatprep.mubr.f32.mxu1 %v9454_v14 }
0x379e   :  { %11911 = vmatpush3.bf16.msra.mxu0 %v13092_v58  ;;  %11933 = vmatpush3.bf16.msra.mxu1 %v13093_v60 }
0x379f   :  { %11912 = vmatprep.subr.bf16.mxu0 %v13094_v23  ;;  %11934 = vmatprep.subr.bf16.mxu1 %v13095_v5 }
0x37a0   :  { %10697 = vmatmul.mubr.f32.gmra.mrb[132].mxu0 %v9451_v25  ;;  %10740 = vmatmul.mubr.f32.gmra.mrb[136].mxu1 %v9453_v48 }
0x37a1   :  { %10777 = vmatprep.mubr.f32.mxu0 %v9440_v50  ;;  %10820 = vmatprep.mubr.f32.mxu1 %v9442_v53 }
0x37a2   :  { %11913 = vmatpush3.bf16.msra.mxu0 %v13096_v63  ;;  %11935 = vmatpush3.bf16.msra.mxu1 %v13097_v15 }
0x37a3   :  { %11914 = vmatprep.subr.bf16.mxu0 %v13098_v57  ;;  %11936 = vmatprep.subr.bf16.mxu1 %v13099_v44 }
0x37a6   :  { %11915 = vmatpush3.bf16.msra.mxu0 %v13100_v61  ;;  %11937 = vmatpush3.bf16.msra.mxu1 %v13101_v62 }
0x37a7   :  { %11916 = vmatprep.subr.bf16.mxu0 %v13102_v38  ;;  %11938 = vmatprep.subr.bf16.mxu1 %v13103_v6 }
0x37aa   :  { %11917 = vmatpush3.bf16.msra.mxu0 %v13104_v9  ;;  %11939 = vmatpush3.bf16.msra.mxu1 %v13105_v0 }
0x37ab   :  { %11918 = vmatprep.subr.bf16.mxu0 %v13106_v22  ;;  %11940 = vmatprep.subr.bf16.mxu1 %v13107_v47 }
0x37ae   :  { %11919 = vmatpush3.bf16.msra.mxu0 %v13108_v49  ;;  %11941 = vmatpush3.bf16.msra.mxu1 %v13109_v36 }
0x37af   :  { %11920 = vmatprep.subr.bf16.mxu0 %v13110_v42  ;;  %11942 = vmatprep.subr.bf16.mxu1 %v13111_v39 }
0x37b2   :  { %11921 = vmatpush3.bf16.msra.mxu0 %v13112_v8  ;;  %11943 = vmatpush3.bf16.msra.mxu1 %v13113_v24 }
0x37b3   :  { %11922 = vmatprep.subr.bf16.mxu0 %v13114_v11  ;;  %11944 = vmatprep.subr.bf16.mxu1 %v13115_v30 }
0x37b6   :  { %11923 = vmatpush3.bf16.msra.mxu0 %v13116_v10  ;;  %11945 = vmatpush3.bf16.msra.mxu1 %v13117_v54 }
0x37b7   :  { %11924 = vmatprep.subr.bf16.mxu0 %v13118_v18  ;;  %11946 = vmatprep.subr.bf16.mxu1 %v13119_v45 }
0x37ba   :  { %11925 = vmatpush3.bf16.msra.mxu0 %v13120_v27  ;;  %11947 = vmatpush3.bf16.msra.mxu1 %v13121_v3 }
0x37bd   :  { %10778 = vmatmul.mubr.f32.vlgmr.msra.gmra.mrb[134].mxu0 %v9439_v32  ;;  %10821 = vmatmul.mubr.f32.vlgmr.msra.gmra.mrb[138].mxu1 %v9441_v26 }
0x37be   :  { %10782 = vmatprep.mubr.f32.mxu0 %v9456_v13  ;;  %10825 = vmatprep.mubr.f32.mxu1 %v9458_v31 }
0x37c1   :  { %10783 = vmatmul.mubr.f32.gmra.mrb[136].mxu0 %v9455_v16  ;;  %10826 = vmatmul.mubr.f32.gmra.mrb[140].mxu1 %v9457_v40 }
0x382e   :  { %v11794_v52 = vpop.f32.mrb[122].mxu0  ;;  %v11816_v1 = vpop.f32.mrb[126].mxu1 }
0x382f   :  { %v11795_v33 = vpop.f32.mrb[123].mxu0  ;;  %v11817_v4 = vpop.f32.mrb[127].mxu1 }
0x3830   :  { %v11796_v28 = vadd.f32 %v11795_v33, %v11794_v52  ;;  %v11818_v51 = vadd.f32 %v11817_v4, %v11816_v1 }
0x3832   :  { %v10522_v7 = vadd.f32 %v11796_v28, %v15788_v35  ;;  %v11797_v58 = vpop.f32.mrb[124].mxu0  ;;  %v11819_v60 = vpop.f32.mrb[128].mxu1 }
0x3833   :  { %v11798_v2 = vpop.f32.mrb[125].mxu0  ;;  %v11820_v14 = vpop.f32.mrb[129].mxu1 }
0x3834   :  { %v10565_v56 = vadd.f32 %v11818_v51, %v10522_v7  ;;  %v11799_v29 = vadd.f32 %v11798_v2, %v11797_v58  ;;  %v11821_v23 = vadd.f32 %v11820_v14, %v11819_v60 }
0x3836   :  { %v10527_v5 = vadd.f32 %v11799_v29, %v15788_v35 }
0x3838   :  { %v10570_v25 = vadd.f32 %v11821_v23, %v10527_v5 }
0x384e   :  { %v11838_v48 = vpop.f32.mrb[126].mxu0  ;;  %v11860_v63 = vpop.f32.mrb[130].mxu1 }
0x384f   :  { %v11839_v20 = vpop.f32.mrb[127].mxu0  ;;  %v11861_v15 = vpop.f32.mrb[131].mxu1 }
0x3850   :  { %v11840_v50 = vadd.f32 %v11839_v20, %v11838_v48  ;;  %v11862_v53 = vadd.f32 %v11861_v15, %v11860_v63 }
0x3852   :  { %v10608_v57 = vadd.f32 %v11840_v50, %v10565_v56  ;;  %v11841_v44 = vpop.f32.mrb[128].mxu0  ;;  %v11863_v61 = vpop.f32.mrb[132].mxu1 }
0x3853   :  { %v11842_v62 = vpop.f32.mrb[129].mxu0  ;;  %v11864_v38 = vpop.f32.mrb[133].mxu1 }
0x3854   :  { %v10651_v6 = vadd.f32 %v11862_v53, %v10608_v57  ;;  %v11843_v9 = vadd.f32 %v11842_v62, %v11841_v44  ;;  %v11865_v0 = vadd.f32 %v11864_v38, %v11863_v61 }
0x3856   :  { %v10613_v22 = vadd.f32 %v11843_v9, %v10570_v25 }
0x3858   :  { %v10656_v47 = vadd.f32 %v11865_v0, %v10613_v22 }
0x386f   :  { %v11882_v49 = vpop.f32.mrb[130].mxu0  ;;  %v11904_v36 = vpop.f32.mrb[134].mxu1 }
0x3870   :  { %v11883_v42 = vpop.f32.mrb[131].mxu0  ;;  %v11905_v39 = vpop.f32.mrb[135].mxu1 }
0x3871   :  { %v11884_v8 = vadd.f32 %v11883_v42, %v11882_v49  ;;  %v11906_v24 = vadd.f32 %v11905_v39, %v11904_v36 }
0x3873   :  { %v10694_v11 = vadd.f32 %v11884_v8, %v10651_v6  ;;  %v11885_v30 = vpop.f32.mrb[132].mxu0  ;;  %v11907_v10 = vpop.f32.mrb[136].mxu1 }
0x3874   :  { %v11886_v54 = vpop.f32.mrb[133].mxu0  ;;  %v11908_v21 = vpop.f32.mrb[137].mxu1 }
0x3875   :  { %v10737_v55 = vadd.f32 %v11906_v24, %v10694_v11  ;;  %v11887_v18 = vadd.f32 %v11886_v54, %v11885_v30  ;;  %v11909_v45 = vadd.f32 %v11908_v21, %v11907_v10 }
0x3877   :  { %v10699_v27 = vadd.f32 %v11887_v18, %v10656_v47 }
0x3879   :  { %v10742_v3 = vadd.f32 %v11909_v45, %v10699_v27 }
0x3890   :  { %v11926_v17 = vpop.f32.mrb[134].mxu0  ;;  %v11948_v59 = vpop.f32.mrb[138].mxu1 }
0x3891   :  { %v11927_v12 = vpop.f32.mrb[135].mxu0  ;;  %v11949_v41 = vpop.f32.mrb[139].mxu1 }
0x3892   :  { %v11928_v32 = vadd.f32 %v11927_v12, %v11926_v17  ;;  %v11950_v26 = vadd.f32 %v11949_v41, %v11948_v59 }
0x3894   :  { %v10780_v46 = vadd.f32 %v11928_v32, %v10737_v55  ;;  %v11929_v34 = vpop.f32.mrb[136].mxu0  ;;  %v11951_v13 = vpop.f32.mrb[140].mxu1 }
0x3895   :  { %v11930_v31 = vpop.f32.mrb[137].mxu0  ;;  %v11952_v16 = vpop.f32.mrb[141].mxu1 }
0x3896   :  { %v10823_v40 = vadd.f32 %v11950_v26, %v10780_v46  ;;  %v11931_v52 = vadd.f32 %v11930_v31, %v11929_v34  ;;  %v11953_v1 = vadd.f32 %v11952_v16, %v11951_v13 }
0x3898   :  { %v10785_v19 = vadd.f32 %v11931_v52, %v10742_v3  ;;  %v10831_v33 = vadd.f32 %v10823_v40, %v15170_v37 }
0x389a   :  { %v10828_v4 = vadd.f32 %v11953_v1, %v10785_v19  ;;  %v10833_v28 = vsel %vm70_vm0, %v10831_v33, 0.0 }
0x389b   :  { %10834 = vadd.xlane.f32.xlu1 %v10833_v28 }
0x389c   :  { %v10832_v51 = vadd.f32 %v10828_v4, %v15188_v43 }
0x389e   :  { %v10836_v7 = vsel %vm70_vm0, %v10832_v51, 0.0 }
0x389f   :  { %10837 = vadd.xlane.f32.xlu0 %v10836_v7 }
0x3928   :  { %v10835_v58 = vpop.xlane.xlu1 %10834 }
0x3929   :  { %v10839_v60 = vmul.f32 0.03125, %v10835_v58 }
0x392b   :  { %v10841_v2 = vsub.f32 %v10831_v33, %v10839_v60 }
0x392c   :  { %v10838_v14 = vpop.xlane.xlu0 %10837 }
0x392d   :  { %v10840_v56 = vmul.f32 0.03125, %v10838_v14  ;;  %v10843_v29 = vmul.f32 %v10841_v2, %v10841_v2 }
0x392f   :  { %v10842_v23 = vsub.f32 %v10832_v51, %v10840_v56  ;;  %v10845_v5 = vsel %vm70_vm0, %v10843_v29, 0.0 }
0x3930   :  { %10846 = vadd.xlane.f32.xlu1 %v10845_v5 }
0x3931   :  { %v10844_v37 = vmul.f32 %v10842_v23, %v10842_v23 }
0x3933   :  { %v10848_v25 = vsel %vm70_vm0, %v10844_v37, 0.0 }
0x3934   :  { %10849 = vadd.xlane.f32.xlu0 %v10848_v25 }
0x3941   :  { %10860 = vrot.lane.b32.xlu1 %v15788_v35, %s13312_s27  ;;  %s10877_s27 = sshll.u32 %s13328_s10, 4  ;;  %s10878_s27 = int_to_ptr.vmem [resolvable:$true] %s10877_s27 }
0x3942   :  { %p13291_p1 = scmp.lt.s32.totalorder %s10878_s27, %s10878_s27 }
0x394a   :  { %10865 = vrot.lane.b32.xlu0 %v15788_v35, %s15854_s17  ;;  %s13286_s17 = scalar_lea.vmem %s10878_s27, 256 }
0x394b   :  { %p13287_p0 = scmp.ne.s32.totalorder %s10878_s27, %s13286_s17  ;;  %p13292_p2 = scmp.lt.s32.totalorder %s13286_s17, %s13286_s17 }
0x394d   :  { %p13293_p3 = por %p13292_p2, %p13291_p1 }
0x394f   :  { %p13294_p4 = pnand %p13293_p3, %p13287_p0 }
0x39bd   :  { %v10847_v43 = vpop.xlane.xlu1 %10846 }
0x39be   :  { %v10851_v48 = vmul.f32 0.03125, %v10847_v43 }
0x39c0   :  { %v10853_v63 = vadd.f32 1e-05, %v10851_v48 }
0x39c1   :  { %v10850_v20 = vpop.xlane.xlu0 %10849  ;;  %v10861_v57 = vpop.permute.xlu1 %10860 }
0x39c2   :  { %13270 = vrsqrt.f32 %v10853_v63  ;;  %v10852_v15 = vmul.f32 0.03125, %v10850_v20 }
0x39c4   :  { %v10854_v50 = vadd.f32 1e-05, %v10852_v15 }
0x39c5   :  { %v10866_v61 = vpop.permute.xlu0 %10865 }
0x39c6   :  { %13272 = vrsqrt.f32 %v10854_v50 }
0x39cc   :  { %v13271_v53 = vpop.eup %13270 }
0x39cd   :  { %v10857_v44 = vmul.f32 %v13271_v53, %v10841_v2 }
0x39cf   :  { %v10863_v62 = vmul.f32 %v10861_v57, %v10857_v44 }
0x39d0   :  { %v13273_v38 = vpop.eup %13272 }
0x39d1   :  { %v10858_v6 = vmul.f32 %v13273_v38, %v10842_v23  ;;  %v10868_v9 = vadd.f32 %v10866_v61, %v10863_v62 }
0x39d3   :  { %v10864_v0 = vmul.f32 %v10861_v57, %v10858_v6  ;;  %10870 = vst.msk [vmem:[#allocation2] sm:$0xff] %vm70_vm0, %v10868_v9 }
0x39d5   :  { %v10869_v35 = vadd.f32 %v10866_v61, %v10864_v0 }
0x39d7   :  { %10871 = vst.msk [vmem:[#allocation2 + $0x8] sm:$0xff] %vm70_vm0, %v10869_v35 }
0x39d8   :  { %13297 = shalt.err (!%p13294_p4)
}
0x39d9   :  { %s13298_s7 = scalar_lea.hbm %s15831_s14, 256 }
0x39da   :  { %p13299_p5 = scmp.ne.s32.totalorder %s15831_s14, %s13298_s7  ;;  %p13302_p6 = scmp.lt.u32.totalorder %s13298_s7, %s15831_s14 }
0x39dc   :  { %p13304_p7 = pnand %p13302_p6, %p13299_p5 }
0x39de   :  { %13307 = shalt.err (!%p13304_p7)
}
0x39df   :  { %s13329_s23 = smov 128  }
0x39e0   :  { %10883 = dma.vmem_to_hbm [thread:$0]  %s10878_s27, 256, %s15831_s14, [#allocation3], %s13329_s23, %s13329_s23, %s15860_s26  }
0x39e1   :  { %13308 = dma.done.wait [#allocation3], 256  }
0x39e2   :  { %13309 = vsyncadd [#allocation3], 4294967040 }
0x39e3   :  { %10887 = vsyncpa [#allocation3], 1 }

</bundles_post_ra>
